<compile_context>
chip_gen: v5e
topology: v5e:2x2
jax: 0.10.0
libtpu: 0.0.40
codegen_flags: <defaults>
</compile_context>

<pallas_src>
import functools

import jax
import jax.numpy as jnp
from jax.experimental import pallas as pl
from jax.experimental.pallas import tpu as pltpu

LN_EPS = 1e-5
_INV_SQRT2 = 0.7071067811865475
_SQRT_2_OVER_PI = 0.7978845608028654
_MIN_ROWS = 16  # bf16 sublane packing


def _round_up(n, m):
    return ((n + m - 1) // m) * m


def projection_head_kernel(x_ref, w1_ref, w2_ref, vecs_ref, o_ref, *,
                           approximate_gelu):
    # Packed per-feature vectors: rows 0..3 = b1, b2, ln_gamma, ln_beta (f32).
    b1 = vecs_ref[0:1, :]
    b2 = vecs_ref[1:2, :]
    gamma = vecs_ref[2:3, :]
    beta = vecs_ref[3:4, :]

    # ---- Linear(embedding_dim -> projection_dim): bf16 operands, f32 accumulate ----
    projected = jnp.dot(x_ref[...], w1_ref[...],
                        preferred_element_type=jnp.float32) + b1

    # ---- GELU ----
    if approximate_gelu:
        # tanh approximation (nn.GELU(approximate='tanh')): single EUP push per
        # element — a VLIW slot that is otherwise idle here.
        p3 = projected * projected * projected
        h = 0.5 * projected * (
            1.0 + jnp.tanh(_SQRT_2_OVER_PI * (projected + 0.044715 * p3)))
    else:
        # exact erf form — matches nn.GELU() default semantics.
        h = 0.5 * projected * (1.0 + jax.lax.erf(projected * _INV_SQRT2))

    # ---- Linear(projection_dim -> projection_dim): downcast activations for MXU ----
    h = jnp.dot(h.astype(w2_ref.dtype), w2_ref[...],
                preferred_element_type=jnp.float32) + b2

    # ---- Dropout: inference-mode identity ----
    # TODO(synk): training-mode dropout (PRNG mask + 1/(1-p) scale) not emitted here.

    # ---- Residual add ----
    y = h + projected

    # ---- LayerNorm over last dim: one-pass stats, var = E[y^2] - mean^2 ----
    inv_p = 1.0 / y.shape[-1]
    mean = jnp.sum(y, axis=-1, keepdims=True) * inv_p
    mean_sq = jnp.sum(y * y, axis=-1, keepdims=True) * inv_p
    var = mean_sq - mean * mean
    y = (y - mean) * jax.lax.rsqrt(var + LN_EPS)
    o_ref[...] = (y * gamma + beta).astype(o_ref.dtype)


@functools.partial(jax.jit, static_argnames=("block_rows", "approximate_gelu"))
def projection_head(x, w1, w2, vecs, *, block_rows=1024, approximate_gelu=False):
    """x: (N, E).  w1: (E, P), w2: (P, P) stored (in, out) == torch W.T.
    vecs: (4, P) f32 rows = [b1; b2; ln_gamma; ln_beta].  Returns (N, P) in x.dtype."""
    N, E = x.shape
    P = w1.shape[1]

    # Row tile: large enough to amortize the ~0.35 us/step pipeline overhead, clamped
    # so the grid keeps >= 2 steps whenever N allows (keeps both v7x TCs busy), and a
    # multiple of 16 for bf16 sublane packing.  Pallas masks the ragged last block
    # (rows are independent, LayerNorm is per-row), so no pad / slice is needed.
    half = _round_up(max((N + 1) // 2, _MIN_ROWS), _MIN_ROWS)
    br = max(_MIN_ROWS, min(block_rows, half))
    grid = (pl.cdiv(N, br),)

    const = lambda i: (0, 0)
    # Grid-invariant operands: constant block index -> single buffer is enough.
    const_spec = lambda shape: pl.BlockSpec(shape, const,
                                            pipeline_mode=pl.Buffered(1))

    itemsize = lambda a: jnp.dtype(a.dtype).itemsize
    out_dtype = x.dtype

    flops = 2 * N * (E * P + P * P) + 12 * N * P
    bytes_accessed = (N * E * itemsize(x)
                      + sum(a.size * itemsize(a) for a in (w1, w2, vecs))
                      + N * P * jnp.dtype(out_dtype).itemsize)

    # VMEM budget: double-buffered activation tiles + resident weights + f32
    # intermediates + headroom; floored at the 32 MiB scoped default and capped
    # generation-aware (v5e/v6e: 128 MiB physical, v7x: 64 MiB per TC).
    need = (2 * br * E * itemsize(x)
            + 2 * br * P * jnp.dtype(out_dtype).itemsize
            + (E * P + P * P) * itemsize(w1)
            + 8 * P * 4
            + 3 * br * P * 4)
    try:
        vmem_cap = int(pltpu.get_tpu_info().vmem_capacity_bytes)
    except Exception:
        vmem_cap = 64 << 20  # conservative fallback (v7x per-TC)
    vmem_limit = min(max(int(need * 1.5) + (4 << 20), 32 << 20),
                     int(vmem_cap * 0.85))

    kernel = functools.partial(projection_head_kernel,
                               approximate_gelu=approximate_gelu)

    return pl.pallas_call(
        kernel,
        out_shape=jax.ShapeDtypeStruct((N, P), out_dtype),
        grid_spec=pltpu.PrefetchScalarGridSpec(
            num_scalar_prefetch=0,
            grid=grid,
            in_specs=[
                pl.BlockSpec((br, E), lambda i: (i, 0)),  # x row tile
                const_spec((E, P)),                       # W1 (in, out), bf16
                const_spec((P, P)),                       # W2 (in, out), bf16
                const_spec((4, P)),                       # [b1; b2; gamma; beta] f32
            ],
            out_specs=pl.BlockSpec((br, P), lambda i: (i, 0)),
        ),
        compiler_params=pltpu.CompilerParams(
            dimension_semantics=("parallel",),
            vmem_limit_bytes=vmem_limit,
        ),
        cost_estimate=pl.CostEstimate(
            flops=int(flops),
            transcendentals=int(N * P),
            bytes_accessed=int(bytes_accessed),
        ),
    )(x, w1, w2, vecs)


def init_params(key, embedding_dim, projection_dim):
    """Deterministic synthetic params (PyTorch Linear default-ish init).
    Weights shipped as bf16 (in, out) == torch W.T; biases / LN affine packed f32."""
    k1, k2, k3, k4 = jax.random.split(key, 4)
    lim1 = 1.0 / float(embedding_dim) ** 0.5
    lim2 = 1.0 / float(projection_dim) ** 0.5
    w1 = jax.random.uniform(k1, (embedding_dim, projection_dim),
                            jnp.float32, -lim1, lim1).astype(jnp.bfloat16)
    b1 = jax.random.uniform(k2, (projection_dim,), jnp.float32, -lim1, lim1)
    w2 = jax.random.uniform(k3, (projection_dim, projection_dim),
                            jnp.float32, -lim2, lim2).astype(jnp.bfloat16)
    b2 = jax.random.uniform(k4, (projection_dim,), jnp.float32, -lim2, lim2)
    gamma = jnp.ones((projection_dim,), jnp.float32)
    beta = jnp.zeros((projection_dim,), jnp.float32)
    vecs = jnp.stack([b1, b2, gamma, beta], axis=0)  # (4, P) f32
    return w1, w2, vecs


def reference(x, w1, w2, vecs, *, approximate_gelu=False):
    """Pure-f32 reference with the module's semantics (same bf16 parameter values)."""
    xf = x.astype(jnp.float32)
    w1f = w1.astype(jnp.float32)
    w2f = w2.astype(jnp.float32)
    b1, b2, gamma, beta = (vecs[i][None, :] for i in range(4))
    projected = xf @ w1f + b1
    if approximate_gelu:
        h = 0.5 * projected * (1.0 + jnp.tanh(
            _SQRT_2_OVER_PI * (projected + 0.044715 * projected ** 3)))
    else:
        h = 0.5 * projected * (1.0 + jax.lax.erf(projected * _INV_SQRT2))
    h = h @ w2f + b2
    y = h + projected
    mean = jnp.mean(y, -1, keepdims=True)
    var = jnp.mean(jnp.square(y - mean), -1, keepdims=True)
    return (y - mean) * jax.lax.rsqrt(var + LN_EPS) * gamma + beta


if __name__ == "__main__":
    embedding_dim = 32
    projection_dim = 256
    N = 200  # ragged vs. the row tile -> exercises the masked partial last block

    key = jax.random.PRNGKey(0)
    kx, kp = jax.random.split(key)
    x = jax.random.normal(kx, (N, embedding_dim), jnp.float32).astype(jnp.bfloat16)
    w1, w2, vecs = init_params(kp, embedding_dim, projection_dim)

    # Default path: exact-erf GELU — matches nn.GELU() semantics.
    out = projection_head(x, w1, w2, vecs)
    out = jax.block_until_ready(out)
    ref = reference(x, w1, w2, vecs)
    assert out.shape == (N, projection_dim)
    # Tolerance covers bf16 MXU operand rounding + bf16 output cast vs the f32 reference.
    assert jnp.allclose(out.astype(jnp.float32), ref, atol=2e-2, rtol=2e-2), (
        float(jnp.max(jnp.abs(out.astype(jnp.float32) - ref))))

    # Fast path: tanh-approx GELU on the EUP, checked against its matching reference.
    out_fast = projection_head(x, w1, w2, vecs, approximate_gelu=True)
    out_fast = jax.block_until_ready(out_fast)
    ref_fast = reference(x, w1, w2, vecs, approximate_gelu=True)
    assert jnp.allclose(out_fast.astype(jnp.float32), ref_fast,
                        atol=2e-2, rtol=2e-2), (
        float(jnp.max(jnp.abs(out_fast.astype(jnp.float32) - ref_fast))))

    print("KERNEL_OK")
</pallas_src>

<mosaic_0001>
module attributes {stable_mosaic.version = 11 : i64} {
  func.func @projection_head_kernel(%arg0: i32, %arg1: memref<112x32xbf16, #tpu.memory_space<vmem>>, %arg2: memref<32x256xbf16, #tpu.memory_space<vmem>>, %arg3: memref<256x256xbf16, #tpu.memory_space<vmem>>, %arg4: memref<4x256xf32, #tpu.memory_space<vmem>>, %arg5: memref<112x256xbf16, #tpu.memory_space<vmem>>) attributes {dimension_semantics = [#tpu.dimension_semantics<parallel>], iteration_bounds = array<i64: 2>, scalar_prefetch = 0 : i64, scratch_operands = 0 : i64, tpu.core_type = #tpu.core_type<tc>, window_params = [{transform_indices = @transform_0, window_bounds = array<i64: 112, 32>}, {pipeline_mode = #tpu.pipeline_mode<synchronous>, transform_indices = @transform_1, window_bounds = array<i64: 32, 256>}, {pipeline_mode = #tpu.pipeline_mode<synchronous>, transform_indices = @transform_2, window_bounds = array<i64: 256, 256>}, {pipeline_mode = #tpu.pipeline_mode<synchronous>, transform_indices = @transform_3, window_bounds = array<i64: 4, 256>}, {transform_indices = @transform_4, window_bounds = array<i64: 112, 256>}]} {
    %c0 = arith.constant 0 : index
    %c0_0 = arith.constant 0 : index
    %0 = vector.load %arg4[%c0, %c0_0] : memref<4x256xf32, #tpu.memory_space<vmem>>, vector<1x256xf32>
    %c1 = arith.constant 1 : index
    %c0_1 = arith.constant 0 : index
    %1 = vector.load %arg4[%c1, %c0_1] : memref<4x256xf32, #tpu.memory_space<vmem>>, vector<1x256xf32>
    %c2 = arith.constant 2 : index
    %c0_2 = arith.constant 0 : index
    %2 = vector.load %arg4[%c2, %c0_2] : memref<4x256xf32, #tpu.memory_space<vmem>>, vector<1x256xf32>
    %c3 = arith.constant 3 : index
    %c0_3 = arith.constant 0 : index
    %3 = vector.load %arg4[%c3, %c0_3] : memref<4x256xf32, #tpu.memory_space<vmem>>, vector<1x256xf32>
    %c0_4 = arith.constant 0 : index
    %c0_5 = arith.constant 0 : index
    %4 = vector.load %arg1[%c0_4, %c0_5] : memref<112x32xbf16, #tpu.memory_space<vmem>>, vector<112x32xbf16>
    %c0_6 = arith.constant 0 : index
    %c0_7 = arith.constant 0 : index
    %5 = vector.load %arg2[%c0_6, %c0_7] : memref<32x256xbf16, #tpu.memory_space<vmem>>, vector<32x256xbf16>
    %cst = arith.constant dense<0.000000e+00> : vector<112x256xf32>
    %6 = tpu.matmul %4, %5, %cst {dimension_numbers = #tpu.dot_dimension_numbers<[1], [0], [0], [1], [0, 0, 1, 1], [], []>} : vector<112x32xbf16>, vector<32x256xbf16>, vector<112x256xf32> -> vector<112x256xf32>
    %7 = vector.broadcast %0 : vector<1x256xf32> to vector<112x256xf32>
    %8 = arith.addf %6, %7 : vector<112x256xf32>
    %cst_8 = arith.constant 5.000000e-01 : f32
    %9 = vector.broadcast %cst_8 : f32 to vector<112x256xf32>
    %10 = arith.mulf %9, %8 : vector<112x256xf32>
    %cst_9 = arith.constant 0.707106769 : f32
    %11 = vector.broadcast %cst_9 : f32 to vector<112x256xf32>
    %12 = arith.mulf %8, %11 : vector<112x256xf32>
    %13 = math.erf %12 : vector<112x256xf32>
    %cst_10 = arith.constant 1.000000e+00 : f32
    %14 = vector.broadcast %cst_10 : f32 to vector<112x256xf32>
    %15 = arith.addf %14, %13 : vector<112x256xf32>
    %16 = arith.mulf %10, %15 : vector<112x256xf32>
    %17 = arith.truncf %16 : vector<112x256xf32> to vector<112x256xbf16>
    %c0_11 = arith.constant 0 : index
    %c0_12 = arith.constant 0 : index
    %18 = vector.load %arg3[%c0_11, %c0_12] : memref<256x256xbf16, #tpu.memory_space<vmem>>, vector<256x256xbf16>
    %cst_13 = arith.constant dense<0.000000e+00> : vector<112x256xf32>
    %19 = tpu.matmul %17, %18, %cst_13 {dimension_numbers = #tpu.dot_dimension_numbers<[1], [0], [0], [1], [0, 0, 1, 1], [], []>} : vector<112x256xbf16>, vector<256x256xbf16>, vector<112x256xf32> -> vector<112x256xf32>
    %20 = vector.broadcast %1 : vector<1x256xf32> to vector<112x256xf32>
    %21 = arith.addf %19, %20 : vector<112x256xf32>
    %22 = arith.addf %21, %8 : vector<112x256xf32>
    %cst_14 = arith.constant dense<0.000000e+00> : vector<112xf32>
    %23 = vector.multi_reduction <add>, %22, %cst_14 [1] : vector<112x256xf32> to vector<112xf32>
    %24 = vector.shape_cast %23 : vector<112xf32> to vector<112x1xf32>
    %cst_15 = arith.constant 3.906250e-03 : f32
    %25 = vector.broadcast %cst_15 : f32 to vector<112x1xf32>
    %26 = arith.mulf %24, %25 : vector<112x1xf32>
    %27 = arith.mulf %22, %22 : vector<112x256xf32>
    %cst_16 = arith.constant dense<0.000000e+00> : vector<112xf32>
    %28 = vector.multi_reduction <add>, %27, %cst_16 [1] : vector<112x256xf32> to vector<112xf32>
    %29 = vector.shape_cast %28 : vector<112xf32> to vector<112x1xf32>
    %cst_17 = arith.constant 3.906250e-03 : f32
    %30 = vector.broadcast %cst_17 : f32 to vector<112x1xf32>
    %31 = arith.mulf %29, %30 : vector<112x1xf32>
    %32 = arith.mulf %26, %26 : vector<112x1xf32>
    %33 = arith.subf %31, %32 : vector<112x1xf32>
    %34 = vector.broadcast %26 : vector<112x1xf32> to vector<112x256xf32>
    %35 = arith.subf %22, %34 : vector<112x256xf32>
    %cst_18 = arith.constant 9.99999974E-6 : f32
    %36 = vector.broadcast %cst_18 : f32 to vector<112x1xf32>
    %37 = arith.addf %33, %36 : vector<112x1xf32>
    %38 = math.rsqrt %37 : vector<112x1xf32>
    %39 = vector.broadcast %38 : vector<112x1xf32> to vector<112x256xf32>
    %40 = arith.mulf %35, %39 : vector<112x256xf32>
    %41 = vector.broadcast %2 : vector<1x256xf32> to vector<112x256xf32>
    %42 = arith.mulf %40, %41 : vector<112x256xf32>
    %43 = vector.broadcast %3 : vector<1x256xf32> to vector<112x256xf32>
    %44 = arith.addf %42, %43 : vector<112x256xf32>
    %45 = arith.truncf %44 : vector<112x256xf32> to vector<112x256xbf16>
    %c0_19 = arith.constant 0 : index
    %c0_20 = arith.constant 0 : index
    %46 = vector.load %arg5[%c0_19, %c0_20] : memref<112x256xbf16, #tpu.memory_space<vmem>>, vector<112x256xbf16>
    tpu.vector_store %arg5[%c0_19, %c0_20], %45 {strides = array<i32>} : memref<112x256xbf16, #tpu.memory_space<vmem>>, vector<112x256xbf16>,
    return
  }
  func.func @transform_0(%arg0: i32) -> (i32, i32) {
    %c0_i32 = arith.constant 0 : i32
    %c0_i32_0 = arith.constant 0 : i32
    return %arg0, %c0_i32 : i32, i32
  }
  func.func @transform_1(%arg0: i32) -> (i32, i32) {
    %c0_i32 = arith.constant 0 : i32
    %c0_i32_0 = arith.constant 0 : i32
    %c0_i32_1 = arith.constant 0 : i32
    return %c0_i32, %c0_i32_0 : i32, i32
  }
  func.func @transform_2(%arg0: i32) -> (i32, i32) {
    %c0_i32 = arith.constant 0 : i32
    %c0_i32_0 = arith.constant 0 : i32
    %c0_i32_1 = arith.constant 0 : i32
    return %c0_i32, %c0_i32_0 : i32, i32
  }
  func.func @transform_3(%arg0: i32) -> (i32, i32) {
    %c0_i32 = arith.constant 0 : i32
    %c0_i32_0 = arith.constant 0 : i32
    %c0_i32_1 = arith.constant 0 : i32
    return %c0_i32, %c0_i32_0 : i32, i32
  }
  func.func @transform_4(%arg0: i32) -> (i32, i32) {
    %c0_i32 = arith.constant 0 : i32
    %c0_i32_0 = arith.constant 0 : i32
    return %arg0, %c0_i32 : i32, i32
  }
}

</mosaic_0001>

<bundles_post_ra>
// kernel: projection_head.1
= control target key start
LH: loop header
LB: loop body
LE: loop exit
PB: predicated region body
PF: predicated region fallthrough
CT: control target
= control target key end

     0   :  { %9 = vsyncpa [#allocation3], 0  ;;  %s5015_s0 = inlined_call_operand.vmem [shape: bf16[200,32], index: 0, kind: input, shape index: {}]   ;;  %s5016_s1 = inlined_call_operand.vmem [shape: bf16[32,256], index: 1, kind: input, shape index: {}]   ;;  %s5017_s2 = inlined_call_operand.hbm [shape: bf16[256,256], index: 2, kind: input, shape index: {}]   ;;  %s5018_s3 = inlined_call_operand.vmem [shape: f32[4,256], index: 3, kind: input, shape index: {}]   ;;  %s5019_s4 = inlined_call_operand.hbm [shape: bf16[200,256], index: 4, kind: output, shape index: {}]  }
   0x1   :  { %10 = vsyncpa [#allocation4], 0 }
   0x2   :  { %12 = vsyncpa [#allocation4 + $0x1], 0  ;;  %s3217_s15 = smov 0   ;;  %s3219_s16 = smov 0  }
   0x3   :  { %s3221_s17 = smov 0   ;;  %s3223_s18 = smov 0  }
   0x4 LB: > { %s3238_s19 = sadd.s32 4294967295, %s3184_s18   ;;  %s2655_s20 = sadd.s32 4294967294, %s3184_s18   ;;  %s3184_s18 = sphi %s3223_s18, %s5334_s18   ;;  %s3180_s17 = sphi %s3221_s17, %s5333_s17   ;;  %s3176_s16 = sphi %s3219_s16, %s5332_s16   ;;  %s3172_s15 = sphi %s3217_s15, %s5331_s15  }
   0x5   : > { %s3242_s21 = sadd.s32 1, %s3184_s18   ;;  %s114_s22 = sadd.s32 1, %s3180_s17 }
   0x6   : > { %s111_s23 = ssub.s32 %s3184_s18, %s3242_s21  ;;  %p124_p0 = scmp.ne.s32.totalorder %s3180_s17, %s3176_s16 }
   0x7   : > { %p112_p1 = scmp.eq.s32.totalorder %s111_s23, 0  ;;  %p125_p2 = scmp.eq.s32.totalorder %s3238_s19, 1 }
   0x8   : > { %p130_p3 = scmp.ne.s32.totalorder %s3176_s16, %s3172_s15  ;;  %p131_p4 = scmp.eq.s32.totalorder %s2655_s20, 1 }
   0x9   : > { %s3253_s24 = scalar_select %p112_p1, %s3180_s17, %s114_s22  }
   0xa   : > { %p3255_p5 = por %p125_p2, %p124_p0  ;;  %p3259_p6 = por %p131_p4, %p130_p3 }
   0xb   : > { %p2656_p7 = scmp.ge.s32.totalorder %s3184_s18, 1  ;;  %p138_p8 = scmp.lt.s32.totalorder %s3184_s18, 3 }
   0xc   : > { %p2953_p9 = scmp.eq.s32.totalorder %s3238_s19, 0  ;;  %s152_s29 = sshll.u32 %s5017_s2, 4  ;;  %s153_s29 = int_to_ptr.hbm [resolvable:$true] %s152_s29 }
   0xd   : > { %p139_p10 = pnand %p2656_p7, %p138_p8  ;;  %s3186_s30 = smov [#allocation2]  }
   0xe   : > { %s154_s5 = sshll.u32 %s3186_s30, 4  ;;  %s3187_s6 = smov 128   ;;  %s155_s5 = int_to_ptr.vmem [resolvable:$true] %s154_s5 }
   0xf   : > { %p2945_p11 = pneg %p139_p10  ;;  %s3188_s7 = smov 8  }
  0x10   : > { %190 = sbr.rel (%p139_p10) target bundleno = 829 (0x33d), region = 36 }
  0x11   : > { %p2946_p12 = pnand %p2953_p9, %p2945_p11 }
  0x13   : > { %2948 = dma.hbm_to_vmem [thread:$0]  (!%p2946_p12), %s153_s29, 4096, %s155_s5, [#allocation3], %s3187_s6, %s3187_s6, %s3188_s7  }
  0x15   : > { %3163 = dma.done.wait (%p2953_p9), [#allocation3], 4096  }
  0x16   : > { %3165 = vsyncadd (%p2953_p9), [#allocation3], 4294963200  ;;  %s3276_s8 = smul.u32 14, %s3238_s19  ;;  %v2703_v0 = vld [vmem:[%s5016_s1 + $0x10] sm:$0xf]  ;;  %vm327_vm0 = vcmask 261120  }
  0x17   : > { %v2898_v1 = vld [vmem:[%s5016_s1 + $0x14] sm:$0xf0]  ;;  %v2897_v2 = vld [vmem:[%s5016_s1 + $0x14] sm:$0xf]  ;;  %v2705_v4 = vld [vmem:[%s5016_s1 + $0x18] sm:$0xf0] }
  0x18   : > { %p226_p13 = scmp.lt.s32.totalorder %s3276_s8, 24  ;;  %v2704_v3 = vor.u32 %v2898_v1, %v2703_v0  ;;  %v2695_v5 = vld [vmem:[%s5016_s1] sm:$0xf]  ;;  %v2896_v6 = vld [vmem:[%s5016_s1 + $0x4] sm:$0xf0]  ;;  %v2708_v7 = vor.u32 %v2897_v2, %v2705_v4  ;;  %s218_s27 = sand.u32 1, %s3176_s16  }
  0x19   : > { %v2895_v8 = vld [vmem:[%s5016_s1 + $0x4] sm:$0xf]  ;;  %v2697_v9 = vld [vmem:[%s5016_s1 + $0x8] sm:$0xf0]  ;;  %v2696_v10 = vor.u32 %v2896_v6, %v2695_v5  ;;  %v2913_v22 = vld [vmem:[#allocation2 + $0x74] sm:$0xf] }
  0x1a   : > { %s227_s9 = scalar_select %p226_p13, %s3276_s8, 24  ;;  %355 = vmatpush.bf16.msra.mxu0 %v2704_v3  ;;  %2935 = vmatpush.bf16.msra.mxu2 %v2704_v3  ;;  %v2700_v11 = vor.u32 %v2895_v8, %v2697_v9  ;;  %v242_v19 = vld [vmem:[%s5018_s3] ss:$4 sm:$0x3]  ;;  %v2811_v23 = vld [vmem:[#allocation2 + $0x78] sm:$0xf0] }
  0x1b   : > { %399 = vmatpush.bf16.msra.mxu1 %v2708_v7  ;;  %2937 = vmatpush.bf16.msra.mxu3 %v2708_v7  ;;  %v3324_v20 = vperm.slane %v242_v19, 0  ;;  %v3326_v21 = vperm.slane %v242_v19, 1  ;;  %v2814_v24 = vor.u32 %v2913_v22, %v2811_v23  ;;  %v2929_v25 = vld [vmem:[#allocation2 + $0xf4] sm:$0xf]  ;;  %v2875_v26 = vld [vmem:[#allocation2 + $0xf8] sm:$0xf0] }
  0x1c   : > { %s2661_s10 = sshll.u32 %s227_s9, 2  ;;  %v2878_v28 = vor.u32 %v2929_v25, %v2875_v26  ;;  %v2809_v32 = vld [vmem:[#allocation2 + $0x70] sm:$0xf]  ;;  %v2914_v33 = vld [vmem:[#allocation2 + $0x74] sm:$0xf0]  ;;  %s2939_s6 = smul.u32 112, %s218_s27 }
  0x1d   : > { %s229_s14 = scalar_lea.vmem %s5015_s0, %s2661_s10  ;;  %v2911_v35 = vld [vmem:[#allocation2 + $0x64] sm:$0xf]  ;;  %v2810_v36 = vor.u32 %v2914_v33, %v2809_v32  ;;  %v2803_v38 = vld [vmem:[#allocation2 + $0x68] sm:$0xf0]  ;;  %v2873_v3 = vld [vmem:[#allocation2 + $0xf0] sm:$0xf] }
  0x1e   : > { %v2888_v12 = vld [vmem:[%s229_s14] sm:$0xff]  ;;  %356 = vmatpush.bf16.msra.mxu0 %v2696_v10  ;;  %2936 = vmatpush.bf16.msra.mxu2 %v2696_v10  ;;  %v2889_v14 = vld [vmem:[%s229_s14 + $0x8] sm:$0xff]  ;;  %v2890_v16 = vld [vmem:[%s229_s14 + $0x10] sm:$0xff]  ;;  %v2806_v40 = vor.u32 %v2911_v35, %v2803_v38  ;;  %s4817_s7 = scalar_lea.vmem [#allocation5], %s2939_s6  ;;  %s4954_s9 = scalar_lea.sflag [#allocation4], %s218_s27 }
  0x1f   : > { %v2892_v13 = vld [vmem:[%s229_s14 + $0x20] sm:$0xff]  ;;  %400 = vmatpush.bf16.msra.mxu1 %v2700_v11  ;;  %2938 = vmatpush.bf16.msra.mxu3 %v2700_v11  ;;  %v2893_v15 = vld [vmem:[%s229_s14 + $0x28] sm:$0xff]  ;;  %v2894_v17 = vld [vmem:[%s229_s14 + $0x30] sm:$0xff]  ;;  %s2565_s11 = ssub.s32 (%p3255_p5), 25, %s3276_s8 }
  0x20   : > { %v2891_v18 = vld [vmem:[%s229_s14 + $0x18] sm:$0xff]  ;;  %v2927_v43 = vld [vmem:[#allocation2 + $0xe4] sm:$0xf]  ;;  %v2867_v44 = vld [vmem:[#allocation2 + $0xe8] sm:$0xf0]  ;;  %p2566_p0 = scmp.lt.s32.totalorder (%p3255_p5), %s2565_s11, 14 }
  0x21   : > { %2709 = vmatmul.msk.bf16.vlgmr.msra.gmra.mxu0 %vm327_vm0, %v2888_v12  ;;  %2713 = vmatmul.msk.bf16.vlgmr.msra.gmra.mxu2 %vm327_vm0, %v2892_v13  ;;  %v2870_v48 = vor.u32 %v2927_v43, %v2867_v44  ;;  %v2930_v4 = vld [vmem:[#allocation2 + $0xf4] sm:$0xf0] }
  0x22   : > { %2716 = vmatmul.msk.bf16.vlgmr.msra.gmra.mxu1 %vm327_vm0, %v2888_v12  ;;  %2720 = vmatmul.msk.bf16.vlgmr.msra.gmra.mxu3 %vm327_vm0, %v2892_v13  ;;  %v2874_v6 = vor.u32 %v2930_v4, %v2873_v3 }
  0x23   : > { %1968 = vmatpush.bf16.msrb.mxu0 %v2814_v24  ;;  %2012 = vmatpush.bf16.msrb.mxu1 %v2878_v28 }
  0x24   : > { %1880 = vmatpush.bf16.msrb.mxu2 %v2810_v36  ;;  %1924 = vmatpush.bf16.msrb.mxu3 %v2874_v6 }
  0x27   : > { %1969 = vmatpush.bf16.msrb.mxu0 %v2806_v40  ;;  %2013 = vmatpush.bf16.msrb.mxu1 %v2870_v48 }
  0x31   : > { %2710 = vmatmul.msk.bf16.gmra.mxu0 %vm327_vm0, %v2889_v14  ;;  %2714 = vmatmul.msk.bf16.gmra.mxu2 %vm327_vm0, %v2893_v15 }
  0x32   : > { %2717 = vmatmul.msk.bf16.gmra.mxu1 %vm327_vm0, %v2889_v14  ;;  %2721 = vmatmul.msk.bf16.gmra.mxu3 %vm327_vm0, %v2893_v15 }
  0x41   : > { %2711 = vmatmul.msk.bf16.gmra.mxu0 %vm327_vm0, %v2890_v16  ;;  %2715 = vmatmul.msk.bf16.gmra.mxu2 %vm327_vm0, %v2894_v17 }
  0x42   : > { %2718 = vmatmul.msk.bf16.gmra.mxu1 %vm327_vm0, %v2890_v16  ;;  %2722 = vmatmul.msk.bf16.gmra.mxu3 %vm327_vm0, %v2894_v17 }
  0x51   : > { %2712 = vmatmul.msk.bf16.gmra.mxu0 %vm327_vm0, %v2891_v18 }
  0x52   : > { %2719 = vmatmul.msk.bf16.gmra.mxu1 %vm327_vm0, %v2891_v18 }
  0x9e   : > { %v358_v27 = vpop.f32.mrf.mxu0 }
  0x9f   : > { %v3329_v29 = vadd.f32 %v358_v27, %v3324_v20  ;;  %v402_v30 = vpop.f32.mrf.mxu1 }
  0xa0   : > { %v3332_v31 = vadd.f32 %v402_v30, %v3326_v21 }
  0xa1   : > { %5094 = vst [vmem:[#allocation8_spill] sm:$0xff] %v3329_v29  ;;  %v3335_v34 = vmul.f32 0.70710677, %v3329_v29 }
  0xa2   : > { %5095 = vst [vmem:[#allocation9_spill] sm:$0xff] %v3332_v31  ;;  %v3338_v37 = vmul.f32 0.70710677, %v3332_v31 }
  0xa3   : > { %v493_v39 = vmul.f32 %v3335_v34, %v3335_v34 }
  0xa4   : > { %v533_v41 = vmul.f32 %v3338_v37, %v3338_v37  ;;  %v378_v42 = vpop.f32.mrf.mxu2 }
  0xa5   : > { %v3344_v45 = vmin.f32 %v493_v39, 16.0  ;;  %v3347_v46 = vadd.f32 %v378_v42, %v3324_v20  ;;  %v422_v47 = vpop.f32.mrf.mxu3 }
  0xa6   : > { %v3349_v49 = vmin.f32 %v533_v41, 16.0  ;;  %v360_v50 = vpop.f32.mrf.mxu0  ;;  %v3352_v51 = vadd.f32 %v422_v47, %v3326_v21 }
  0xa7   : > { %5096 = vst [vmem:[#allocation10_spill] sm:$0xff] %v3347_v46  ;;  %v495_v52 = vmul.f32 2.1237322e-06, %v3344_v45  ;;  %v3356_v53 = vadd.f32 %v360_v50, %v3324_v20  ;;  %v404_v54 = vpop.f32.mrf.mxu1  ;;  %v3359_v55 = vmul.f32 0.70710677, %v3347_v46 }
  0xa8   : > { %5097 = vst [vmem:[#allocation11_spill] sm:$0xff] %v3349_v49  ;;  %v535_v56 = vmul.f32 2.1237322e-06, %v3349_v49  ;;  %v3363_v57 = vadd.f32 %v404_v54, %v3326_v21  ;;  %v3366_v58 = vmul.f32 0.70710677, %v3352_v51 }
  0xa9   : > { %5098 = vst [vmem:[#allocation12_spill] sm:$0xff] %v3352_v51  ;;  %v496_v59 = vadd.f32 0.00028619796, %v495_v52  ;;  %v3369_v60 = vmul.f32 0.70710677, %v3356_v53  ;;  %v1133_v61 = vmul.f32 %v3359_v55, %v3359_v55 }
  0xaa   : > { %5099 = vst [vmem:[#allocation13_spill] sm:$0xff] %v3356_v53  ;;  %v536_v62 = vadd.f32 0.00028619796, %v535_v56  ;;  %v3374_v63 = vmul.f32 0.70710677, %v3363_v57  ;;  %v1173_v0 = vmul.f32 %v3366_v58, %v3366_v58  ;;  %v3426_v56 = vmul.f32 0.5, %v3329_v29 }
  0xab   : > { %5100 = vst [vmem:[#allocation14_spill] sm:$0xff] %v3363_v57  ;;  %v497_v1 = vmul.f32 %v496_v59, %v3344_v45  ;;  %v573_v2 = vmul.f32 %v3369_v60, %v3369_v60  ;;  %v3381_v5 = vmin.f32 %v1133_v61, 16.0  ;;  %v3430_v61 = vmul.f32 0.5, %v3332_v31 }
  0xac   : > { %v537_v7 = vmul.f32 %v536_v62, %v3349_v49  ;;  %v613_v9 = vmul.f32 %v3374_v63, %v3374_v63  ;;  %v3389_v11 = vmin.f32 %v1173_v0, 16.0  ;;  %v380_v40 = vpop.f32.mrf.mxu2  ;;  %5110 = vst [vmem:[#allocation24_spill] sm:$0xff] %v3426_v56  ;;  %v3433_v0 = vmul.f32 0.5, %v3347_v46 }
  0xad   : > { %5101 = vst [vmem:[#allocation15_spill] sm:$0xff] %v3381_v5  ;;  %v3384_v8 = vmin.f32 %v573_v2, 16.0  ;;  %v1135_v10 = vmul.f32 2.1237322e-06, %v3381_v5  ;;  %v498_v13 = vadd.f32 0.0036580483, %v497_v1  ;;  %v3423_v52 = vadd.f32 %v380_v40, %v3324_v20  ;;  %v424_v54 = vpop.f32.mrf.mxu3 }
  0xae   : > { %5103 = vst [vmem:[#allocation17_spill] sm:$0xff] %v3389_v11  ;;  %v363_v12 = vpop.f32.mrf.mxu0  ;;  %v1175_v17 = vmul.f32 2.1237322e-06, %v3389_v11  ;;  %v538_v18 = vadd.f32 0.0036580483, %v537_v7  ;;  %v3399_v22 = vmin.f32 %v613_v9, 16.0  ;;  %v3440_v6 = vadd.f32 %v424_v54, %v3326_v21 }
  0xaf   : > { %5102 = vst [vmem:[#allocation16_spill] sm:$0xff] %v3384_v8  ;;  %v3392_v14 = vadd.f32 %v363_v12, %v3324_v20  ;;  %v407_v15 = vpop.f32.mrf.mxu1  ;;  %v575_v16 = vmul.f32 2.1237322e-06, %v3384_v8  ;;  %v1136_v23 = vadd.f32 0.00028619796, %v1135_v10  ;;  %v499_v25 = vmul.f32 %v498_v13, %v3344_v45 }
  0xb0   : > { %v3397_v19 = vadd.f32 %v407_v15, %v3326_v21  ;;  %5106 = vst [vmem:[#allocation20_spill] sm:$0xff] %v3399_v22  ;;  %v1176_v27 = vadd.f32 0.00028619796, %v1175_v17  ;;  %v539_v32 = vmul.f32 %v538_v18, %v3349_v49  ;;  %v615_v33 = vmul.f32 2.1237322e-06, %v3399_v22 }
  0xb1   : > { %5104 = vst [vmem:[#allocation18_spill] sm:$0xff] %v3392_v14  ;;  %v3402_v24 = vmul.f32 0.70710677, %v3392_v14  ;;  %v576_v26 = vadd.f32 0.00028619796, %v575_v16  ;;  %v1137_v35 = vmul.f32 %v1136_v23, %v3381_v5  ;;  %v3436_v2 = vmul.f32 0.5, %v3352_v51 }
  0xb2   : > { %5105 = vst [vmem:[#allocation19_spill] sm:$0xff] %v3397_v19  ;;  %v3408_v30 = vmul.f32 0.70710677, %v3397_v19  ;;  %v500_v38 = vadd.f32 0.05243302, %v499_v25  ;;  %v1177_v42 = vmul.f32 %v1176_v27, %v3389_v11  ;;  %v3449_v15 = vmul.f32 0.5, %v3356_v53 }
  0xb3   : > { %v653_v28 = vmul.f32 %v3402_v24, %v3402_v24  ;;  %v577_v41 = vmul.f32 %v576_v26, %v3384_v8  ;;  %v540_v47 = vadd.f32 0.05243302, %v539_v32  ;;  %v616_v48 = vadd.f32 0.00028619796, %v615_v33  ;;  %5109 = vst [vmem:[#allocation23_spill] sm:$0xff] %v3423_v52 }
  0xb4   : > { %v693_v39 = vmul.f32 %v3408_v30, %v3408_v30  ;;  %v1138_v50 = vadd.f32 0.0036580483, %v1137_v35  ;;  %v501_v59 = vmul.f32 %v500_v38, %v3344_v45  ;;  %5111 = vst [vmem:[#allocation25_spill] sm:$0xff] %v3430_v61  ;;  %v1178_v1 = vadd.f32 0.0036580483, %v1177_v42 }
  0xb5   : > { %v3413_v36 = vmin.f32 %v653_v28, 16.0  ;;  %v578_v62 = vadd.f32 0.0036580483, %v577_v41  ;;  %5112 = vst [vmem:[#allocation26_spill] sm:$0xff] %v3433_v0  ;;  %v541_v7 = vmul.f32 %v540_v47, %v3349_v49  ;;  %v617_v9 = vmul.f32 %v616_v48, %v3399_v22  ;;  %v2801_v17 = vld [vmem:[#allocation2 + $0x60] sm:$0xf] }
  0xb6   : > { %v3420_v44 = vmin.f32 %v693_v39, 16.0  ;;  %5113 = vst [vmem:[#allocation27_spill] sm:$0xff] %v3436_v2  ;;  %v1139_v10 = vmul.f32 %v1138_v50, %v3381_v5  ;;  %v3446_v12 = vmul.f32 0.70710677, %v3423_v52  ;;  %v502_v13 = vadd.f32 0.18741608, %v501_v59  ;;  %v365_v42 = vpop.f32.mrf.mxu0 }
  0xb7   : > { %5107 = vst [vmem:[#allocation21_spill] sm:$0xff] %v3413_v36  ;;  %v655_v43 = vmul.f32 2.1237322e-06, %v3413_v36  ;;  %v3452_v16 = vmul.f32 0.5, %v3363_v57  ;;  %v579_v18 = vmul.f32 %v578_v62, %v3384_v8  ;;  %v1179_v23 = vmul.f32 %v1178_v1, %v3389_v11  ;;  %v2912_v26 = vld [vmem:[#allocation2 + $0x64] sm:$0xf0]  ;;  %v409_v48 = vpop.f32.mrf.mxu1 }
  0xb8   : > { %5108 = vst [vmem:[#allocation22_spill] sm:$0xff] %v3420_v44  ;;  %v695_v4 = vmul.f32 2.1237322e-06, %v3420_v44  ;;  %v1213_v25 = vmul.f32 %v3446_v12, %v3446_v12  ;;  %v2909_v27 = vld [vmem:[#allocation2 + $0x54] sm:$0xf]  ;;  %v2802_v47 = vor.u32 %v2912_v26, %v2801_v17  ;;  %v3478_v26 = vmul.f32 0.5, %v3392_v14 }
  0xb9   : > { %v656_v3 = vadd.f32 0.00028619796, %v655_v43  ;;  %5114 = vst [vmem:[#allocation28_spill] sm:$0xff] %v3440_v6  ;;  %v2795_v28 = vld [vmem:[#allocation2 + $0x58] sm:$0xf0]  ;;  %v503_v43 = vmul.f32 %v502_v13, %v3344_v45  ;;  %v3473_v13 = vadd.f32 %v409_v48, %v3326_v21  ;;  %v383_v48 = vpop.f32.mrf.mxu2 }
  0xba   : > { %5115 = vst [vmem:[#allocation29_spill] sm:$0xff] %v3449_v15  ;;  %v696_v33 = vadd.f32 0.00028619796, %v695_v4  ;;  %v3460_v35 = vmul.f32 0.70710677, %v3440_v6  ;;  %v3463_v46 = vmin.f32 %v1213_v25, 16.0  ;;  %1881 = vmatpush.bf16.msrb.mxu2 %v2802_v47 }
  0xbb   : > { %5116 = vst [vmem:[#allocation30_spill] sm:$0xff] %v3452_v16  ;;  %v657_v32 = vmul.f32 %v656_v3, %v3413_v36  ;;  %v2865_v38 = vld [vmem:[#allocation2 + $0xe0] sm:$0xf]  ;;  %v542_v39 = vadd.f32 0.18741608, %v541_v7  ;;  %v2798_v3 = vor.u32 %v2909_v27, %v2795_v28  ;;  %v3481_v27 = vmul.f32 0.5, %v3397_v19 }
  0xbc   : > { %v618_v40 = vadd.f32 0.0036580483, %v617_v9  ;;  %v1140_v41 = vadd.f32 0.05243302, %v1139_v10  ;;  %v2928_v50 = vld [vmem:[#allocation2 + $0xe4] sm:$0xf0]  ;;  %v697_v51 = vmul.f32 %v696_v33, %v3420_v44  ;;  %v1253_v7 = vmul.f32 %v3460_v35, %v3460_v35 }
  0xbd   : > { %v2925_v54 = vld [vmem:[#allocation2 + $0xd4] sm:$0xf]  ;;  %v2859_v59 = vld [vmem:[#allocation2 + $0xd8] sm:$0xf0]  ;;  %v580_v62 = vadd.f32 0.05243302, %v579_v18  ;;  %v3469_v9 = vadd.f32 %v365_v42, %v3324_v20  ;;  %1970 = vmatpush.bf16.msrb.mxu0 %v2798_v3  ;;  %v2866_v17 = vor.u32 %v2928_v50, %v2865_v38 }
  0xbe   : > { %v1180_v1 = vadd.f32 0.05243302, %v1179_v23  ;;  %5117 = vst [vmem:[#allocation31_spill] sm:$0xff] %v3463_v46  ;;  %v658_v4 = vadd.f32 0.0036580483, %v657_v32  ;;  %v2862_v18 = vor.u32 %v2925_v54, %v2859_v59  ;;  %v543_v23 = vmul.f32 %v542_v39, %v3349_v49 }
  0xbf   : > { %5118 = vst [vmem:[#allocation32_spill] sm:$0xff] %v3469_v9  ;;  %v1215_v10 = vmul.f32 2.1237322e-06, %v3463_v46  ;;  %v619_v25 = vmul.f32 %v618_v40, %v3399_v22  ;;  %v504_v28 = vadd.f32 1.1283791, %v503_v43  ;;  %v1141_v32 = vmul.f32 %v1140_v41, %v3381_v5  ;;  %1925 = vmatpush.bf16.msrb.mxu3 %v2866_v17 }
  0xc0   : > { %5119 = vst [vmem:[#allocation33_spill] sm:$0xff] %v3473_v13  ;;  %v1181_v33 = vmul.f32 %v1180_v1, %v3389_v11  ;;  %v3486_v42 = vmul.f32 0.70710677, %v3469_v9  ;;  %2014 = vmatpush.bf16.msrb.mxu1 %v2862_v18  ;;  %v581_v38 = vmul.f32 %v580_v62, %v3384_v8  ;;  %v659_v39 = vmul.f32 %v658_v4, %v3413_v36  ;;  %v2793_v50 = vld [vmem:[#allocation2 + $0x50] sm:$0xf] }
  0xc1   : > { %5120 = vst [vmem:[#allocation34_spill] sm:$0xff] %v3478_v26  ;;  %v698_v40 = vadd.f32 0.0036580483, %v697_v51  ;;  %v3490_v47 = vmin.f32 %v1253_v7, 16.0  ;;  %v1216_v54 = vadd.f32 0.00028619796, %v1215_v10  ;;  %v3496_v41 = vadd.f32 %v383_v48, %v3324_v20 }
  0xc2   : > { %5121 = vst [vmem:[#allocation35_spill] sm:$0xff] %v3481_v27  ;;  %v3493_v43 = vmul.f32 0.70710677, %v3473_v13  ;;  %v2910_v59 = vld [vmem:[#allocation2 + $0x54] sm:$0xf0]  ;;  %v733_v51 = vmul.f32 %v3486_v42, %v3486_v42  ;;  %v3509_v29 = vmul.f32 %v504_v28, %v3335_v34 }
  0xc3   : > { %5122 = vst [vmem:[#allocation36_spill] sm:$0xff] %v3490_v47  ;;  %v544_v1 = vadd.f32 1.1283791, %v543_v23  ;;  %v620_v3 = vadd.f32 0.05243302, %v619_v25  ;;  %v699_v10 = vmul.f32 %v698_v40, %v3420_v44  ;;  %v2794_v19 = vor.u32 %v2910_v59, %v2793_v50  ;;  %v368_v50 = vpop.f32.mrf.mxu0 }
  0xc4   : > { %5123 = vst [vmem:[#allocation37_spill] sm:$0xff] %v3496_v41  ;;  %v1255_v17 = vmul.f32 2.1237322e-06, %v3490_v47  ;;  %v1142_v62 = vadd.f32 0.18741608, %v1141_v32  ;;  %v1217_v48 = vmul.f32 %v1216_v54, %v3463_v46  ;;  %v773_v23 = vmul.f32 %v3493_v43, %v3493_v43  ;;  %v427_v32 = vpop.f32.mrf.mxu3 }
  0xc5   : > { %v1182_v18 = vadd.f32 0.18741608, %v1181_v33  ;;  %v2857_v4 = vld [vmem:[#allocation2 + $0xd0] sm:$0xf]  ;;  %v582_v7 = vadd.f32 0.18741608, %v581_v38  ;;  %v621_v38 = vmul.f32 %v620_v3, %v3399_v22  ;;  %v3513_v40 = vadd.f32 %v427_v32, %v3326_v21  ;;  %1882 = vmatpush.bf16.msrb.mxu2 %v2794_v19  ;;  %v412_v3 = vpop.f32.mrf.mxu1 }
  0xc6   : > { %v660_v14 = vadd.f32 0.05243302, %v659_v39  ;;  %v2926_v57 = vld [vmem:[#allocation2 + $0xd4] sm:$0xf0]  ;;  %v3506_v25 = vmul.f32 0.70710677, %v3496_v41  ;;  %v1143_v54 = vmul.f32 %v1142_v62, %v3381_v5  ;;  %v3526_v62 = vadd.f32 %v368_v50, %v3324_v20 }
  0xc7   : > { %v2907_v33 = vld [vmem:[#allocation2 + $0x44] sm:$0xf]  ;;  %v2787_v53 = vld [vmem:[#allocation2 + $0x48] sm:$0xf0]  ;;  %5124 = vst [vmem:[#allocation38_spill] sm:$0xff] %v3509_v29  ;;  %v1183_v59 = vmul.f32 %v1182_v18, %v3389_v11  ;;  %v3517_v31 = vmin.f32 %v733_v51, 16.0  ;;  %v2858_v2 = vor.u32 %v2926_v57, %v2857_v4  ;;  %v583_v0 = vmul.f32 %v582_v7, %v3384_v8 }
  0xc8   : > { %v1256_v39 = vadd.f32 0.00028619796, %v1255_v17  ;;  %5125 = vst [vmem:[#allocation39_spill] sm:$0xff] %v3513_v40  ;;  %v661_v34 = vmul.f32 %v660_v14, %v3413_v36  ;;  %v700_v28 = vadd.f32 0.05243302, %v699_v10  ;;  %v2790_v27 = vor.u32 %v2907_v33, %v2787_v53 }
  0xc9   : > { %5126 = vst [vmem:[#allocation40_spill] sm:$0xff] %v3517_v31  ;;  %v1218_v17 = vadd.f32 0.0036580483, %v1217_v48  ;;  %v3521_v26 = vmin.f32 %v773_v23, 16.0  ;;  %v1293_v19 = vmul.f32 %v3506_v25, %v3506_v25  ;;  %1926 = vmatpush.bf16.msrb.mxu3 %v2858_v2  ;;  %v622_v18 = vadd.f32 0.18741608, %v621_v38 }
  0xca   : > { %5128 = vst [vmem:[#allocation42_spill] sm:$0xff] %v3526_v62  ;;  %v3529_v57 = vmul.f32 0.5, %v3423_v52  ;;  %v1257_v51 = vmul.f32 %v1256_v39, %v3490_v47  ;;  %v3533_v14 = vmul.f32 0.70710677, %v3513_v40  ;;  %1971 = vmatpush.bf16.msrb.mxu0 %v2790_v27  ;;  %v1144_v53 = vadd.f32 1.1283791, %v1143_v54 }
  0xcb   : > { %5127 = vst [vmem:[#allocation41_spill] sm:$0xff] %v3521_v26  ;;  %v3536_v4 = vmul.f32 0.5, %v3440_v6  ;;  %v735_v7 = vmul.f32 2.1237322e-06, %v3517_v31  ;;  %v3540_v2 = vadd.f32 %v412_v3, %v3326_v21  ;;  %v1184_v10 = vadd.f32 1.1283791, %v1183_v59 }
  0xcc   : > { %5129 = vst [vmem:[#allocation43_spill] sm:$0xff] %v3529_v57  ;;  %v662_v48 = vadd.f32 0.18741608, %v661_v34  ;;  %v701_v23 = vmul.f32 %v700_v28, %v3420_v44  ;;  %v3544_v32 = vmul.f32 0.70710677, %v3526_v62  ;;  %v1219_v38 = vmul.f32 %v1218_v17, %v3463_v46  ;;  %v385_v57 = vpop.f32.mrf.mxu2 }
  0xcd   : > { %5130 = vst [vmem:[#allocation44_spill] sm:$0xff] %v3536_v4  ;;  %v584_v33 = vadd.f32 1.1283791, %v583_v0  ;;  %v775_v27 = vmul.f32 2.1237322e-06, %v3521_v26  ;;  %v3548_v39 = vmin.f32 %v1293_v19, 16.0  ;;  %v623_v50 = vmul.f32 %v622_v18, %v3399_v22 }
  0xce   : > { %5131 = vst [vmem:[#allocation45_spill] sm:$0xff] %v3540_v2  ;;  %v1258_v54 = vadd.f32 0.0036580483, %v1257_v51  ;;  %v1333_v3 = vmul.f32 %v3533_v14, %v3533_v14  ;;  %v813_v59 = vmul.f32 %v3544_v32, %v3544_v32  ;;  %v2923_v34 = vld [vmem:[#allocation2 + $0xc4] sm:$0xf]  ;;  %v3556_v52 = vmul.f32 %v544_v1, %v3338_v37 }
  0xcf   : > { %v2851_v28 = vld [vmem:[#allocation2 + $0xc8] sm:$0xf0]  ;;  %v736_v0 = vadd.f32 0.00028619796, %v735_v7  ;;  %v1295_v17 = vmul.f32 2.1237322e-06, %v3548_v39  ;;  %v3563_v18 = vmul.f32 %v1144_v53, %v3359_v55  ;;  %v663_v51 = vmul.f32 %v662_v48, %v3413_v36 }
  0xd0   : > { %5132 = vst [vmem:[#allocation46_spill] sm:$0xff] %v3556_v52  ;;  %v3560_v19 = vmul.f32 0.70710677, %v3540_v2  ;;  %v702_v6 = vadd.f32 0.18741608, %v701_v23  ;;  %v3566_v4 = vmin.f32 %v813_v59, 16.0  ;;  %v2854_v1 = vor.u32 %v2923_v34, %v2851_v28  ;;  %v429_v28 = vpop.f32.mrf.mxu3 }
  0xd1   : > { %5133 = vst [vmem:[#allocation47_spill] sm:$0xff] %v3563_v18  ;;  %v2785_v11 = vld [vmem:[#allocation2 + $0x40] sm:$0xf]  ;;  %v1220_v5 = vadd.f32 0.05243302, %v1219_v38  ;;  %v1259_v15 = vmul.f32 %v1258_v54, %v3490_v47  ;;  %v3572_v55 = vmul.f32 0.5, %v3469_v9  ;;  %v737_v48 = vmul.f32 %v736_v0, %v3517_v31 }
  0xd2   : > { %v776_v16 = vadd.f32 0.00028619796, %v775_v27  ;;  %v853_v37 = vmul.f32 %v3560_v19, %v3560_v19  ;;  %v2908_v7 = vld [vmem:[#allocation2 + $0x44] sm:$0xf0]  ;;  %v624_v61 = vadd.f32 1.1283791, %v623_v50  ;;  %2015 = vmatpush.bf16.msrb.mxu1 %v2854_v1  ;;  %v3580_v38 = vadd.f32 %v385_v57, %v3324_v20 }
  0xd3   : > { %5134 = vst [vmem:[#allocation48_spill] sm:$0xff] %v3572_v55  ;;  %v3574_v53 = vmin.f32 %v1333_v3, 16.0  ;;  %v1296_v23 = vadd.f32 0.00028619796, %v1295_v17  ;;  %v3583_v27 = vmul.f32 0.5, %v3473_v13  ;;  %v2786_v34 = vor.u32 %v2908_v7, %v2785_v11 }
  0xd4   : > { %v3577_v59 = vmin.f32 %v853_v37, 16.0  ;;  %5136 = vst [vmem:[#allocation50_spill] sm:$0xff] %v3580_v38  ;;  %v815_v54 = vmul.f32 2.1237322e-06, %v3566_v4  ;;  %v3587_v3 = vadd.f32 1.1283791, %v663_v51  ;;  %v703_v0 = vmul.f32 %v702_v6, %v3420_v44 }
  0xd5   : > { %5135 = vst [vmem:[#allocation49_spill] sm:$0xff] %v3574_v53  ;;  %v1335_v50 = vmul.f32 2.1237322e-06, %v3574_v53  ;;  %v1221_v17 = vmul.f32 %v1220_v5, %v3463_v46  ;;  %v777_v37 = vmul.f32 %v776_v16, %v3521_v26  ;;  %v3593_v57 = vmul.f32 %v1184_v10, %v3366_v58  ;;  %1883 = vmatpush.bf16.msrb.mxu2 %v2786_v34  ;;  %v2849_v11 = vld [vmem:[#allocation2 + $0xc0] sm:$0xf] }
  0xd6   : > { %5137 = vst [vmem:[#allocation51_spill] sm:$0xff] %v3583_v27  ;;  %v1260_v1 = vadd.f32 0.05243302, %v1259_v15  ;;  %v855_v9 = vmul.f32 2.1237322e-06, %v3577_v59  ;;  %v3600_v18 = vmul.f32 0.5, %v3496_v41  ;;  %v1297_v5 = vmul.f32 %v1296_v23, %v3548_v39 }
  0xd7   : > { %5138 = vst [vmem:[#allocation52_spill] sm:$0xff] %v3593_v57  ;;  %v3597_v13 = vmul.f32 0.70710677, %v3580_v38  ;;  %v2924_v7 = vld [vmem:[#allocation2 + $0xc4] sm:$0xf0]  ;;  %v3604_v6 = vadd.f32 %v429_v28, %v3326_v21  ;;  %v3607_v15 = vmul.f32 %v584_v33, %v3369_v60  ;;  %v370_v33 = vpop.f32.mrf.mxu0 }
  0xd8   : > { %v738_v51 = vadd.f32 0.0036580483, %v737_v48  ;;  %5139 = vst [vmem:[#allocation53_spill] sm:$0xff] %v3600_v18  ;;  %v2905_v58 = vld [vmem:[#allocation2 + $0x34] sm:$0xf]  ;;  %v3612_v48 = vmul.f32 %v624_v61, %v3374_v63  ;;  %v1261_v28 = vmul.f32 %v1260_v1, %v3490_v47  ;;  %v2850_v56 = vor.u32 %v2924_v7, %v2849_v11 }
  0xd9   : > { %5140 = vst [vmem:[#allocation54_spill] sm:$0xff] %v3604_v6  ;;  %v1336_v16 = vadd.f32 0.00028619796, %v1335_v50  ;;  %v816_v10 = vadd.f32 0.00028619796, %v815_v54  ;;  %v1373_v34 = vmul.f32 %v3597_v13, %v3597_v13 }
  0xda   : > { %5141 = vst [vmem:[#allocation55_spill] sm:$0xff] %v3607_v15  ;;  %v2779_v57 = vld [vmem:[#allocation2 + $0x38] sm:$0xf0]  ;;  %v3614_v41 = vadd.f32 1.1283791, %v703_v0  ;;  %v739_v50 = vmul.f32 %v738_v51, %v3517_v31  ;;  %1927 = vmatpush.bf16.msrb.mxu3 %v2850_v56  ;;  %v3637_v51 = vmul.f32 0.5, %v3526_v62  ;;  %v388_v15 = vpop.f32.mrf.mxu2 }
  0xdb   : > { %5142 = vst [vmem:[#allocation56_spill] sm:$0xff] %v3612_v48  ;;  %v1222_v18 = vadd.f32 0.18741608, %v1221_v17  ;;  %v778_v23 = vadd.f32 0.0036580483, %v777_v37  ;;  %v3617_v55 = vmin.f32 %v1373_v34, 16.0  ;;  %v2782_v52 = vor.u32 %v2905_v58, %v2779_v57  ;;  %v414_v17 = vpop.f32.mrf.mxu1 }
  0xdc   : > { %v856_v27 = vadd.f32 0.00028619796, %v855_v9  ;;  %v3620_v60 = vmul.f32 0.70710677, %v3604_v6  ;;  %v1298_v54 = vadd.f32 0.0036580483, %v1297_v5  ;;  %v1337_v63 = vmul.f32 %v1336_v16, %v3574_v53 }
  0xdd   : > { %v817_v61 = vmul.f32 %v816_v10, %v3566_v4  ;;  %v1375_v0 = vmul.f32 2.1237322e-06, %v3617_v55  ;;  %v1223_v37 = vmul.f32 %v1222_v18, %v3463_v46  ;;  %v779_v1 = vmul.f32 %v778_v23, %v3521_v26  ;;  %1972 = vmatpush.bf16.msrb.mxu0 %v2782_v52  ;;  %v2777_v11 = vld [vmem:[#allocation2 + $0x30] sm:$0xf]  ;;  %v2906_v7 = vld [vmem:[#allocation2 + $0x34] sm:$0xf0] }
  0xde   : > { %v1413_v9 = vmul.f32 %v3620_v60, %v3620_v60  ;;  %v3631_v34 = vmul.f32 0.5, %v3513_v40  ;;  %v3634_v57 = vadd.f32 %v370_v33, %v3324_v20  ;;  %5145 = vst [vmem:[#allocation59_spill] sm:$0xff] %v3637_v51  ;;  %v857_v5 = vmul.f32 %v856_v27, %v3577_v59  ;;  %v2921_v18 = vld [vmem:[#allocation2 + $0xb4] sm:$0xf]  ;;  %v2843_v10 = vld [vmem:[#allocation2 + $0xb8] sm:$0xf0] }
  0xdf   : > { %v1376_v58 = vadd.f32 0.00028619796, %v1375_v0  ;;  %v1262_v23 = vadd.f32 0.18741608, %v1261_v28  ;;  %v740_v40 = vadd.f32 0.05243302, %v739_v50  ;;  %v3646_v52 = vadd.f32 %v414_v17, %v3326_v21 }
  0xe0   : > { %5143 = vst [vmem:[#allocation57_spill] sm:$0xff] %v3631_v34  ;;  %v3640_v16 = vmin.f32 %v1413_v9, 16.0  ;;  %v3643_v56 = vmul.f32 0.70710677, %v3634_v57  ;;  %v1299_v33 = vmul.f32 %v1298_v54, %v3548_v39  ;;  %v1338_v34 = vadd.f32 0.0036580483, %v1337_v63 }
  0xe1   : > { %5144 = vst [vmem:[#allocation58_spill] sm:$0xff] %v3634_v57  ;;  %v818_v62 = vadd.f32 0.0036580483, %v817_v61  ;;  %v2841_v27 = vld [vmem:[#allocation2 + $0xb0] sm:$0xf]  ;;  %v1377_v17 = vmul.f32 %v1376_v58, %v3617_v55  ;;  %v2778_v48 = vor.u32 %v2906_v7, %v2777_v11  ;;  %v741_v63 = vmul.f32 %v740_v40, %v3517_v31 }
  0xe2   : > { %5146 = vst [vmem:[#allocation60_spill] sm:$0xff] %v3640_v16  ;;  %v1415_v6 = vmul.f32 2.1237322e-06, %v3640_v16  ;;  %v3650_v0 = vadd.f32 1.1283791, %v1223_v37  ;;  %v893_v28 = vmul.f32 %v3643_v56, %v3643_v56  ;;  %v1339_v44 = vmul.f32 %v1338_v34, %v3574_v53 }
  0xe3   : > { %5147 = vst [vmem:[#allocation61_spill] sm:$0xff] %v3646_v52  ;;  %v780_v9 = vadd.f32 0.05243302, %v779_v1  ;;  %v3655_v50 = vmul.f32 0.70710677, %v3646_v52  ;;  %v2846_v1 = vor.u32 %v2921_v18, %v2843_v10  ;;  %v819_v36 = vmul.f32 %v818_v62, %v3566_v4  ;;  %1884 = vmatpush.bf16.msrb.mxu2 %v2778_v48 }
  0xe4   : > { %v858_v46 = vadd.f32 0.0036580483, %v857_v5  ;;  %v1416_v51 = vadd.f32 0.00028619796, %v1415_v6  ;;  %v2922_v54 = vld [vmem:[#allocation2 + $0xb4] sm:$0xf0]  ;;  %v3666_v5 = vadd.f32 %v388_v15, %v3324_v20  ;;  %v1263_v10 = vmul.f32 %v1262_v23, %v3490_v47 }
  0xe5   : > { %v3659_v61 = vmin.f32 %v893_v28, 16.0  ;;  %v933_v37 = vmul.f32 %v3655_v50, %v3655_v50  ;;  %v1300_v29 = vadd.f32 0.05243302, %v1299_v33  ;;  %v2769_v6 = vld [vmem:[#allocation2 + $0x20] sm:$0xf]  ;;  %2016 = vmatpush.bf16.msrb.mxu1 %v2846_v1  ;;  %v2842_v58 = vor.u32 %v2922_v54, %v2841_v27  ;;  %v432_v33 = vpop.f32.mrf.mxu3 }
  0xe6   : > { %5148 = vst [vmem:[#allocation62_spill] sm:$0xff] %v3666_v5  ;;  %v1417_v11 = vmul.f32 %v1416_v51, %v3640_v16  ;;  %v2904_v18 = vld [vmem:[#allocation2 + $0x24] sm:$0xf0]  ;;  %v781_v34 = vmul.f32 %v780_v9, %v3521_v26  ;;  %v859_v62 = vmul.f32 %v858_v46, %v3577_v59  ;;  %v1378_v48 = vadd.f32 0.0036580483, %v1377_v17  ;;  %v373_v46 = vpop.f32.mrf.mxu0 }
  0xe7   : > { %v895_v40 = vmul.f32 2.1237322e-06, %v3659_v61  ;;  %v3670_v7 = vmin.f32 %v933_v37, 16.0  ;;  %v2903_v15 = vld [vmem:[#allocation2 + $0x24] sm:$0xf]  ;;  %1928 = vmatpush.bf16.msrb.mxu3 %v2842_v58  ;;  %v3677_v37 = vadd.f32 %v432_v33, %v3326_v21  ;;  %v1301_v27 = vmul.f32 %v1300_v29, %v3548_v39 }
  0xe8   : > { %v742_v28 = vadd.f32 0.18741608, %v741_v63  ;;  %v1340_v54 = vadd.f32 0.05243302, %v1339_v44  ;;  %v3681_v23 = vmul.f32 0.70710677, %v3666_v5  ;;  %v2770_v9 = vor.u32 %v2904_v18, %v2769_v6 }
  0xe9   : > { %v896_v22 = vadd.f32 0.00028619796, %v895_v40  ;;  %v935_v51 = vmul.f32 2.1237322e-06, %v3670_v7  ;;  %5149 = vst [vmem:[#allocation63_spill] sm:$0xff] %v3677_v37  ;;  %v1379_v58 = vmul.f32 %v1378_v48, %v3617_v55 }
  0xea   : > { %5150 = vst [vmem:[#allocation64_spill] sm:$0xff] %v3681_v23  ;;  %v2771_v1 = vld [vmem:[#allocation2 + $0x28] sm:$0xf0]  ;;  %v820_v17 = vadd.f32 0.05243302, %v819_v36  ;;  %v1453_v33 = vmul.f32 %v3681_v23, %v3681_v23  ;;  %1885 = vmatpush.bf16.msrb.mxu2 %v2770_v9  ;;  %v3692_v36 = vadd.f32 %v373_v46, %v3324_v20 }
  0xeb   : > { %v1418_v47 = vadd.f32 0.0036580483, %v1417_v11  ;;  %v897_v63 = vmul.f32 %v896_v22, %v3659_v61  ;;  %v936_v40 = vadd.f32 0.00028619796, %v935_v51  ;;  %v860_v49 = vadd.f32 0.05243302, %v859_v62  ;;  %v417_v11 = vpop.f32.mrf.mxu1 }
  0xec   : > { %v3688_v29 = vmul.f32 0.70710677, %v3677_v37  ;;  %v2774_v18 = vor.u32 %v2903_v15, %v2771_v1  ;;  %5152 = vst [vmem:[#allocation66_spill] sm:$0xff] %v3692_v36  ;;  %v3694_v22 = vadd.f32 1.1283791, %v1263_v10  ;;  %v743_v62 = vmul.f32 %v742_v28, %v3517_v31 }
  0xed   : > { %v898_v44 = vadd.f32 0.0036580483, %v897_v63  ;;  %v937_v6 = vmul.f32 %v936_v40, %v3670_v7  ;;  %v782_v48 = vadd.f32 0.18741608, %v781_v34  ;;  %v3698_v51 = vmul.f32 0.5, %v3540_v2 }
  0xee   : > { %5151 = vst [vmem:[#allocation65_spill] sm:$0xff] %v3688_v29  ;;  %v1341_v37 = vmul.f32 %v1340_v54, %v3574_v53  ;;  %v1419_v9 = vmul.f32 %v1418_v47, %v3640_v16  ;;  %1973 = vmatpush.bf16.msrb.mxu0 %v2774_v18  ;;  %v3703_v15 = vmul.f32 0.70710677, %v3692_v36  ;;  %v1302_v1 = vadd.f32 0.18741608, %v1301_v27 }
  0xef   : > { %5153 = vst [vmem:[#allocation67_spill] sm:$0xff] %v3698_v51  ;;  %v938_v63 = vadd.f32 0.0036580483, %v937_v6  ;;  %v821_v46 = vmul.f32 %v820_v17, %v3566_v4  ;;  %v3706_v10 = vmin.f32 %v1453_v33, 16.0  ;;  %v3709_v28 = vadd.f32 %v417_v11, %v3326_v21  ;;  %v2833_v6 = vld [vmem:[#allocation2 + $0xa0] sm:$0xf] }
  0xf0   : > { %5154 = vst [vmem:[#allocation68_spill] sm:$0xff] %v3703_v15  ;;  %v861_v34 = vmul.f32 %v860_v49, %v3577_v59  ;;  %v1380_v40 = vadd.f32 0.05243302, %v1379_v58  ;;  %v899_v54 = vmul.f32 %v898_v44, %v3659_v61  ;;  %v1493_v47 = vmul.f32 %v3688_v29, %v3688_v29  ;;  %v2920_v18 = vld [vmem:[#allocation2 + $0xa4] sm:$0xf0] }
  0xf1   : > { %5155 = vst [vmem:[#allocation69_spill] sm:$0xff] %v3706_v10  ;;  %v3717_v27 = vmul.f32 %v3587_v3, %v3402_v24  ;;  %v783_v17 = vmul.f32 %v782_v48, %v3521_v26  ;;  %v1455_v33 = vmul.f32 2.1237322e-06, %v3706_v10  ;;  %v973_v11 = vmul.f32 %v3703_v15, %v3703_v15  ;;  %v2919_v49 = vld [vmem:[#allocation2 + $0xa4] sm:$0xf] }
  0xf2   : > { %5156 = vst [vmem:[#allocation70_spill] sm:$0xff] %v3709_v28  ;;  %v2835_v58 = vld [vmem:[#allocation2 + $0xa8] sm:$0xf0]  ;;  %v744_v2 = vadd.f32 1.1283791, %v743_v62  ;;  %v939_v29 = vmul.f32 %v938_v63, %v3670_v7  ;;  %v1303_v23 = vmul.f32 %v1302_v1, %v3548_v39  ;;  %v2834_v3 = vor.u32 %v2920_v18, %v2833_v6 }
  0xf3   : > { %5157 = vst [vmem:[#allocation71_spill] sm:$0xff] %v3717_v27  ;;  %v1342_v44 = vadd.f32 0.18741608, %v1341_v37  ;;  %v1420_v5 = vadd.f32 0.05243302, %v1419_v9  ;;  %v1381_v27 = vmul.f32 %v1380_v40, %v3617_v55  ;;  %v3729_v31 = vmin.f32 %v1493_v47, 16.0 }
  0xf4   : > { %v822_v51 = vadd.f32 0.18741608, %v821_v46  ;;  %v3726_v24 = vmul.f32 0.70710677, %v3709_v28  ;;  %v862_v48 = vadd.f32 0.18741608, %v861_v34  ;;  %1929 = vmatpush.bf16.msrb.mxu3 %v2834_v3  ;;  %v2838_v62 = vor.u32 %v2919_v49, %v2835_v58 }
  0xf5   : > { %v900_v26 = vadd.f32 0.05243302, %v899_v54  ;;  %5158 = vst [vmem:[#allocation72_spill] sm:$0xff] %v3729_v31  ;;  %v1456_v15 = vadd.f32 0.00028619796, %v1455_v33  ;;  %v3731_v8 = vmin.f32 %v973_v11, 16.0  ;;  %v1343_v63 = vmul.f32 %v1342_v44, %v3574_v53 }
  0xf6   : > { %v1013_v37 = vmul.f32 %v3726_v24, %v3726_v24  ;;  %v784_v9 = vadd.f32 1.1283791, %v783_v17  ;;  %v1421_v1 = vmul.f32 %v1420_v5, %v3640_v16  ;;  %v940_v46 = vadd.f32 0.05243302, %v939_v29  ;;  %2017 = vmatpush.bf16.msrb.mxu1 %v2838_v62  ;;  %v2761_v5 = vld [vmem:[#allocation2 + $0x10] sm:$0xf] }
  0xf7   : > { %v1304_v34 = vadd.f32 1.1283791, %v1303_v23  ;;  %v3738_v40 = vmul.f32 0.5, %v3580_v38  ;;  %v1495_v54 = vmul.f32 2.1237322e-06, %v3729_v31  ;;  %v3745_v6 = vmul.f32 %v3614_v41, %v3408_v30 }
  0xf8   : > { %v3741_v47 = vmin.f32 %v1013_v37, 16.0  ;;  %v823_v18 = vmul.f32 %v822_v51, %v3566_v4  ;;  %v1382_v17 = vadd.f32 0.18741608, %v1381_v27  ;;  %v901_v33 = vmul.f32 %v900_v26, %v3659_v61  ;;  %v2902_v29 = vld [vmem:[#allocation2 + $0x14] sm:$0xf0] }
  0xf9   : > { %5159 = vst [vmem:[#allocation73_spill] sm:$0xff] %v3738_v40  ;;  %v3751_v23 = vmul.f32 %v3650_v0, %v3446_v12  ;;  %v863_v11 = vmul.f32 %v862_v48, %v3577_v59  ;;  %v1457_v49 = vmul.f32 %v1456_v15, %v3706_v10  ;;  %v975_v58 = vmul.f32 2.1237322e-06, %v3731_v8  ;;  %v2825_v44 = vld [vmem:[#allocation2 + $0x90] sm:$0xf] }
  0xfa   : > { %v2918_v30 = vld [vmem:[#allocation2 + $0x94] sm:$0xf0]  ;;  %v3758_v41 = vmul.f32 %v3694_v22, %v3460_v35  ;;  %v1344_v51 = vadd.f32 1.1283791, %v1343_v63  ;;  %v1422_v26 = vadd.f32 0.18741608, %v1421_v1  ;;  %v941_v27 = vmul.f32 %v940_v46, %v3670_v7 }
  0xfb   : > { %5160 = vst [vmem:[#allocation74_spill] sm:$0xff] %v3751_v23  ;;  %v2901_v3 = vld [vmem:[#allocation2 + $0x14] sm:$0xf]  ;;  %v3762_v12 = vmul.f32 %v744_v2, %v3486_v42  ;;  %v3765_v0 = vmul.f32 %v784_v9, %v3493_v43  ;;  %v1496_v15 = vadd.f32 0.00028619796, %v1495_v54  ;;  %v1383_v38 = vmul.f32 %v1382_v17, %v3617_v55  ;;  %v375_v42 = vpop.f32.mrf.mxu0 }
  0xfc   : > { %5161 = vst [vmem:[#allocation75_spill] sm:$0xff] %v3758_v41  ;;  %v1015_v48 = vmul.f32 2.1237322e-06, %v3741_v47  ;;  %v2763_v37 = vld [vmem:[#allocation2 + $0x18] sm:$0xf0]  ;;  %v2762_v22 = vor.u32 %v2902_v29, %v2761_v5  ;;  %v3770_v63 = vmul.f32 %v1304_v34, %v3506_v25  ;;  %v1423_v2 = vmul.f32 %v1422_v26, %v3640_v16  ;;  %v419_v41 = vpop.f32.mrf.mxu1 }
  0xfd   : > { %v824_v62 = vadd.f32 1.1283791, %v823_v18  ;;  %v902_v35 = vadd.f32 0.18741608, %v901_v33  ;;  %v864_v1 = vadd.f32 1.1283791, %v863_v11  ;;  %v2826_v9 = vor.u32 %v2918_v30, %v2825_v44  ;;  %v390_v11 = vpop.f32.mrf.mxu2 }
  0xfe   : > { %5162 = vst [vmem:[#allocation76_spill] sm:$0xff] %v3770_v63  ;;  %v1458_v46 = vadd.f32 0.0036580483, %v1457_v49  ;;  %v976_v40 = vadd.f32 0.00028619796, %v975_v58  ;;  %1886 = vmatpush.bf16.msrb.mxu2 %v2762_v22  ;;  %v2766_v54 = vor.u32 %v2901_v3, %v2763_v37  ;;  %v3774_v18 = vmul.f32 %v1344_v51, %v3533_v14  ;;  %v434_v3 = vpop.f32.mrf.mxu3 }
  0xff   : > { %v942_v43 = vadd.f32 0.18741608, %v941_v27  ;;  %v3777_v17 = vmul.f32 0.5, %v3634_v57  ;;  %v1497_v25 = vmul.f32 %v1496_v15, %v3729_v31  ;;  %v1016_v34 = vadd.f32 0.00028619796, %v1015_v48  ;;  %1930 = vmatpush.bf16.msrb.mxu3 %v2826_v9 }
 0x100   : > { %5163 = vst [vmem:[#allocation77_spill] sm:$0xff] %v3774_v18  ;;  %v1384_v33 = vadd.f32 1.1283791, %v1383_v38  ;;  %v903_v5 = vmul.f32 %v902_v35, %v3659_v61  ;;  %v3782_v29 = vmul.f32 0.5, %v3646_v52  ;;  %1974 = vmatpush.bf16.msrb.mxu0 %v2766_v54  ;;  %v3785_v49 = vadd.f32 %v375_v42, %v3324_v20  ;;  %v2917_v30 = vld [vmem:[#allocation2 + $0x94] sm:$0xf] }
 0x101   : > { %v3788_v14 = vmul.f32 %v824_v62, %v3544_v32  ;;  %v1459_v58 = vmul.f32 %v1458_v46, %v3706_v10  ;;  %v977_v44 = vmul.f32 %v976_v40, %v3731_v8  ;;  %v3793_v38 = vadd.f32 %v419_v41, %v3326_v21  ;;  %v2827_v32 = vld [vmem:[#allocation2 + $0x98] sm:$0xf0]  ;;  %v2753_v62 = vld [vmem:[#allocation2] sm:$0xf] }
 0x102   : > { %5164 = vst [vmem:[#allocation78_spill] sm:$0xff] %v3785_v49  ;;  %v3796_v51 = vmul.f32 %v864_v1, %v3560_v19  ;;  %v1424_v26 = vadd.f32 1.1283791, %v1423_v2  ;;  %v943_v27 = vmul.f32 %v942_v43, %v3670_v7  ;;  %v3800_v15 = vmul.f32 0.70710677, %v3785_v49 }
 0x103   : > { %5165 = vst [vmem:[#allocation79_spill] sm:$0xff] %v3793_v38  ;;  %v1498_v48 = vadd.f32 0.0036580483, %v1497_v25  ;;  %v3803_v37 = vmul.f32 0.5, %v3692_v36  ;;  %v1017_v40 = vmul.f32 %v1016_v34, %v3741_v47  ;;  %v3807_v41 = vadd.f32 %v390_v11, %v3324_v20  ;;  %v2900_v19 = vld [vmem:[#allocation2 + $0x4] sm:$0xf0] }
 0x104   : > { %v2817_v35 = vld [vmem:[#allocation2 + $0x80] sm:$0xf]  ;;  %v3810_v22 = vmul.f32 %v1384_v33, %v3597_v13  ;;  %v904_v1 = vadd.f32 1.1283791, %v903_v5  ;;  %v3813_v46 = vmul.f32 0.5, %v3709_v28  ;;  %v1053_v42 = vmul.f32 %v3800_v15, %v3800_v15 }
 0x105   : > { %5166 = vst [vmem:[#allocation80_spill] sm:$0xff] %v3807_v41  ;;  %v2916_v2 = vld [vmem:[#allocation2 + $0x84] sm:$0xf0]  ;;  %v1460_v43 = vadd.f32 0.05243302, %v1459_v58  ;;  %v3818_v54 = vadd.f32 %v434_v3, %v3326_v21  ;;  %v3824_v13 = vmul.f32 %v1424_v26, %v3620_v60  ;;  %v2830_v11 = vor.u32 %v2917_v30, %v2827_v32 }
 0x106   : > { %5167 = vst [vmem:[#allocation81_spill] sm:$0xff] %v3810_v22  ;;  %v978_v9 = vadd.f32 0.0036580483, %v977_v44  ;;  %v3821_v20 = vmul.f32 0.70710677, %v3793_v38  ;;  %v3826_v5 = vmin.f32 %v1053_v42, 16.0  ;;  %v1499_v28 = vmul.f32 %v1498_v48, %v3729_v31 }
 0x107   : > { %5168 = vst [vmem:[#allocation82_spill] sm:$0xff] %v3813_v46  ;;  %v2899_v25 = vld [vmem:[#allocation2 + $0x4] sm:$0xf]  ;;  %v2755_v34 = vld [vmem:[#allocation2 + $0x8] sm:$0xf0]  ;;  %v3835_v57 = vmul.f32 %v904_v1, %v3643_v56  ;;  %2018 = vmatpush.bf16.msrb.mxu1 %v2830_v11  ;;  %v2754_v26 = vor.u32 %v2900_v19, %v2753_v62  ;;  %v1461_v30 = vmul.f32 %v1460_v43, %v3706_v10 }
 0x108   : > { %5169 = vst [vmem:[#allocation83_spill] sm:$0xff] %v3818_v54  ;;  %v944_v33 = vadd.f32 1.1283791, %v943_v27  ;;  %v2915_v36 = vld [vmem:[#allocation2 + $0x84] sm:$0xf]  ;;  %v1093_v21 = vmul.f32 %v3821_v20, %v3821_v20  ;;  %v2818_v27 = vor.u32 %v2916_v2, %v2817_v35  ;;  %v979_v32 = vmul.f32 %v978_v9, %v3731_v8 }
 0x109   : > { %5170 = vst [vmem:[#allocation84_spill] sm:$0xff] %v3824_v13  ;;  %v1018_v58 = vadd.f32 0.0036580483, %v1017_v40  ;;  %v3830_v44 = vmul.f32 0.70710677, %v3807_v41  ;;  %1887 = vmatpush.bf16.msrb.mxu2 %v2754_v26  ;;  %v2758_v52 = vor.u32 %v2899_v25, %v2755_v34  ;;  %v5173_v25 = vld [vmem:[#allocation16_spill] sm:$0xff] }
 0x10a   : > { %v2819_v3 = vld [vmem:[#allocation2 + $0x88] sm:$0xf0]  ;;  %v1055_v60 = vmul.f32 2.1237322e-06, %v3826_v5  ;;  %v3841_v48 = vmul.f32 0.70710677, %v3818_v54  ;;  %1931 = vmatpush.bf16.msrb.mxu3 %v2818_v27  ;;  %v3847_v11 = vmul.f32 %v944_v33, %v3655_v50 }
 0x10b   : > { %5171 = vst [vmem:[#allocation85_spill] sm:$0xff] %v3830_v44  ;;  %v3843_v40 = vmin.f32 %v1093_v21, 16.0  ;;  %v2822_v56 = vor.u32 %v2915_v36, %v2819_v3  ;;  %v506_v1 = vmul.f32 3.8918573e-05, %v3344_v45  ;;  %v1500_v62 = vadd.f32 0.05243302, %v1499_v28  ;;  %1975 = vmatpush.bf16.msrb.mxu0 %v2758_v52 }
 0x10c   : > { %5172 = vst [vmem:[#allocation86_spill] sm:$0xff] %v3841_v48  ;;  %v1056_v42 = vadd.f32 0.00028619796, %v1055_v60  ;;  %v1019_v19 = vmul.f32 %v1018_v58, %v3741_v47  ;;  %v1533_v35 = vmul.f32 %v3830_v44, %v3830_v44  ;;  %v586_v36 = vmul.f32 3.8918573e-05, %v5173_v25  ;;  %v5174_v28 = vld [vmem:[#allocation11_spill] sm:$0xff] }
 0x10d   : > { %v1095_v43 = vmul.f32 2.1237322e-06, %v3843_v40  ;;  %2019 = vmatpush.bf16.msrb.mxu1 %v2822_v56  ;;  %v507_v9 = vadd.f32 0.001143296, %v506_v1  ;;  %v1462_v34 = vadd.f32 0.18741608, %v1461_v30  ;;  %v1573_v50 = vmul.f32 %v3841_v48, %v3841_v48 }
 0x10e   : > { %v1057_v2 = vmul.f32 %v1056_v42, %v3826_v5  ;;  %v980_v21 = vadd.f32 0.05243302, %v979_v32  ;;  %v546_v33 = vmul.f32 3.8918573e-05, %v5174_v28  ;;  %v587_v26 = vadd.f32 0.001143296, %v586_v36 }
 0x10f   : > { %v1096_v3 = vadd.f32 0.00028619796, %v1095_v43  ;;  %v508_v60 = vmul.f32 %v507_v9, %v3344_v45  ;;  %v1501_v27 = vmul.f32 %v1500_v62, %v3729_v31  ;;  %v1020_v42 = vadd.f32 0.05243302, %v1019_v19  ;;  %v5177_v9 = vld [vmem:[#allocation20_spill] sm:$0xff]  ;;  %v5180_v13 = vld [vmem:[#allocation21_spill] sm:$0xff] }
 0x110   : > { %v1058_v58 = vadd.f32 0.0036580483, %v1057_v2  ;;  %v3860_v52 = vmin.f32 %v1533_v35, 16.0  ;;  %v547_v56 = vadd.f32 0.001143296, %v546_v33  ;;  %v588_v54 = vmul.f32 %v587_v26, %v5173_v25 }
 0x111   : > { %v1097_v30 = vmul.f32 %v1096_v3, %v3843_v40  ;;  %v509_v32 = vadd.f32 0.014752088, %v508_v60  ;;  %v981_v48 = vmul.f32 %v980_v21, %v3731_v8  ;;  %v3866_v2 = vmin.f32 %v1573_v50, 16.0 }
 0x112   : > { %5175 = vst [vmem:[#allocation16_spill] sm:$0xff] %v3860_v52  ;;  %v1059_v1 = vmul.f32 %v1058_v58, %v3826_v5  ;;  %v548_v43 = vmul.f32 %v547_v56, %v5174_v28  ;;  %v626_v36 = vmul.f32 3.8918573e-05, %v5177_v9  ;;  %v589_v33 = vadd.f32 0.014752088, %v588_v54 }
 0x113   : > { %5176 = vst [vmem:[#allocation11_spill] sm:$0xff] %v3866_v2  ;;  %v1098_v19 = vadd.f32 0.0036580483, %v1097_v30  ;;  %v510_v35 = vmul.f32 %v509_v32, %v3344_v45  ;;  %v3872_v58 = vmul.f32 %v1462_v34, %v3706_v10  ;;  %v3874_v3 = vadd.f32 0.18741608, %v1501_v27 }
 0x114   : > { %v1060_v62 = vadd.f32 0.05243302, %v1059_v1  ;;  %v1535_v60 = vmul.f32 2.1237322e-06, %v3860_v52  ;;  %v549_v26 = vadd.f32 0.014752088, %v548_v43  ;;  %v1021_v21 = vmul.f32 %v1020_v42, %v3741_v47 }
 0x115   : > { %5178 = vst [vmem:[#allocation20_spill] sm:$0xff] %v3872_v58  ;;  %v1099_v50 = vmul.f32 %v1098_v19, %v3843_v40  ;;  %v511_v56 = vadd.f32 0.112945676, %v510_v35  ;;  %v590_v41 = vmul.f32 %v589_v33, %v5173_v25  ;;  %v982_v1 = vadd.f32 0.18741608, %v981_v48  ;;  %v5181_v35 = vld [vmem:[#allocation40_spill] sm:$0xff] }
 0x116   : > { %5179 = vst [vmem:[#allocation87_spill] sm:$0xff] %v3874_v3  ;;  %v1575_v30 = vmul.f32 2.1237322e-06, %v3866_v2  ;;  %v550_v54 = vmul.f32 %v549_v26, %v5174_v28  ;;  %v627_v32 = vadd.f32 0.001143296, %v626_v36  ;;  %v1061_v34 = vmul.f32 %v1060_v62, %v3826_v5 }
 0x117   : > { %v1100_v27 = vadd.f32 0.05243302, %v1099_v50  ;;  %v512_v44 = vmul.f32 %v511_v56, %v3344_v45  ;;  %v591_v3 = vadd.f32 0.112945676, %v590_v41  ;;  %v666_v19 = vmul.f32 3.8918573e-05, %v5180_v13 }
 0x118   : > { %v551_v43 = vadd.f32 0.112945676, %v550_v54  ;;  %v628_v42 = vmul.f32 %v627_v32, %v5177_v9  ;;  %v746_v18 = vmul.f32 3.8918573e-05, %v5181_v35  ;;  %v1022_v33 = vadd.f32 0.18741608, %v1021_v21 }
 0x119   : > { %v1101_v48 = vmul.f32 %v1100_v27, %v3843_v40  ;;  %v513_v58 = vadd.f32 0.4994258, %v512_v44  ;;  %v592_v26 = vmul.f32 %v591_v3, %v5173_v25  ;;  %v667_v50 = vadd.f32 0.001143296, %v666_v19 }
 0x11a   : > { %v552_v36 = vmul.f32 %v551_v43, %v5174_v28  ;;  %v629_v62 = vadd.f32 0.014752088, %v628_v42  ;;  %v747_v22 = vadd.f32 0.001143296, %v746_v18  ;;  %v1062_v56 = vadd.f32 0.18741608, %v1061_v34 }
 0x11b   : > { %v1102_v41 = vadd.f32 0.18741608, %v1101_v48  ;;  %v514_v54 = vmul.f32 %v513_v58, %v3344_v45  ;;  %v593_v32 = vadd.f32 0.4994258, %v592_v26  ;;  %v668_v21 = vmul.f32 %v667_v50, %v5180_v13 }
 0x11c   : > { %v553_v63 = vadd.f32 0.4994258, %v552_v36  ;;  %v630_v31 = vmul.f32 %v629_v62, %v5177_v9  ;;  %v748_v27 = vmul.f32 %v747_v22, %v5181_v35  ;;  %v983_v44 = vmul.f32 %v982_v1, %v3731_v8 }
 0x11d   : > { %v3896_v3 = vmul.f32 0.5, %v3785_v49  ;;  %v3898_v43 = vadd.f32 1.0, %v514_v54  ;;  %v594_v18 = vmul.f32 %v593_v32, %v5173_v25  ;;  %v669_v58 = vadd.f32 0.014752088, %v668_v21 }
 0x11e   : > { %v554_v34 = vmul.f32 %v553_v63, %v5174_v28  ;;  %v631_v45 = vadd.f32 0.112945676, %v630_v31  ;;  %v749_v42 = vadd.f32 0.014752088, %v748_v27  ;;  %v1023_v19 = vmul.f32 %v1022_v33, %v3741_v47 }
 0x11f   : > { %v1063_v48 = vmul.f32 %v1062_v56, %v3826_v5  ;;  %v1103_v22 = vmul.f32 %v1102_v41, %v3843_v40  ;;  %2993 = vrcp.f32 %v3898_v43  ;;  %v1536_v1 = vadd.f32 0.00028619796, %v1535_v60 }
 0x120   : > { %v3906_v26 = vadd.f32 1.0, %v594_v18  ;;  %v3908_v36 = vadd.f32 1.0, %v554_v34  ;;  %v632_v25 = vmul.f32 %v631_v45, %v5177_v9  ;;  %v3911_v62 = vadd.f32 0.00028619796, %v1575_v30  ;;  %v5185_v45 = vld [vmem:[#allocation22_spill] sm:$0xff] }
 0x121   : > { %v3914_v31 = vmul.f32 0.5, %v3793_v38  ;;  %v670_v63 = vmul.f32 %v669_v58, %v5180_v13  ;;  %v750_v28 = vmul.f32 %v749_v42, %v5181_v35  ;;  %v3918_v33 = vadd.f32 1.1283791, %v983_v44 }
 0x122   : > { %5182 = vst [vmem:[#allocation21_spill] sm:$0xff] %v3911_v62  ;;  %v525_v50 = vand.u32 2147483647, %v3898_v43  ;;  %v527_v60 = vand.u32 2147483648, %v3898_v43  ;;  %2995 = vrcp.f32 %v3906_v26  ;;  %v3923_v56 = vadd.f32 1.1283791, %v1023_v19 }
 0x123   : > { %5183 = vst [vmem:[#allocation40_spill] sm:$0xff] %v3914_v31  ;;  %v3925_v41 = vadd.f32 1.1283791, %v1063_v48  ;;  %v3927_v30 = vadd.f32 1.1283791, %v1103_v22  ;;  %2997 = vrcp.f32 %v3908_v36  ;;  %v3931_v54 = vmul.f32 %v1536_v1, %v3860_v52 }
 0x124   : > { %v607_v32 = vand.u32 2147483648, %v3906_v26  ;;  %v633_v21 = vadd.f32 0.4994258, %v632_v25  ;;  %v671_v27 = vadd.f32 0.112945676, %v670_v63  ;;  %vm521_vm1 = vweird.f32 %v3898_v43 }
 0x125   : > { %5184 = vst [vmem:[#allocation88_spill] sm:$0xff] %v3931_v54  ;;  %v2994_v44 = vpop.eup %2993  ;;  %v605_v18 = vand.u32 2147483647, %v3906_v26  ;;  %v751_v34 = vadd.f32 0.112945676, %v750_v28  ;;  %vm3938_vm2 = vcmp.eq.f32.partialorder %v525_v50, 8.507059e+37  ;;  %vm601_vm3 = vweird.f32 %v3906_v26 }
 0x126   : > { %v706_v58 = vmul.f32 3.8918573e-05, %v5185_v45  ;;  %v517_v42 = vmul.f32 %v2994_v44, %v3898_v43  ;;  %v528_v48 = vor.u32 1.1754944e-38, %v527_v60  ;;  %v565_v22 = vand.u32 2147483647, %v3908_v36 }
 0x127   : > { %v634_v1 = vmul.f32 %v633_v21, %v5177_v9  ;;  %v567_v25 = vand.u32 2147483648, %v3908_v36  ;;  %v672_v63 = vmul.f32 %v671_v27, %v5180_v13  ;;  %v752_v28 = vmul.f32 %v751_v34, %v5181_v35 }
 0x128   : > { %v2996_v49 = vpop.eup %2995  ;;  %v518_v38 = vsub.f32 1.0, %v517_v42  ;;  %vm522_vm4 = vweird.f32 %v2994_v44  ;;  %v608_v50 = vor.u32 1.1754944e-38, %v607_v32  ;;  %vm561_vm5 = vweird.f32 %v3908_v36  ;;  %v5192_v32 = vld [vmem:[#allocation41_spill] sm:$0xff] }
 0x129   : > { %v3949_v10 = vadd.f32 1.0, %v634_v1  ;;  %v2998_v60 = vpop.eup %2997  ;;  %v597_v52 = vmul.f32 %v2996_v49, %v3906_v26  ;;  %vm3952_vm6 = vcmp.eq.f32.partialorder %v605_v18, 8.507059e+37  ;;  %v673_v21 = vadd.f32 0.4994258, %v672_v63  ;;  %vm523_vm8 = vmor %vm521_vm1, %vm522_vm4 }
 0x12a   : > { %v753_v54 = vadd.f32 0.4994258, %v752_v28  ;;  %v707_v27 = vadd.f32 0.001143296, %v706_v58  ;;  %v519_v62 = vmul.f32 %v2994_v44, %v518_v38  ;;  %v557_v34 = vmul.f32 %v2998_v60, %v3908_v36 }
 0x12b   : > { %vm3957_vm7 = vcmp.eq.f32.partialorder %v565_v22, 8.507059e+37  ;;  %2999 = vrcp.f32 %v3949_v10  ;;  %v786_v1 = vmul.f32 3.8918573e-05, %v5192_v32  ;;  %v598_v2 = vsub.f32 1.0, %v597_v52 }
 0x12c   : > { %v568_v23 = vor.u32 1.1754944e-38, %v567_v25  ;;  %v3964_v18 = vmul.f32 3.8918573e-05, %v3566_v4  ;;  %v3967_v63 = vmul.f32 3.8918573e-05, %v3659_v61  ;;  %v520_v58 = vadd.f32 %v2994_v44, %v519_v62 }
 0x12d   : > { %v558_v38 = vsub.f32 1.0, %v557_v34  ;;  %v674_v28 = vmul.f32 %v673_v21, %v5180_v13  ;;  %v754_v22 = vmul.f32 %v753_v54, %v5181_v35  ;;  %v599_v31 = vmul.f32 %v2996_v49, %v598_v2  ;;  %v5193_v2 = vld [vmem:[#allocation38_spill] sm:$0xff] }
 0x12e   : > { %vm602_vm9 = vweird.f32 %v2996_v49  ;;  %v645_v52 = vand.u32 2147483647, %v3949_v10  ;;  %v708_v25 = vmul.f32 %v707_v27, %v5185_v45  ;;  %v524_v16 = vsel %vm523_vm8, %v2994_v44, %v520_v58  ;;  %v5196_v58 = vld [vmem:[#allocation55_spill] sm:$0xff] }
 0x12f   : > { %v559_v53 = vmul.f32 %v2998_v60, %v558_v38  ;;  %vm562_vm10 = vweird.f32 %v2998_v60  ;;  %v3976_v46 = vadd.f32 1.0, %v674_v28  ;;  %v529_v13 = vsel %vm3938_vm2, %v528_v48, %v524_v16  ;;  %vm603_vm12 = vmor %vm601_vm3, %vm602_vm9 }
 0x130   : > { %v600_v62 = vadd.f32 %v2996_v49, %v599_v31  ;;  %vm641_vm11 = vweird.f32 %v3949_v10  ;;  %v647_v35 = vand.u32 2147483648, %v3949_v10  ;;  %v530_v54 = vmul.f32 %v529_v13, %v5193_v2  ;;  %vm563_vm13 = vmor %vm561_vm5, %vm562_vm10 }
 0x131   : > { %v3000_v43 = vpop.eup %2999  ;;  %v560_v21 = vadd.f32 %v2998_v60, %v559_v53  ;;  %3001 = vrcp.f32 %v3976_v46  ;;  %v3986_v44 = vadd.f32 1.0, %v754_v22  ;;  %vm3991_vm14 = vcmp.eq.f32.partialorder %v645_v52, 8.507059e+37  ;;  %v5197_v52 = vld [vmem:[#allocation46_spill] sm:$0xff] }
 0x132   : > { %v604_v27 = vsel %vm603_vm12, %v2996_v49, %v600_v62  ;;  %v637_v16 = vmul.f32 %v3000_v43, %v3949_v10  ;;  %v709_v19 = vadd.f32 0.014752088, %v708_v25  ;;  %v2723_v48 = vclamps-f32 %v530_v54, 1.0 }
 0x133   : > { %v609_v26 = vsel %vm3952_vm6, %v608_v50, %v604_v27  ;;  %v564_v53 = vsel %vm563_vm13, %v2998_v60, %v560_v21  ;;  %v687_v34 = vand.u32 2147483648, %v3976_v46  ;;  %v685_v28 = vand.u32 2147483647, %v3976_v46 }
 0x134   : > { %v610_v38 = vmul.f32 %v609_v26, %v5196_v58  ;;  %v569_v49 = vsel %vm3957_vm7, %v568_v23, %v564_v53  ;;  %v638_v36 = vsub.f32 1.0, %v637_v16  ;;  %v1613_v22 = vadd.f32 1.0, %v2723_v48  ;;  %v5200_v48 = vld [vmem:[#allocation24_spill] sm:$0xff] }
 0x135   : > { %v570_v13 = vmul.f32 %v569_v49, %v5197_v52  ;;  %v648_v62 = vor.u32 1.1754944e-38, %v647_v35  ;;  %3003 = vrcp.f32 %v3986_v44  ;;  %vm642_vm15 = vweird.f32 %v3000_v43 }
 0x136   : > { %v2725_v25 = vclamps-f32 %v610_v38, 1.0  ;;  %v639_v9 = vmul.f32 %v3000_v43, %v638_v36  ;;  %v787_v50 = vadd.f32 0.001143296, %v786_v1  ;;  %vm681_vm0 = vweird.f32 %v3976_v46  ;;  %vm643_vm2 = vmor %vm641_vm11, %vm642_vm15 }
 0x137   : > { %v3002_v60 = vpop.eup %3001  ;;  %v2724_v2 = vclamps-f32 %v570_v13, 1.0  ;;  %v688_v54 = vor.u32 1.1754944e-38, %v687_v34  ;;  %v710_v23 = vmul.f32 %v709_v19, %v5185_v45  ;;  %vm4007_vm1 = vcmp.eq.f32.partialorder %v685_v28, 8.507059e+37  ;;  %v5201_v19 = vld [vmem:[#allocation29_spill] sm:$0xff] }
 0x138   : > { %v1615_v42 = vadd.f32 1.0, %v2725_v25  ;;  %v640_v21 = vadd.f32 %v3000_v43, %v639_v9  ;;  %v677_v27 = vmul.f32 %v3002_v60, %v3976_v46  ;;  %v765_v35 = vand.u32 2147483647, %v3986_v44  ;;  %v5202_v25 = vld [vmem:[#allocation56_spill] sm:$0xff] }
 0x139   : > { %v1641_v26 = vmul.f32 %v1613_v22, %v5200_v48  ;;  %v1614_v1 = vadd.f32 1.0, %v2724_v2  ;;  %v767_v53 = vand.u32 2147483648, %v3986_v44  ;;  %v711_v34 = vadd.f32 0.112945676, %v710_v23  ;;  %v5203_v23 = vld [vmem:[#allocation25_spill] sm:$0xff] }
 0x13a   : > { %v1643_v58 = vmul.f32 %v1615_v42, %v5201_v19  ;;  %v644_v38 = vsel %vm643_vm2, %v3000_v43, %v640_v21  ;;  %v678_v49 = vsub.f32 1.0, %v677_v27  ;;  %vm761_vm3 = vweird.f32 %v3986_v44 }
 0x13b   : > { %v788_v36 = vmul.f32 %v787_v50, %v5192_v32  ;;  %v3004_v28 = vpop.eup %3003  ;;  %v649_v52 = vsel %vm3991_vm14, %v648_v62, %v644_v38  ;;  %vm682_vm4 = vweird.f32 %v3002_v60  ;;  %v712_v10 = vmul.f32 %v711_v34, %v5185_v45 }
 0x13c   : > { %v827_v22 = vadd.f32 0.001143296, %v3964_v18  ;;  %v1669_v13 = vpack.c.bf16 %v1643_v58, %v1641_v26  ;;  %v650_v9 = vmul.f32 %v649_v52, %v5202_v25  ;;  %v679_v2 = vmul.f32 %v3002_v60, %v678_v49  ;;  %vm683_vm5 = vmor %vm681_vm0, %vm682_vm4 }
 0x13d   : > { %v757_v43 = vmul.f32 %v3004_v28, %v3986_v44  ;;  %v1642_v42 = vmul.f32 %v1614_v1, %v5203_v23  ;;  %v713_v21 = vadd.f32 0.4994258, %v712_v10  ;;  %v789_v27 = vadd.f32 0.014752088, %v788_v36  ;;  %v5204_v10 = vld [vmem:[#allocation30_spill] sm:$0xff] }
 0x13e   : > { %v828_v50 = vmul.f32 %v827_v22, %v3566_v4  ;;  %1888 = vmatmul.bf16.vlgmr.msrb.gmra.mxu2 %v1669_v13  ;;  %v2726_v31 = vclamps-f32 %v650_v9, 1.0  ;;  %1976 = vmatmul.bf16.vlgmr.msrb.gmra.mxu0 %v1669_v13  ;;  %v680_v62 = vadd.f32 %v3002_v60, %v679_v2  ;;  %v907_v34 = vadd.f32 0.001143296, %v3967_v63  ;;  %v5205_v13 = vld [vmem:[#allocation71_spill] sm:$0xff] }
 0x13f   : > { %v758_v48 = vsub.f32 1.0, %v757_v43  ;;  %vm762_vm6 = vweird.f32 %v3004_v28  ;;  %v714_v18 = vmul.f32 %v713_v21, %v5185_v45  ;;  %v790_v26 = vmul.f32 %v789_v27, %v5192_v32  ;;  %v5206_v21 = vld [vmem:[#allocation68_spill] sm:$0xff] }
 0x140   : > { %v829_v1 = vadd.f32 0.014752088, %v828_v50  ;;  %v1616_v19 = vadd.f32 1.0, %v2726_v31  ;;  %v684_v58 = vsel %vm683_vm5, %v3002_v60, %v680_v62  ;;  %v908_v49 = vmul.f32 %v907_v34, %v3659_v61  ;;  %vm763_vm7 = vmor %vm761_vm3, %vm762_vm6 }
 0x141   : > { %v759_v38 = vmul.f32 %v3004_v28, %v758_v48  ;;  %v689_v36 = vsel %vm4007_vm1, %v688_v54, %v684_v58  ;;  %v4036_v52 = vadd.f32 1.0, %v714_v18  ;;  %v791_v63 = vadd.f32 0.112945676, %v790_v26 }
 0x142   : > { %v830_v46 = vmul.f32 %v829_v1, %v3566_v4  ;;  %v1644_v22 = vmul.f32 %v1616_v19, %v5204_v10  ;;  %v690_v45 = vmul.f32 %v689_v36, %v5205_v13  ;;  %v909_v9 = vadd.f32 0.014752088, %v908_v49 }
 0x143   : > { %v760_v25 = vadd.f32 %v3004_v28, %v759_v38  ;;  %vm766_vm8 = vcmp.eq.f32.partialorder %v765_v35, 8.507059e+37  ;;  %v768_v60 = vor.u32 1.1754944e-38, %v767_v53  ;;  %3005 = vrcp.f32 %v4036_v52 }
 0x144   : > { %v866_v54 = vmul.f32 3.8918573e-05, %v3577_v59  ;;  %v1670_v16 = vpack.c.bf16 %v1644_v22, %v1642_v42  ;;  %v2727_v2 = vclamps-f32 %v690_v45, 1.0  ;;  %v792_v23 = vmul.f32 %v791_v63, %v5192_v32  ;;  %v5208_v22 = vld [vmem:[#allocation48_spill] sm:$0xff] }
 0x145   : > { %v764_v43 = vsel %vm763_vm7, %v3004_v28, %v760_v25  ;;  %v4049_v27 = vmul.f32 %v3918_v33, %v5206_v21  ;;  %v4053_v50 = vmul.f32 %v3923_v56, %v3726_v24  ;;  %v831_v35 = vadd.f32 0.112945676, %v830_v46  ;;  %v5207_v46 = vld [vmem:[#allocation34_spill] sm:$0xff] }
 0x146   : > { %v769_v44 = vsel %vm766_vm8, %v768_v60, %v764_v43  ;;  %v4057_v53 = vmul.f32 %v3925_v41, %v3800_v15  ;;  %1932 = vmatmul.bf16.vlgmr.msrb.gmra.mxu3 %v1670_v16  ;;  %2020 = vmatmul.bf16.vlgmr.msrb.gmra.mxu1 %v1670_v16  ;;  %v793_v42 = vadd.f32 0.4994258, %v792_v23  ;;  %v910_v31 = vmul.f32 %v909_v9, %v3659_v61 }
 0x147   : > { %v770_v28 = vmul.f32 %v769_v44, %v3762_v12  ;;  %v4063_v33 = vmul.f32 %v3927_v30, %v3821_v20  ;;  %v832_v24 = vmul.f32 %v831_v35, %v3566_v4  ;;  %v867_v56 = vadd.f32 0.001143296, %v866_v54 }
 0x148   : > { %v946_v62 = vmul.f32 3.8918573e-05, %v3670_v7  ;;  %v1617_v34 = vadd.f32 1.0, %v2727_v2  ;;  %v794_v15 = vmul.f32 %v793_v42, %v5192_v32  ;;  %v911_v41 = vadd.f32 0.112945676, %v910_v31 }
 0x149   : > { %v2729_v48 = vclamps-f32 %v770_v28, 1.0  ;;  %v3006_v18 = vpop.eup %3005  ;;  %v725_v12 = vand.u32 2147483647, %v4036_v52  ;;  %v833_v26 = vadd.f32 0.4994258, %v832_v24  ;;  %v868_v1 = vmul.f32 %v867_v56, %v3577_v59 }
 0x14a   : > { %v947_v19 = vadd.f32 0.001143296, %v946_v62  ;;  %v717_v20 = vmul.f32 %v3006_v18, %v4036_v52  ;;  %v4071_v30 = vadd.f32 1.0, %v794_v15  ;;  %v986_v38 = vmul.f32 3.8918573e-05, %v3731_v8 }
 0x14b   : > { %v1619_v58 = vadd.f32 1.0, %v2729_v48  ;;  %v834_v49 = vmul.f32 %v833_v26, %v3566_v4  ;;  %v912_v36 = vmul.f32 %v911_v41, %v3659_v61  ;;  %v869_v32 = vadd.f32 0.014752088, %v868_v1 }
 0x14c   : > { %v948_v63 = vmul.f32 %v947_v19, %v3670_v7  ;;  %v1645_v10 = vmul.f32 %v1617_v34, %v5207_v46  ;;  %v718_v45 = vsub.f32 1.0, %v717_v20  ;;  %3007 = vrcp.f32 %v4071_v30 }
 0x14d   : > { %v1647_v13 = vmul.f32 %v1619_v58, %v5208_v22  ;;  %vm722_vm9 = vweird.f32 %v3006_v18  ;;  %v727_v25 = vand.u32 2147483648, %v4036_v52  ;;  %v4081_v9 = vadd.f32 1.0, %v834_v49 }
 0x14e   : > { %v913_v60 = vadd.f32 0.4994258, %v912_v36  ;;  %v719_v4 = vmul.f32 %v3006_v18, %v718_v45  ;;  %v870_v16 = vmul.f32 %v869_v32, %v3577_v59  ;;  %v949_v2 = vadd.f32 0.014752088, %v948_v63 }
 0x14f   : > { %v1671_v54 = vpack.c.bf16 %v1647_v13, %v1645_v10  ;;  %vm721_vm10 = vweird.f32 %v4036_v52  ;;  %v805_v43 = vand.u32 2147483647, %v4071_v30  ;;  %v807_v23 = vand.u32 2147483648, %v4071_v30 }
 0x150   : > { %3009 = vrcp.f32 %v4081_v9  ;;  %v720_v21 = vadd.f32 %v3006_v18, %v719_v4  ;;  %vm726_vm11 = vcmp.eq.f32.partialorder %v725_v12, 8.507059e+37  ;;  %v914_v44 = vmul.f32 %v913_v60, %v3659_v61  ;;  %vm723_vm12 = vmor %vm721_vm10, %vm722_vm9 }
 0x151   : > { %1893 = vmatmul.bf16.gmra.mxu2 %v1671_v54  ;;  %1981 = vmatmul.bf16.gmra.mxu0 %v1671_v54  ;;  %v987_v35 = vadd.f32 0.001143296, %v986_v38  ;;  %v728_v28 = vor.u32 1.1754944e-38, %v727_v25  ;;  %vm801_vm13 = vweird.f32 %v4071_v30  ;;  %v871_v42 = vadd.f32 0.112945676, %v870_v16 }
 0x152   : > { %v950_v52 = vmul.f32 %v949_v2, %v3670_v7  ;;  %v3008_v31 = vpop.eup %3007  ;;  %v724_v24 = vsel %vm723_vm12, %v3006_v18, %v720_v21  ;;  %v845_v56 = vand.u32 2147483647, %v4081_v9  ;;  %v847_v62 = vand.u32 2147483648, %v4081_v9 }
 0x153   : > { %v4094_v48 = vadd.f32 1.0, %v914_v44  ;;  %v729_v34 = vsel %vm726_vm11, %v728_v28, %v724_v24  ;;  %v797_v61 = vmul.f32 %v3008_v31, %v4071_v30  ;;  %vm4097_vm14 = vcmp.eq.f32.partialorder %v805_v43, 8.507059e+37 }
 0x154   : > { %v808_v41 = vor.u32 1.1754944e-38, %v807_v23  ;;  %v872_v12 = vmul.f32 %v871_v42, %v3577_v59  ;;  %v730_v26 = vmul.f32 %v729_v34, %v3745_v6  ;;  %v988_v18 = vmul.f32 %v987_v35, %v3731_v8 }
 0x155   : > { %3011 = vrcp.f32 %v4094_v48  ;;  %v1066_v1 = vmul.f32 3.8918573e-05, %v3826_v5  ;;  %v798_v58 = vsub.f32 1.0, %v797_v61  ;;  %vm841_vm15 = vweird.f32 %v4081_v9 }
 0x156   : > { %v3010_v19 = vpop.eup %3009  ;;  %v873_v20 = vadd.f32 0.4994258, %v872_v12  ;;  %v951_v38 = vadd.f32 0.112945676, %v950_v52  ;;  %vm802_vm0 = vweird.f32 %v3008_v31  ;;  %vm4108_vm1 = vcmp.eq.f32.partialorder %v845_v56, 8.507059e+37 }
 0x157   : > { %v837_v49 = vmul.f32 %v3010_v19, %v4081_v9  ;;  %v848_v6 = vor.u32 1.1754944e-38, %v847_v62  ;;  %v799_v32 = vmul.f32 %v3008_v31, %v798_v58  ;;  %v925_v63 = vand.u32 2147483647, %v4094_v48  ;;  %vm803_vm2 = vmor %vm801_vm13, %vm802_vm0 }
 0x158   : > { %v874_v46 = vmul.f32 %v873_v20, %v3577_v59  ;;  %v952_v10 = vmul.f32 %v951_v38, %v3670_v7  ;;  %v2728_v22 = vclamps-f32 %v730_v26, 1.0  ;;  %v989_v45 = vadd.f32 0.014752088, %v988_v18  ;;  %v5215_v18 = vld [vmem:[#allocation35_spill] sm:$0xff] }
 0x159   : > { %v838_v13 = vsub.f32 1.0, %v837_v49  ;;  %v1067_v25 = vadd.f32 0.001143296, %v1066_v1  ;;  %v800_v60 = vadd.f32 %v3008_v31, %v799_v32  ;;  %v927_v54 = vand.u32 2147483648, %v4094_v48 }
 0x15a   : > { %v4116_v4 = vadd.f32 1.0, %v874_v46  ;;  %v953_v16 = vadd.f32 0.4994258, %v952_v10  ;;  %vm842_vm3 = vweird.f32 %v3010_v19  ;;  %v990_v59 = vmul.f32 %v989_v45, %v3731_v8 }
 0x15b   : > { %v3012_v2 = vpop.eup %3011  ;;  %v839_v43 = vmul.f32 %v3010_v19, %v838_v13  ;;  %v1068_v23 = vmul.f32 %v1067_v25, %v3826_v5  ;;  %v804_v21 = vsel %vm803_vm2, %v3008_v31, %v800_v60  ;;  %vm921_vm4 = vweird.f32 %v4094_v48  ;;  %vm843_vm6 = vmor %vm841_vm15, %vm842_vm3 }
 0x15c   : > { %v917_v44 = vmul.f32 %v3012_v2, %v4094_v48  ;;  %3013 = vrcp.f32 %v4116_v4  ;;  %v809_v35 = vsel %vm4097_vm14, %v808_v41, %v804_v21  ;;  %v1618_v28 = vadd.f32 1.0, %v2728_v22 }
 0x15d   : > { %v840_v42 = vadd.f32 %v3010_v19, %v839_v43  ;;  %vm4128_vm5 = vcmp.eq.f32.partialorder %v925_v63, 8.507059e+37  ;;  %v810_v52 = vmul.f32 %v809_v35, %v3765_v0  ;;  %v928_v24 = vor.u32 1.1754944e-38, %v927_v54 }
 0x15e   : > { %v918_v31 = vsub.f32 1.0, %v917_v44  ;;  %v954_v56 = vmul.f32 %v953_v16, %v3670_v7  ;;  %v991_v34 = vadd.f32 0.112945676, %v990_v59  ;;  %v1069_v61 = vadd.f32 0.014752088, %v1068_v23 }
 0x15f   : > { %v844_v62 = vsel %vm843_vm6, %v3010_v19, %v840_v42  ;;  %v1026_v15 = vmul.f32 3.8918573e-05, %v3741_v47  ;;  %v2730_v41 = vclamps-f32 %v810_v52, 1.0  ;;  %vm922_vm7 = vweird.f32 %v3012_v2 }
 0x160   : > { %v849_v12 = vsel %vm4108_vm1, %v848_v6, %v844_v62  ;;  %v919_v26 = vmul.f32 %v3012_v2, %v918_v31  ;;  %v1646_v0 = vmul.f32 %v1618_v28, %v5215_v18  ;;  %v885_v1 = vand.u32 2147483647, %v4116_v4  ;;  %vm923_vm8 = vmor %vm921_vm4, %vm922_vm7  ;;  %v5216_v6 = vld [vmem:[#allocation51_spill] sm:$0xff] }
 0x161   : > { %v850_v9 = vmul.f32 %v849_v12, %v3788_v14  ;;  %v4142_v58 = vadd.f32 1.0, %v954_v56  ;;  %v1620_v19 = vadd.f32 1.0, %v2730_v41  ;;  %v887_v38 = vand.u32 2147483648, %v4116_v4 }
 0x162   : > { %v3014_v7 = vpop.eup %3013  ;;  %v920_v20 = vadd.f32 %v3012_v2, %v919_v26  ;;  %v992_v49 = vmul.f32 %v991_v34, %v3731_v8  ;;  %v1070_v14 = vmul.f32 %v1069_v61, %v3826_v5  ;;  %v1027_v10 = vadd.f32 0.001143296, %v1026_v15 }
 0x163   : > { %v2731_v32 = vclamps-f32 %v850_v9, 1.0  ;;  %v877_v36 = vmul.f32 %v3014_v7, %v4116_v4  ;;  %3015 = vrcp.f32 %v4142_v58  ;;  %v1648_v63 = vmul.f32 %v1620_v19, %v5216_v6 }
 0x164   : > { %v924_v46 = vsel %vm923_vm8, %v3012_v2, %v920_v20  ;;  %v1106_v22 = vmul.f32 3.8918573e-05, %v3843_v40  ;;  %vm881_vm9 = vweird.f32 %v4116_v4  ;;  %vm4156_vm10 = vcmp.eq.f32.partialorder %v885_v1, 8.507059e+37  ;;  %v5221_v1 = vld [vmem:[#allocation31_spill] sm:$0xff] }
 0x165   : > { %v929_v13 = vsel %vm4128_vm5, %v928_v24, %v924_v46  ;;  %v878_v45 = vsub.f32 1.0, %v877_v36  ;;  %v1672_v25 = vpack.c.bf16 %v1648_v63, %v1646_v0  ;;  %v1621_v54 = vadd.f32 1.0, %v2731_v32  ;;  %v5219_v24 = vld [vmem:[#allocation59_spill] sm:$0xff] }
 0x166   : > { %v930_v60 = vmul.f32 %v929_v13, %v3835_v57  ;;  %v993_v16 = vadd.f32 0.4994258, %v992_v49  ;;  %vm882_vm11 = vweird.f32 %v3014_v7  ;;  %v888_v2 = vor.u32 1.1754944e-38, %v887_v38  ;;  %v5220_v0 = vld [vmem:[#allocation15_spill] sm:$0xff] }
 0x167   : > { %v879_v43 = vmul.f32 %v3014_v7, %v878_v45  ;;  %v1071_v59 = vadd.f32 0.112945676, %v1070_v14  ;;  %1937 = vmatmul.bf16.gmra.mxu3 %v1672_v25  ;;  %2025 = vmatmul.bf16.gmra.mxu1 %v1672_v25  ;;  %v1028_v44 = vmul.f32 %v1027_v10, %v3741_v47  ;;  %v1107_v35 = vadd.f32 0.001143296, %v1106_v22  ;;  %vm883_vm12 = vmor %vm881_vm9, %vm882_vm11  ;;  %v5222_v45 = vld [vmem:[#allocation17_spill] sm:$0xff] }
 0x168   : > { %v2733_v23 = vclamps-f32 %v930_v60, 1.0  ;;  %v994_v21 = vmul.f32 %v993_v16, %v3731_v8  ;;  %v965_v30 = vand.u32 2147483647, %v4142_v58  ;;  %v967_v57 = vand.u32 2147483648, %v4142_v58 }
 0x169   : > { %v3016_v28 = vpop.eup %3015  ;;  %v880_v42 = vadd.f32 %v3014_v7, %v879_v43  ;;  %v1072_v52 = vmul.f32 %v1071_v59, %v3826_v5  ;;  %v1649_v56 = vmul.f32 %v1621_v54, %v5219_v24  ;;  %v1029_v15 = vadd.f32 0.014752088, %v1028_v44 }
 0x16a   : > { %v1623_v31 = vadd.f32 1.0, %v2733_v23  ;;  %v957_v8 = vmul.f32 %v3016_v28, %v4142_v58  ;;  %v4171_v62 = vadd.f32 1.0, %v994_v21  ;;  %v1108_v41 = vmul.f32 %v1107_v35, %v3843_v40 }
 0x16b   : > { %v884_v34 = vsel %vm883_vm12, %v3014_v7, %v880_v42  ;;  %v1073_v61 = vadd.f32 0.4994258, %v1072_v52  ;;  %vm962_vm13 = vweird.f32 %v3016_v28  ;;  %v1146_v9 = vmul.f32 3.8918573e-05, %v5220_v0 }
 0x16c   : > { %v1651_v12 = vmul.f32 %v1623_v31, %v3777_v17  ;;  %v889_v26 = vsel %vm4156_vm10, %v888_v2, %v884_v34  ;;  %v958_v18 = vsub.f32 1.0, %v957_v8  ;;  %3017 = vrcp.f32 %v4171_v62 }
 0x16d   : > { %v890_v4 = vmul.f32 %v889_v26, %v3796_v51  ;;  %v1226_v19 = vmul.f32 3.8918573e-05, %v5221_v1  ;;  %v1074_v38 = vmul.f32 %v1073_v61, %v3826_v5  ;;  %v1030_v49 = vmul.f32 %v1029_v15, %v3741_v47  ;;  %v5225_v15 = vld [vmem:[#allocation67_spill] sm:$0xff] }
 0x16e   : > { %v1673_v7 = vpack.c.bf16 %v1651_v12, %v1649_v56  ;;  %v959_v20 = vmul.f32 %v3016_v28, %v958_v18  ;;  %vm961_vm14 = vweird.f32 %v4142_v58  ;;  %v1005_v17 = vand.u32 2147483647, %v4171_v62 }
 0x16f   : > { %v1007_v32 = vand.u32 2147483648, %v4171_v62  ;;  %v1109_v36 = vadd.f32 0.014752088, %v1108_v41  ;;  %v2732_v51 = vclamps-f32 %v890_v4, 1.0  ;;  %v4186_v6 = vadd.f32 1.0, %v1074_v38  ;;  %vm963_vm15 = vmor %vm961_vm14, %vm962_vm13 }
 0x170   : > { %1898 = vmatmul.bf16.gmra.mxu2 %v1673_v7  ;;  %v960_v14 = vadd.f32 %v3016_v28, %v959_v20  ;;  %1986 = vmatmul.bf16.gmra.mxu0 %v1673_v7  ;;  %v1031_v63 = vadd.f32 0.112945676, %v1030_v49  ;;  %v968_v46 = vor.u32 1.1754944e-38, %v967_v57  ;;  %v1147_v10 = vadd.f32 0.001143296, %v1146_v9 }
 0x171   : > { %v1110_v5 = vmul.f32 %v1109_v36, %v3843_v40  ;;  %v1227_v22 = vadd.f32 0.001143296, %v1226_v19  ;;  %vm966_vm0 = vcmp.eq.f32.partialorder %v965_v30, 8.507059e+37  ;;  %3019 = vrcp.f32 %v4186_v6 }
 0x172   : > { %v3018_v58 = vpop.eup %3017  ;;  %v964_v13 = vsel %vm963_vm15, %v3016_v28, %v960_v14  ;;  %v1186_v48 = vmul.f32 3.8918573e-05, %v5222_v45  ;;  %vm1001_vm1 = vweird.f32 %v4171_v62  ;;  %vm4194_vm2 = vcmp.eq.f32.partialorder %v1005_v17, 8.507059e+37 }
 0x173   : > { %v969_v25 = vsel %vm966_vm0, %v968_v46, %v964_v13  ;;  %v997_v60 = vmul.f32 %v3018_v58, %v4171_v62  ;;  %v1622_v43 = vadd.f32 1.0, %v2732_v51  ;;  %v1008_v2 = vor.u32 1.1754944e-38, %v1007_v32 }
 0x174   : > { %v970_v16 = vmul.f32 %v969_v25, %v3847_v11  ;;  %v1032_v59 = vmul.f32 %v1031_v63, %v3741_v47  ;;  %v1111_v21 = vadd.f32 0.112945676, %v1110_v5  ;;  %v1148_v44 = vmul.f32 %v1147_v10, %v5220_v0 }
 0x175   : > { %v998_v23 = vsub.f32 1.0, %v997_v60  ;;  %v1228_v35 = vmul.f32 %v1227_v22, %v5221_v1  ;;  %vm1002_vm3 = vweird.f32 %v3018_v58  ;;  %v1187_v30 = vadd.f32 0.001143296, %v1186_v48 }
 0x176   : > { %v2734_v28 = vclamps-f32 %v970_v16, 1.0  ;;  %v1033_v42 = vadd.f32 0.4994258, %v1032_v59  ;;  %v1112_v52 = vmul.f32 %v1111_v21, %v3843_v40  ;;  %v1149_v31 = vadd.f32 0.014752088, %v1148_v44  ;;  %vm1003_vm4 = vmor %vm1001_vm1, %vm1002_vm3 }
 0x177   : > { %v999_v57 = vmul.f32 %v3018_v58, %v998_v23  ;;  %v1229_v24 = vadd.f32 0.014752088, %v1228_v35  ;;  %v3020_v11 = vpop.eup %3019  ;;  %v1085_v8 = vand.u32 2147483647, %v4186_v6  ;;  %v1188_v61 = vmul.f32 %v1187_v30, %v5222_v45  ;;  %v5235_v35 = vld [vmem:[#allocation82_spill] sm:$0xff] }
 0x178   : > { %v1624_v56 = vadd.f32 1.0, %v2734_v28  ;;  %v1034_v34 = vmul.f32 %v1033_v42, %v3741_v47  ;;  %v1650_v41 = vmul.f32 %v1622_v43, %v5225_v15  ;;  %v1077_v26 = vmul.f32 %v3020_v11, %v4186_v6 }
 0x179   : > { %v1000_v12 = vadd.f32 %v3018_v58, %v999_v57  ;;  %v1113_v18 = vadd.f32 0.4994258, %v1112_v52  ;;  %v1150_v19 = vmul.f32 %v1149_v31, %v5220_v0  ;;  %v1230_v47 = vmul.f32 %v1229_v24, %v5221_v1 }
 0x17a   : > { %v1652_v4 = vmul.f32 %v1624_v56, %v3782_v29  ;;  %v4212_v9 = vadd.f32 1.0, %v1034_v34  ;;  %v1078_v20 = vsub.f32 1.0, %v1077_v26  ;;  %v1189_v49 = vadd.f32 0.014752088, %v1188_v61 }
 0x17b   : > { %v1004_v7 = vsel %vm1003_vm4, %v3018_v58, %v1000_v12  ;;  %v1114_v38 = vmul.f32 %v1113_v18, %v3843_v40  ;;  %v1087_v29 = vand.u32 2147483648, %v4186_v6  ;;  %vm1082_vm5 = vweird.f32 %v3020_v11  ;;  %v5226_v58 = vld [vmem:[#allocation36_spill] sm:$0xff] }
 0x17c   : > { %v1674_v17 = vpack.c.bf16 %v1652_v4, %v1650_v41  ;;  %v1009_v32 = vsel %vm4194_vm2, %v1008_v2, %v1004_v7  ;;  %3021 = vrcp.f32 %v4212_v9  ;;  %v1079_v36 = vmul.f32 %v3020_v11, %v1078_v20 }
 0x17d   : > { %v1010_v62 = vmul.f32 %v1009_v32, %v4049_v27  ;;  %v1047_v51 = vand.u32 2147483648, %v4212_v9  ;;  %v4223_v14 = vadd.f32 1.0, %v1114_v38  ;;  %v1151_v40 = vadd.f32 0.112945676, %v1150_v19 }
 0x17e   : > { %1942 = vmatmul.bf16.gmra.mxu3 %v1674_v17  ;;  %2030 = vmatmul.bf16.gmra.mxu1 %v1674_v17  ;;  %v1231_v63 = vadd.f32 0.112945676, %v1230_v47  ;;  %v1190_v46 = vmul.f32 %v1189_v49, %v5222_v45  ;;  %v1080_v10 = vadd.f32 %v3020_v11, %v1079_v36  ;;  %vm1081_vm6 = vweird.f32 %v4186_v6 }
 0x17f   : > { %v2735_v5 = vclamps-f32 %v1010_v62, 1.0  ;;  %v1045_v22 = vand.u32 2147483647, %v4212_v9  ;;  %vm1083_vm7 = vmor %vm1081_vm6, %vm1082_vm5  ;;  %vm1086_vm8 = vcmp.eq.f32.partialorder %v1085_v8, 8.507059e+37  ;;  %v1088_v27 = vor.u32 1.1754944e-38, %v1087_v29 }
 0x180   : > { %3023 = vrcp.f32 %v4223_v14  ;;  %v1266_v13 = vmul.f32 3.8918573e-05, %v5226_v58  ;;  %v1084_v48 = vsel %vm1083_vm7, %v3020_v11, %v1080_v10  ;;  %vm1041_vm9 = vweird.f32 %v4212_v9 }
 0x181   : > { %v1625_v25 = vadd.f32 1.0, %v2735_v5  ;;  %v1152_v60 = vmul.f32 %v1151_v40, %v5220_v0  ;;  %v1232_v54 = vmul.f32 %v1231_v63, %v5221_v1  ;;  %v1089_v43 = vsel %vm1086_vm8, %v1088_v27, %v1084_v48  ;;  %v5248_v48 = vld [vmem:[#allocation21_spill] sm:$0xff] }
 0x182   : > { %v3022_v16 = vpop.eup %3021  ;;  %v1048_v6 = vor.u32 1.1754944e-38, %v1047_v51  ;;  %v1125_v2 = vand.u32 2147483647, %v4223_v14  ;;  %v1191_v59 = vadd.f32 0.112945676, %v1190_v46  ;;  %v1090_v23 = vmul.f32 %v1089_v43, %v4057_v53 }
 0x183   : > { %v1653_v21 = vmul.f32 %v1625_v25, %v3803_v37  ;;  %v1037_v44 = vmul.f32 %v3022_v16, %v4212_v9  ;;  %vm4237_vm10 = vcmp.eq.f32.partialorder %v1045_v22, 8.507059e+37  ;;  %v1127_v28 = vand.u32 2147483648, %v4223_v14 }
 0x184   : > { %v1153_v42 = vadd.f32 0.4994258, %v1152_v60  ;;  %v1233_v30 = vadd.f32 0.4994258, %v1232_v54  ;;  %v1192_v57 = vmul.f32 %v1191_v59, %v5222_v45  ;;  %v1267_v52 = vadd.f32 0.001143296, %v1266_v13 }
 0x185   : > { %v2737_v31 = vclamps-f32 %v1090_v23, 1.0  ;;  %v1038_v24 = vsub.f32 1.0, %v1037_v44  ;;  %vm1042_vm11 = vweird.f32 %v3022_v16  ;;  %vm1121_vm12 = vweird.f32 %v4223_v14 }
 0x186   : > { %v1306_v37 = vmul.f32 3.8918573e-05, %v3548_v39  ;;  %v3024_v53 = vpop.eup %3023  ;;  %v1154_v11 = vmul.f32 %v1153_v42, %v5220_v0  ;;  %v1234_v56 = vmul.f32 %v1233_v30, %v5221_v1  ;;  %v1193_v8 = vadd.f32 0.4994258, %v1192_v57  ;;  %vm1043_vm14 = vmor %vm1041_vm9, %vm1042_vm11 }
 0x187   : > { %v1268_v34 = vmul.f32 %v1267_v52, %v5226_v58  ;;  %v1627_v61 = vadd.f32 1.0, %v2737_v31  ;;  %v1039_v15 = vmul.f32 %v3022_v16, %v1038_v24  ;;  %v1117_v41 = vmul.f32 %v3024_v53, %v4223_v14  ;;  %v5236_v24 = vld [vmem:[#allocation49_spill] sm:$0xff] }
 0x188   : > { %v1386_v12 = vmul.f32 3.8918573e-05, %v3617_v55  ;;  %vm1122_vm13 = vweird.f32 %v3024_v53  ;;  %v4250_v26 = vadd.f32 1.0, %v1154_v11  ;;  %v4252_v18 = vadd.f32 1.0, %v1234_v56 }
 0x189   : > { %v1194_v4 = vmul.f32 %v1193_v8, %v5222_v45  ;;  %v1655_v0 = vmul.f32 %v1627_v61, %v3896_v3  ;;  %v1040_v19 = vadd.f32 %v3022_v16, %v1039_v15  ;;  %v1118_v1 = vsub.f32 1.0, %v1117_v41  ;;  %vm1123_vm1 = vmor %vm1121_vm12, %vm1122_vm13  ;;  %v5239_v61 = vld [vmem:[#allocation60_spill] sm:$0xff] }
 0x18a   : > { %v1269_v47 = vadd.f32 0.014752088, %v1268_v34  ;;  %3025 = vrcp.f32 %v4250_v26  ;;  %v1165_v7 = vand.u32 2147483647, %v4250_v26  ;;  %v1167_v20 = vand.u32 2147483648, %v4250_v26  ;;  %v5240_v41 = vld [vmem:[#allocation40_spill] sm:$0xff] }
 0x18b   : > { %v1307_v38 = vadd.f32 0.001143296, %v1306_v37  ;;  %v1675_v49 = vpack.c.bf16 %v1655_v0, %v1653_v21  ;;  %v1044_v17 = vsel %vm1043_vm14, %v3022_v16, %v1040_v19  ;;  %v1119_v32 = vmul.f32 %v3024_v53, %v1118_v1  ;;  %v5253_v0 = vld [vmem:[#allocation16_spill] sm:$0xff] }
 0x18c   : > { %3027 = vrcp.f32 %v4252_v18  ;;  %v1049_v3 = vsel %vm4237_vm10, %v1048_v6, %v1044_v17  ;;  %vm4265_vm15 = vcmp.eq.f32.partialorder %v1125_v2, 8.507059e+37  ;;  %v1128_v9 = vor.u32 1.1754944e-38, %v1127_v28 }
 0x18d   : > { %vm1161_vm0 = vweird.f32 %v4250_v26  ;;  %1903 = vmatmul.bf16.gmra.mxu2 %v1675_v49  ;;  %v1050_v29 = vmul.f32 %v1049_v3, %v4053_v50  ;;  %v1120_v62 = vadd.f32 %v3024_v53, %v1119_v32  ;;  %1991 = vmatmul.bf16.gmra.mxu0 %v1675_v49  ;;  %v1245_v36 = vand.u32 2147483647, %v4252_v18 }
 0x18e   : > { %v1247_v51 = vand.u32 2147483648, %v4252_v18  ;;  %v1168_v40 = vor.u32 1.1754944e-38, %v1167_v20  ;;  %vm1241_vm2 = vweird.f32 %v4252_v18  ;;  %v4277_v63 = vadd.f32 1.0, %v1194_v4 }
 0x18f   : > { %v1270_v46 = vmul.f32 %v1269_v47, %v5226_v58  ;;  %v2736_v5 = vclamps-f32 %v1050_v29, 1.0  ;;  %v1124_v10 = vsel %vm1123_vm1, %v3024_v53, %v1120_v62  ;;  %vm4280_vm3 = vcmp.eq.f32.partialorder %v1165_v7, 8.507059e+37 }
 0x190   : > { %v1308_v22 = vmul.f32 %v1307_v38, %v3548_v39  ;;  %v1387_v27 = vadd.f32 0.001143296, %v1386_v12  ;;  %v3026_v13 = vpop.eup %3025  ;;  %v1129_v14 = vsel %vm4265_vm15, %v1128_v9, %v1124_v10  ;;  %vm4287_vm4 = vcmp.eq.f32.partialorder %v1245_v36, 8.507059e+37  ;;  %v5243_v9 = vld [vmem:[#allocation47_spill] sm:$0xff] }
 0x191   : > { %v1248_v25 = vor.u32 1.1754944e-38, %v1247_v51  ;;  %3029 = vrcp.f32 %v4277_v63  ;;  %v1130_v54 = vmul.f32 %v1129_v14, %v4063_v33  ;;  %v1626_v16 = vadd.f32 1.0, %v2736_v5  ;;  %v5247_v14 = vld [vmem:[#allocation11_spill] sm:$0xff] }
 0x192   : > { %v3028_v60 = vpop.eup %3027  ;;  %v1157_v43 = vmul.f32 %v3026_v13, %v4250_v26  ;;  %vm1201_vm5 = vweird.f32 %v4277_v63  ;;  %vm1162_vm6 = vweird.f32 %v3026_v13  ;;  %v1205_v2 = vand.u32 2147483647, %v4277_v63 }
 0x193   : > { %v1237_v6 = vmul.f32 %v3028_v60, %v4252_v18  ;;  %vm1242_vm7 = vweird.f32 %v3028_v60  ;;  %v2738_v59 = vclamps-f32 %v1130_v54, 1.0  ;;  %v1207_v21 = vand.u32 2147483648, %v4277_v63  ;;  %vm4305_vm8 = vmor %vm1161_vm0, %vm1162_vm6 }
 0x194   : > { %v1158_v23 = vsub.f32 1.0, %v1157_v43  ;;  %v1271_v44 = vadd.f32 0.112945676, %v1270_v46  ;;  %v1654_v28 = vmul.f32 %v1626_v16, %v5235_v35  ;;  %v1309_v33 = vadd.f32 0.014752088, %v1308_v22  ;;  %vm4315_vm9 = vmor %vm1241_vm2, %vm1242_vm7  ;;  %v5244_v46 = vld [vmem:[#allocation74_spill] sm:$0xff] }
 0x195   : > { %v1238_v42 = vsub.f32 1.0, %v1237_v6  ;;  %v1388_v30 = vmul.f32 %v1387_v27, %v3617_v55  ;;  %v1628_v57 = vadd.f32 1.0, %v2738_v59  ;;  %v1346_v37 = vmul.f32 3.8918573e-05, %v5236_v24  ;;  %v5249_v59 = vld [vmem:[#allocation88_spill] sm:$0xff]  ;;  %v5250_v35 = vld [vmem:[#allocation26_spill] sm:$0xff] }
 0x196   : > { %v1159_v52 = vmul.f32 %v3026_v13, %v1158_v23  ;;  %v1272_v31 = vmul.f32 %v1271_v44, %v5226_v58  ;;  %v1310_v8 = vmul.f32 %v1309_v33, %v3548_v39  ;;  %v1426_v15 = vmul.f32 3.8918573e-05, %v5239_v61 }
 0x197   : > { %v3030_v53 = vpop.eup %3029  ;;  %v1239_v56 = vmul.f32 %v3028_v60, %v1238_v42  ;;  %v1389_v34 = vadd.f32 0.014752088, %v1388_v30  ;;  %v1656_v12 = vmul.f32 %v1628_v57, %v5240_v41  ;;  %v1347_v17 = vadd.f32 0.001143296, %v1346_v37  ;;  %v5251_v42 = vld [vmem:[#allocation52_spill] sm:$0xff] }
 0x198   : > { %v1160_v4 = vadd.f32 %v3026_v13, %v1159_v52  ;;  %v1197_v26 = vmul.f32 %v3030_v53, %v4277_v63  ;;  %vm1202_vm10 = vweird.f32 %v3030_v53  ;;  %v1273_v1 = vadd.f32 0.4994258, %v1272_v31  ;;  %v5252_v52 = vld [vmem:[#allocation43_spill] sm:$0xff] }
 0x199   : > { %v1240_v19 = vadd.f32 %v3028_v60, %v1239_v56  ;;  %v1311_v47 = vadd.f32 0.112945676, %v1310_v8  ;;  %v1390_v7 = vmul.f32 %v1389_v34, %v3617_v55  ;;  %v1676_v20 = vpack.c.bf16 %v1656_v12, %v1654_v28  ;;  %vm4336_vm11 = vmor %vm1201_vm5, %vm1202_vm10 }
 0x19a   : > { %v1164_v38 = vsel %vm4305_vm8, %v3026_v13, %v1160_v4  ;;  %v1198_v49 = vsub.f32 1.0, %v1197_v26  ;;  %v1274_v3 = vmul.f32 %v1273_v1, %v5226_v58  ;;  %v1208_v58 = vor.u32 1.1754944e-38, %v1207_v21 }
 0x19b   : > { %v1169_v18 = vsel %vm4280_vm3, %v1168_v40, %v1164_v38  ;;  %v1244_v32 = vsel %vm4315_vm9, %v3028_v60, %v1240_v19  ;;  %v1312_v45 = vmul.f32 %v1311_v47, %v3548_v39  ;;  %1947 = vmatmul.bf16.gmra.mxu3 %v1676_v20  ;;  %2035 = vmatmul.bf16.gmra.mxu1 %v1676_v20  ;;  %v1391_v51 = vadd.f32 0.112945676, %v1390_v7 }
 0x19c   : > { %v1170_v29 = vmul.f32 %v1169_v18, %v5243_v9  ;;  %v1249_v62 = vsel %vm4287_vm4, %v1248_v25, %v1244_v32  ;;  %v1199_v36 = vmul.f32 %v3030_v53, %v1198_v49  ;;  %v1275_v10 = vadd.f32 1.0, %v1274_v3  ;;  %v5258_v32 = vld [vmem:[#allocation69_spill] sm:$0xff] }
 0x19d   : > { %v1250_v5 = vmul.f32 %v1249_v62, %v5244_v46  ;;  %v1313_v50 = vadd.f32 0.4994258, %v1312_v45  ;;  %vm1206_vm12 = vcmp.eq.f32.partialorder %v1205_v2, 8.507059e+37  ;;  %v1392_v13 = vmul.f32 %v1391_v51, %v3617_v55 }
 0x19e   : > { %v2739_v22 = vclamps-f32 %v1170_v29, 1.0  ;;  %v1200_v27 = vadd.f32 %v3030_v53, %v1199_v36  ;;  %v1577_v25 = vmul.f32 %v5248_v48, %v5247_v14  ;;  %3031 = vrcp.f32 %v1275_v10  ;;  %v5272_v36 = vld [vmem:[#allocation81_spill] sm:$0xff] }
 0x19f   : > { %v2741_v60 = vclamps-f32 %v1250_v5, 1.0  ;;  %v1348_v54 = vmul.f32 %v1347_v17, %v5236_v24  ;;  %v1314_v43 = vmul.f32 %v1313_v50, %v3548_v39  ;;  %v1427_v6 = vadd.f32 0.001143296, %v1426_v15  ;;  %v5261_v50 = vld [vmem:[#allocation27_spill] sm:$0xff] }
 0x1a0   : > { %v1629_v63 = vadd.f32 1.0, %v2739_v22  ;;  %v1204_v16 = vsel %vm4336_vm11, %v3030_v53, %v1200_v27  ;;  %v1538_v23 = vadd.f32 0.0036580483, %v5249_v59  ;;  %v1393_v44 = vadd.f32 0.4994258, %v1392_v13 }
 0x1a1   : > { %v1631_v21 = vadd.f32 1.0, %v2741_v60  ;;  %v1209_v2 = vsel %vm1206_vm12, %v1208_v58, %v1204_v16  ;;  %v1285_v30 = vand.u32 2147483647, %v1275_v10  ;;  %v1315_v57 = vadd.f32 1.0, %v1314_v43 }
 0x1a2   : > { %v1657_v28 = vmul.f32 %v1629_v63, %v5250_v35  ;;  %v1210_v33 = vmul.f32 %v1209_v2, %v5251_v42  ;;  %v1287_v37 = vand.u32 2147483648, %v1275_v10  ;;  %v1394_v11 = vmul.f32 %v1393_v44, %v3617_v55  ;;  %v5262_v2 = vld [vmem:[#allocation75_spill] sm:$0xff] }
 0x1a3   : > { %v1659_v31 = vmul.f32 %v1631_v21, %v5252_v52  ;;  %v1349_v53 = vadd.f32 0.014752088, %v1348_v54  ;;  %3033 = vrcp.f32 %v1315_v57  ;;  %v1325_v39 = vand.u32 2147483647, %v1315_v57 }
 0x1a4   : > { %v2740_v56 = vclamps-f32 %v1210_v33, 1.0  ;;  %v1428_v8 = vmul.f32 %v1427_v6, %v5239_v61  ;;  %v3032_v34 = vpop.eup %3031  ;;  %v1327_v41 = vand.u32 2147483648, %v1315_v57  ;;  %v1395_v12 = vadd.f32 1.0, %v1394_v11 }
 0x1a5   : > { %v1677_v15 = vpack.c.bf16 %v1659_v31, %v1657_v28  ;;  %v1350_v4 = vmul.f32 %v1349_v53, %v5236_v24  ;;  %v4355_v26 = vmul.f32 %v1538_v23, %v5253_v0  ;;  %v4357_v19 = vadd.f32 0.0036580483, %v1577_v25 }
 0x1a6   : > { %v1277_v1 = vmul.f32 %v3032_v34, %v1275_v10  ;;  %vm1281_vm13 = vweird.f32 %v1275_v10  ;;  %vm4359_vm14 = vcmp.eq.f32.partialorder %v1285_v30, 8.507059e+37  ;;  %v1288_v47 = vor.u32 1.1754944e-38, %v1287_v37 }
 0x1a7   : > { %1908 = vmatmul.bf16.gmra.mxu2 %v1677_v15  ;;  %1996 = vmatmul.bf16.gmra.mxu0 %v1677_v15  ;;  %vm1321_vm15 = vweird.f32 %v1315_v57  ;;  %3035 = vrcp.f32 %v1395_v12  ;;  %vm1282_vm0 = vweird.f32 %v3032_v34  ;;  %v1630_v20 = vadd.f32 1.0, %v2740_v56 }
 0x1a8   : > { %v1278_v7 = vsub.f32 1.0, %v1277_v1  ;;  %v1351_v38 = vadd.f32 0.112945676, %v1350_v4  ;;  %vm4363_vm1 = vcmp.eq.f32.partialorder %v1325_v39, 8.507059e+37  ;;  %v1328_v17 = vor.u32 1.1754944e-38, %v1327_v41  ;;  %vm4371_vm3 = vmor %vm1281_vm13, %vm1282_vm0 }
 0x1a9   : > { %v1429_v18 = vadd.f32 0.014752088, %v1428_v8  ;;  %v1466_v3 = vmul.f32 3.8918573e-05, %v5258_v32  ;;  %v3034_v45 = vpop.eup %3033  ;;  %vm1401_vm2 = vweird.f32 %v1395_v12  ;;  %v1546_v62 = vmul.f32 3.8918573e-05, %v5253_v0 }
 0x1aa   : > { %v1279_v9 = vmul.f32 %v3032_v34, %v1278_v7  ;;  %v1352_v29 = vmul.f32 %v1351_v38, %v5236_v24  ;;  %v1317_v51 = vmul.f32 %v3034_v45, %v1315_v57  ;;  %v1405_v46 = vand.u32 2147483647, %v1395_v12  ;;  %v5269_v8 = vld [vmem:[#allocation72_spill] sm:$0xff] }
 0x1ab   : > { %v1430_v5 = vmul.f32 %v1429_v18, %v5239_v61  ;;  %v1467_v40 = vadd.f32 0.001143296, %v1466_v3  ;;  %v1658_v22 = vmul.f32 %v1630_v20, %v5261_v50  ;;  %v1407_v27 = vand.u32 2147483648, %v1395_v12  ;;  %v5271_v38 = vld [vmem:[#allocation44_spill] sm:$0xff] }
 0x1ac   : > { %v1280_v58 = vadd.f32 %v3032_v34, %v1279_v9  ;;  %v1353_v13 = vadd.f32 0.4994258, %v1352_v29  ;;  %v1318_v25 = vsub.f32 1.0, %v1317_v51  ;;  %vm1322_vm4 = vweird.f32 %v3034_v45 }
 0x1ad   : > { %v3036_v48 = vpop.eup %3035  ;;  %v1431_v60 = vadd.f32 0.112945676, %v1430_v5  ;;  %v1468_v10 = vmul.f32 %v1467_v40, %v5258_v32  ;;  %v1547_v43 = vadd.f32 0.001143296, %v1546_v62  ;;  %vm4386_vm5 = vmor %vm1321_vm15, %vm1322_vm4  ;;  %vm4390_vm7 = vcmp.eq.f32.partialorder %v1405_v46, 8.507059e+37 }
 0x1ae   : > { %v1284_v54 = vsel %vm4371_vm3, %v3032_v34, %v1280_v58  ;;  %v1397_v63 = vmul.f32 %v3036_v48, %v1395_v12  ;;  %v1354_v16 = vmul.f32 %v1353_v13, %v5236_v24  ;;  %v1319_v59 = vmul.f32 %v3034_v45, %v1318_v25  ;;  %v5270_v12 = vld [vmem:[#allocation76_spill] sm:$0xff]  ;;  %v5285_v13 = vld [vmem:[#allocation87_spill] sm:$0xff] }
 0x1af   : > { %v1289_v6 = vsel %vm4359_vm14, %v1288_v47, %v1284_v54  ;;  %v1432_v23 = vmul.f32 %v1431_v60, %v5239_v61  ;;  %v1469_v21 = vadd.f32 0.014752088, %v1468_v10  ;;  %vm1402_vm6 = vweird.f32 %v3036_v48  ;;  %v5275_v10 = vld [vmem:[#allocation53_spill] sm:$0xff] }
 0x1b0   : > { %v1290_v44 = vmul.f32 %v1289_v6, %v5262_v2  ;;  %v1398_v28 = vsub.f32 1.0, %v1397_v63  ;;  %v1355_v42 = vadd.f32 1.0, %v1354_v16  ;;  %v1320_v33 = vadd.f32 %v3034_v45, %v1319_v59  ;;  %vm4399_vm8 = vmor %vm1401_vm2, %vm1402_vm6  ;;  %v5276_v2 = vld [vmem:[#allocation73_spill] sm:$0xff] }
 0x1b1   : > { %v1433_v30 = vadd.f32 0.4994258, %v1432_v23  ;;  %v1470_v52 = vmul.f32 %v1469_v21, %v5258_v32  ;;  %v1548_v57 = vmul.f32 %v1547_v43, %v5253_v0  ;;  %v1408_v56 = vor.u32 1.1754944e-38, %v1407_v27 }
 0x1b2   : > { %v2742_v31 = vclamps-f32 %v1290_v44, 1.0  ;;  %v1399_v37 = vmul.f32 %v3036_v48, %v1398_v28  ;;  %3037 = vrcp.f32 %v1355_v42  ;;  %v1324_v11 = vsel %vm4386_vm5, %v3034_v45, %v1320_v33 }
 0x1b3   : > { %v1434_v39 = vmul.f32 %v1433_v30, %v5239_v61  ;;  %v1506_v34 = vmul.f32 3.8918573e-05, %v5269_v8  ;;  %v1329_v41 = vsel %vm4363_vm1, %v1328_v17, %v1324_v11  ;;  %v1471_v1 = vadd.f32 0.112945676, %v1470_v52 }
 0x1b4   : > { %v1632_v15 = vadd.f32 1.0, %v2742_v31  ;;  %v1400_v4 = vadd.f32 %v3036_v48, %v1399_v37  ;;  %v4409_v55 = vmul.f32 %v4357_v19, %v5247_v14  ;;  %v1330_v47 = vmul.f32 %v1329_v41, %v5270_v12 }
 0x1b5   : > { %v1365_v7 = vand.u32 2147483647, %v1355_v42  ;;  %v4412_v20 = vadd.f32 1.0, %v1434_v39  ;;  %v1472_v3 = vmul.f32 %v1471_v1, %v5258_v32  ;;  %v1549_v49 = vadd.f32 0.014752088, %v1548_v57 }
 0x1b6   : > { %v1660_v18 = vmul.f32 %v1632_v15, %v5271_v38  ;;  %v1404_v61 = vsel %vm4399_vm8, %v3036_v48, %v1400_v4  ;;  %v2743_v17 = vclamps-f32 %v1330_v47, 1.0  ;;  %v1507_v19 = vadd.f32 0.001143296, %v1506_v34  ;;  %v5280_v4 = vld [vmem:[#allocation77_spill] sm:$0xff] }
 0x1b7   : > { %v1409_v45 = vsel %vm4390_vm7, %v1408_v56, %v1404_v61  ;;  %3039 = vrcp.f32 %v4412_v20  ;;  %v1540_v29 = vadd.f32 0.05243302, %v4355_v26  ;;  %v1367_v46 = vand.u32 2147483648, %v1355_v42  ;;  %v5279_v56 = vld [vmem:[#allocation20_spill] sm:$0xff] }
 0x1b8   : > { %v3038_v9 = vpop.eup %3037  ;;  %v1678_v62 = vpack.c.bf16 %v1660_v18, %v1658_v22  ;;  %v1410_v51 = vmul.f32 %v1409_v45, %v5272_v36  ;;  %v1633_v5 = vadd.f32 1.0, %v2743_v17  ;;  %v1473_v58 = vadd.f32 0.4994258, %v1472_v3 }
 0x1b9   : > { %v1357_v40 = vmul.f32 %v3038_v9, %v1355_v42  ;;  %v1586_v50 = vmul.f32 3.8918573e-05, %v5247_v14  ;;  %vm1361_vm9 = vweird.f32 %v1355_v42  ;;  %vm4424_vm10 = vcmp.eq.f32.partialorder %v1365_v7, 8.507059e+37 }
 0x1ba   : > { %1952 = vmatmul.bf16.gmra.mxu3 %v1678_v62  ;;  %2040 = vmatmul.bf16.gmra.mxu1 %v1678_v62  ;;  %v2745_v27 = vclamps-f32 %v1410_v51, 1.0  ;;  %v1550_v48 = vmul.f32 %v1549_v49, %v5253_v0  ;;  %vm1362_vm11 = vweird.f32 %v3038_v9  ;;  %v1474_v22 = vmul.f32 %v1473_v58, %v5258_v32  ;;  %v5283_v51 = vld [vmem:[#allocation84_spill] sm:$0xff] }
 0x1bb   : > { %v1358_v26 = vsub.f32 1.0, %v1357_v40  ;;  %v1508_v25 = vmul.f32 %v1507_v19, %v5269_v8  ;;  %v1661_v54 = vmul.f32 %v1633_v5, %v5275_v10  ;;  %v1368_v63 = vor.u32 1.1754944e-38, %v1367_v46  ;;  %vm4436_vm12 = vmor %vm1361_vm9, %vm1362_vm11 }
 0x1bc   : > { %v1635_v60 = vadd.f32 1.0, %v2745_v27  ;;  %v1551_v16 = vadd.f32 0.112945676, %v1550_v48  ;;  %v4432_v59 = vadd.f32 1.0, %v1474_v22  ;;  %v1587_v21 = vadd.f32 0.001143296, %v1586_v50 }
 0x1bd   : > { %v3040_v43 = vpop.eup %3039  ;;  %v1359_v6 = vmul.f32 %v3038_v9, %v1358_v26  ;;  %v1509_v23 = vadd.f32 0.014752088, %v1508_v25  ;;  %vm1441_vm13 = vweird.f32 %v4412_v20  ;;  %v1445_v24 = vand.u32 2147483647, %v4412_v20  ;;  %v5284_v50 = vld [vmem:[#allocation54_spill] sm:$0xff]  ;;  %v5286_v25 = vld [vmem:[#allocation64_spill] sm:$0xff] }
 0x1be   : > { %v1663_v44 = vmul.f32 %v1635_v60, %v5276_v2  ;;  %v1437_v32 = vmul.f32 %v3040_v43, %v4412_v20  ;;  %v1552_v28 = vmul.f32 %v1551_v16, %v5253_v0  ;;  %v1447_v30 = vand.u32 2147483648, %v4412_v20 }
 0x1bf   : > { %v1360_v33 = vadd.f32 %v3038_v9, %v1359_v6  ;;  %3041 = vrcp.f32 %v4432_v59  ;;  %vm1442_vm14 = vweird.f32 %v3040_v43  ;;  %v1541_v37 = vmul.f32 %v1540_v29, %v5253_v0 }
 0x1c0   : > { %v1679_v52 = vpack.c.bf16 %v1663_v44, %v1661_v54  ;;  %v1438_v31 = vsub.f32 1.0, %v1437_v32  ;;  %v1553_v42 = vadd.f32 0.4994258, %v1552_v28  ;;  %v1510_v11 = vmul.f32 %v1509_v23, %v5269_v8  ;;  %vm4458_vm15 = vmor %vm1441_vm13, %vm1442_vm14  ;;  %v5291_v44 = vld [vmem:[#allocation57_spill] sm:$0xff] }
 0x1c1   : > { %v1364_v57 = vsel %vm4436_vm12, %v3038_v9, %v1360_v33  ;;  %v1588_v53 = vmul.f32 %v1587_v21, %v5247_v14  ;;  %v1464_v39 = vadd.f32 1.1283791, %v5279_v56  ;;  %v1448_v47 = vor.u32 1.1754944e-38, %v1447_v30 }
 0x1c2   : > { %1913 = vmatmul.bf16.gmra.mxu2 %v1679_v52  ;;  %v1369_v34 = vsel %vm4424_vm10, %v1368_v63, %v1364_v57  ;;  %v1439_v15 = vmul.f32 %v3040_v43, %v1438_v31  ;;  %2001 = vmatmul.bf16.gmra.mxu0 %v1679_v52  ;;  %v1554_v41 = vmul.f32 %v1553_v42, %v5253_v0  ;;  %v1511_v7 = vadd.f32 0.112945676, %v1510_v11  ;;  %v1977_v57 = vpop.f32.mrf.mxu0 }
 0x1c3   : > { %v1370_v1 = vmul.f32 %v1369_v34, %v5280_v4  ;;  %v1589_v38 = vadd.f32 0.014752088, %v1588_v53  ;;  %v1580_v18 = vadd.f32 0.05243302, %v4409_v55  ;;  %vm1446_vm0 = vcmp.eq.f32.partialorder %v1445_v24, 8.507059e+37 }
 0x1c4   : > { %v1440_v61 = vadd.f32 %v3040_v43, %v1439_v15  ;;  %v4463_v3 = vadd.f32 1.0, %v1554_v41  ;;  %v1542_v17 = vadd.f32 0.18741608, %v1541_v37  ;;  %v1512_v19 = vmul.f32 %v1511_v7, %v5269_v8  ;;  %v2662_v34 = vld [vmem:[%s5018_s3 + $0x1] ss:$4 sm:$0x3]  ;;  %v1889_v15 = vpop.f32.mrf.mxu2 }
 0x1c5   : > { %v3042_v49 = vpop.eup %3041  ;;  %v2744_v45 = vclamps-f32 %v1370_v1, 1.0  ;;  %v1590_v20 = vmul.f32 %v1589_v38, %v5247_v14  ;;  %vm1481_vm1 = vweird.f32 %v4432_v59  ;;  %v1485_v62 = vand.u32 2147483647, %v4432_v59  ;;  %v5292_v41 = vld [vmem:[#allocation62_spill] sm:$0xff]  ;;  %v5293_v38 = vld [vmem:[#allocation85_spill] sm:$0xff] }
 0x1c6   : > { %v1444_v9 = vsel %vm4458_vm15, %v3040_v43, %v1440_v61  ;;  %v1477_v29 = vmul.f32 %v3042_v49, %v4432_v59  ;;  %3043 = vrcp.f32 %v4463_v3  ;;  %vm1482_vm2 = vweird.f32 %v3042_v49 }
 0x1c7   : > { %v1449_v55 = vsel %vm1446_vm0, %v1448_v47, %v1444_v9  ;;  %v1487_v36 = vand.u32 2147483648, %v4432_v59  ;;  %v1634_v5 = vadd.f32 1.0, %v2744_v45  ;;  %v1513_v58 = vadd.f32 0.4994258, %v1512_v19  ;;  %vm4485_vm3 = vmor %vm1481_vm1, %vm1482_vm2  ;;  %v2021_v47 = vpop.f32.mrf.mxu1 }
 0x1c8   : > { %v1450_v46 = vmul.f32 %v1449_v55, %v5283_v51  ;;  %v1478_v40 = vsub.f32 1.0, %v1477_v29  ;;  %v460_v27 = vmul.f32 0.5, %v5284_v50  ;;  %v1503_v48 = vmul.f32 %v5285_v13, %v5269_v8 }
 0x1c9   : > { %v1543_v26 = vmul.f32 %v1542_v17, %v5253_v0  ;;  %v1591_v22 = vadd.f32 0.112945676, %v1590_v20  ;;  %v1465_v60 = vmul.f32 %v1464_v39, %v5286_v25  ;;  %v1514_v63 = vmul.f32 %v1513_v58, %v5269_v8  ;;  %v1933_v7 = vpop.f32.mrf.mxu3  ;;  %v5297_v25 = vld [vmem:[#allocation65_spill] sm:$0xff] }
 0x1ca   : > { %v2746_v10 = vclamps-f32 %v1450_v46, 1.0  ;;  %v1479_v54 = vmul.f32 %v3042_v49, %v1478_v40  ;;  %v1581_v16 = vmul.f32 %v1580_v18, %v5247_v14  ;;  %vm4489_vm4 = vcmp.eq.f32.partialorder %v1485_v62, 8.507059e+37 }
 0x1cb   : > { %v1488_v0 = vor.u32 1.1754944e-38, %v1487_v36  ;;  %v1592_v23 = vmul.f32 %v1591_v22, %v5247_v14  ;;  %v1662_v8 = vmul.f32 %v1634_v5, %v5291_v44  ;;  %v4495_v32 = vadd.f32 1.0, %v1514_v63  ;;  %v1979_v22 = vpop.f32.mrf.mxu0 }
 0x1cc   : > { %v3044_v21 = vpop.eup %3043  ;;  %v1636_v2 = vadd.f32 1.0, %v2746_v10  ;;  %v1480_v35 = vadd.f32 %v3042_v49, %v1479_v54  ;;  %v1544_v28 = vadd.f32 1.1283791, %v1543_v26  ;;  %vm1561_vm5 = vweird.f32 %v4463_v3 }
 0x1cd   : > { %v1557_v59 = vmul.f32 %v3044_v21, %v4463_v3  ;;  %v1593_v33 = vadd.f32 0.4994258, %v1592_v23  ;;  %v1567_v52 = vand.u32 2147483648, %v4463_v3  ;;  %3045 = vrcp.f32 %v4495_v32 }
 0x1ce   : > { %v1664_v24 = vmul.f32 %v1636_v2, %v460_v27  ;;  %v1484_v30 = vsel %vm4485_vm3, %v3042_v49, %v1480_v35  ;;  %vm1562_vm6 = vweird.f32 %v3044_v21  ;;  %v1565_v37 = vand.u32 2147483647, %v4463_v3  ;;  %v5296_v3 = vld [vmem:[#allocation80_spill] sm:$0xff]  ;;  %v5302_v35 = vld [vmem:[#allocation9_spill] sm:$0xff] }
 0x1cf   : > { %v1489_v31 = vsel %vm4489_vm4, %v1488_v0, %v1484_v30  ;;  %v1558_v42 = vsub.f32 1.0, %v1557_v59  ;;  %v1582_v11 = vadd.f32 0.18741608, %v1581_v16  ;;  %v1594_v39 = vmul.f32 %v1593_v33, %v5247_v14  ;;  %vm4517_vm7 = vmor %vm1561_vm5, %vm1562_vm6  ;;  %v1891_v16 = vpop.f32.mrf.mxu2  ;;  %v5306_v49 = vld [vmem:[#allocation13_spill] sm:$0xff] }
 0x1d0   : > { %v1680_v53 = vpack.c.bf16 %v1664_v24, %v1662_v8  ;;  %v1490_v56 = vmul.f32 %v1489_v31, %v1465_v60  ;;  %v461_v4 = vmul.f32 0.5, %v5292_v41  ;;  %v4511_v12 = vperm.slane %v2662_v34, 1 }
 0x1d1   : > { %v1559_v1 = vmul.f32 %v3044_v21, %v1558_v42  ;;  %v1545_v18 = vmul.f32 %v1544_v28, %v5293_v38  ;;  %v1568_v17 = vor.u32 1.1754944e-38, %v1567_v52  ;;  %v4521_v45 = vadd.f32 1.0, %v1594_v39  ;;  %v2023_v52 = vpop.f32.mrf.mxu1  ;;  %v1935_v31 = vpop.f32.mrf.mxu3  ;;  %v5303_v42 = vld [vmem:[#allocation8_spill] sm:$0xff] }
 0x1d2   : > { %1957 = vmatmul.bf16.gmra.mxu3 %v1680_v53  ;;  %2045 = vmatmul.bf16.gmra.mxu1 %v1680_v53  ;;  %v2747_v61 = vclamps-f32 %v1490_v56, 1.0  ;;  %vm1566_vm8 = vcmp.eq.f32.partialorder %v1565_v37, 8.507059e+37  ;;  %v1978_v20 = vadd.f32 %v1977_v57, %v4511_v12  ;;  %v4524_v9 = vperm.slane %v2662_v34, 0 }
 0x1d3   : > { %v1560_v19 = vadd.f32 %v3044_v21, %v1559_v1  ;;  %v3046_v29 = vpop.eup %3045  ;;  %v1504_v55 = vadd.f32 1.1283791, %v1503_v48  ;;  %v1583_v62 = vmul.f32 %v1582_v11, %v5247_v14  ;;  %v1525_v36 = vand.u32 2147483647, %v4495_v32 }
 0x1d4   : > { %3047 = vrcp.f32 %v4521_v45  ;;  %v463_v51 = vmul.f32 0.5, %v5296_v3  ;;  %v1517_v5 = vmul.f32 %v3046_v29, %v4495_v32  ;;  %vm1521_vm9 = vweird.f32 %v4495_v32 }
 0x1d5   : > { %v1564_v46 = vsel %vm4517_vm7, %v3044_v21, %v1560_v19  ;;  %v1637_v58 = vadd.f32 1.0, %v2747_v61  ;;  %v1527_v27 = vand.u32 2147483648, %v4495_v32  ;;  %v2022_v13 = vadd.f32 %v2021_v47, %v1978_v20  ;;  %v1982_v19 = vpop.f32.mrf.mxu0 }
 0x1d6   : > { %v1569_v40 = vsel %vm1566_vm8, %v1568_v17, %v1564_v46  ;;  %v1518_v14 = vsub.f32 1.0, %v1517_v5  ;;  %vm1522_vm10 = vweird.f32 %v3046_v29  ;;  %v1890_v26 = vadd.f32 %v1889_v15, %v4524_v9 }
 0x1d7   : > { %v1570_v48 = vmul.f32 %v1569_v40, %v1545_v18  ;;  %v1505_v60 = vmul.f32 %v1504_v55, %v5297_v25  ;;  %v1584_v10 = vadd.f32 1.1283791, %v1583_v62  ;;  %vm4537_vm11 = vcmp.eq.f32.partialorder %v1525_v36, 8.507059e+37  ;;  %vm4545_vm12 = vmor %vm1521_vm9, %vm1522_vm10  ;;  %v1894_v40 = vpop.f32.mrf.mxu2 }
 0x1d8   : > { %v1980_v63 = vadd.f32 %v1979_v22, %v4511_v12  ;;  %v1519_v6 = vmul.f32 %v3046_v29, %v1518_v14  ;;  %v1934_v0 = vadd.f32 %v1933_v7, %v1890_v26  ;;  %v1892_v23 = vadd.f32 %v1891_v16, %v4524_v9  ;;  %v5310_v22 = vld [vmem:[#allocation83_spill] sm:$0xff] }
 0x1d9   : > { %v2749_v43 = vclamps-f32 %v1570_v48, 1.0  ;;  %v1528_v44 = vor.u32 1.1754944e-38, %v1527_v27  ;;  %vm1601_vm13 = vweird.f32 %v4521_v45  ;;  %v1605_v8 = vand.u32 2147483647, %v4521_v45  ;;  %v5309_v27 = vld [vmem:[#allocation63_spill] sm:$0xff] }
 0x1da   : > { %v3048_v21 = vpop.eup %3047  ;;  %v4552_v28 = vadd.f32 %v2022_v13, %v5302_v35  ;;  %v1665_v33 = vmul.f32 %v1637_v58, %v461_v4  ;;  %v1520_v24 = vadd.f32 %v3046_v29, %v1519_v6  ;;  %v1607_v32 = vand.u32 2147483648, %v4521_v45 }
 0x1db   : > { %v1639_v59 = vadd.f32 1.0, %v2749_v43  ;;  %v1597_v30 = vmul.f32 %v3048_v21, %v4521_v45  ;;  %v4557_v37 = vadd.f32 %v1934_v0, %v5303_v42  ;;  %v2024_v57 = vadd.f32 %v2023_v52, %v1980_v63  ;;  %v5312_v52 = vld [vmem:[#allocation18_spill] sm:$0xff] }
 0x1dc   : > { %v1936_v11 = vadd.f32 %v1935_v31, %v1892_v23  ;;  %v1524_v56 = vsel %vm4545_vm12, %v3046_v29, %v1520_v24  ;;  %vm1602_vm14 = vweird.f32 %v3048_v21  ;;  %v2141_v1 = vmul.f32 %v4552_v28, %v4552_v28  ;;  %v5307_v29 = vld [vmem:[#allocation86_spill] sm:$0xff]  ;;  %v5311_v24 = vld [vmem:[#allocation19_spill] sm:$0xff] }
 0x1dd   : > { %v1667_v53 = vmul.f32 %v1639_v59, %v463_v51  ;;  %v1598_v39 = vsub.f32 1.0, %v1597_v30  ;;  %v1529_v34 = vsel %vm4537_vm11, %v1528_v44, %v1524_v56  ;;  %v2084_v15 = vadd.f32 %v4552_v28, %v4557_v37  ;;  %vm4571_vm15 = vmor %vm1601_vm13, %vm1602_vm14  ;;  %v5308_v51 = vld [vmem:[#allocation14_spill] sm:$0xff]  ;;  %v1984_v43 = vpop.f32.mrf.mxu0  ;;  %v5313_v56 = vld [vmem:[#allocation33_spill] sm:$0xff] }
 0x1de   : > { %v2140_v4 = vmul.f32 %v4557_v37, %v4557_v37  ;;  %v1530_v7 = vmul.f32 %v1529_v34, %v1505_v60  ;;  %v1608_v61 = vor.u32 1.1754944e-38, %v1607_v32  ;;  %v4576_v17 = vadd.f32 %v1936_v11, %v5306_v49 }
 0x1df   : > { %v1681_v47 = vpack.c.bf16 %v1667_v53, %v1665_v33  ;;  %v1599_v38 = vmul.f32 %v3048_v21, %v1598_v39  ;;  %2085 = vadd.xlane.f32.xlu0 %v2084_v15  ;;  %v1585_v55 = vmul.f32 %v1584_v10, %v5307_v29  ;;  %vm1606_vm0 = vcmp.eq.f32.partialorder %v1605_v8, 8.507059e+37  ;;  %v1896_v59 = vpop.f32.mrf.mxu2 }
 0x1e0   : > { %v2168_v20 = vadd.f32 %v2141_v1, %v2140_v4  ;;  %v2748_v62 = vclamps-f32 %v1530_v7, 1.0  ;;  %v4580_v45 = vadd.f32 %v2024_v57, %v5308_v51  ;;  %v462_v13 = vmul.f32 0.5, %v5309_v27  ;;  %v5314_v1 = vld [vmem:[#allocation32_spill] sm:$0xff] }
 0x1e1   : > { %1918 = vmatmul.bf16.gmra.mxu2 %v1681_v47  ;;  %v1600_v36 = vadd.f32 %v3048_v21, %v1599_v38  ;;  %2006 = vmatmul.bf16.gmra.mxu0 %v1681_v47  ;;  %v464_v25 = vmul.f32 0.5, %v5310_v22  ;;  %v1983_v10 = vadd.f32 %v1982_v19, %v4511_v12  ;;  %v1895_v16 = vadd.f32 %v1894_v40, %v4524_v9 }
 0x1e2   : > { %2169 = vadd.xlane.f32.xlu2 %v2168_v20  ;;  %v2087_v58 = vadd.f32 %v4580_v45, %v4576_v17  ;;  %v1638_v14 = vadd.f32 1.0, %v2748_v62  ;;  %v2142_v6 = vmul.f32 %v4576_v17, %v4576_v17  ;;  %v2143_v2 = vmul.f32 %v4580_v45, %v4580_v45 }
 0x1e3   : > { %v1604_v46 = vsel %vm4571_vm15, %v3048_v21, %v1600_v36  ;;  %v1985_v35 = vadd.f32 %v1984_v43, %v4511_v12  ;;  %v1897_v57 = vadd.f32 %v1896_v59, %v4524_v9 }
 0x1e4   : > { %v1609_v5 = vsel %vm1606_vm0, %v1608_v61, %v1604_v46  ;;  %v2026_v26 = vpop.f32.mrf.mxu1  ;;  %v1666_v63 = vmul.f32 %v1638_v14, %v462_v13  ;;  %v2171_v33 = vadd.f32 %v2143_v2, %v2142_v6  ;;  %v5316_v14 = vld [vmem:[#allocation42_spill] sm:$0xff] }
 0x1e5   : > { %v1610_v48 = vmul.f32 %v1609_v5, %v1585_v55  ;;  %v2027_v23 = vadd.f32 %v2026_v26, %v1983_v10  ;;  %v5315_v5 = vld [vmem:[#allocation45_spill] sm:$0xff]  ;;  %v5318_v2 = vld [vmem:[#allocation58_spill] sm:$0xff] }
 0x1e7   : > { %v2750_v60 = vclamps-f32 %v1610_v48, 1.0  ;;  %2088 = vadd.xlane.f32.xlu0 %v2087_v58  ;;  %v4596_v30 = vadd.f32 %v2027_v23, %v5311_v24 }
 0x1e9   : > { %v1640_v54 = vadd.f32 1.0, %v2750_v60  ;;  %v2145_v7 = vmul.f32 %v4596_v30, %v4596_v30 }
 0x1ea   : > { %v1938_v21 = vpop.f32.mrf.mxu3 }
 0x1eb   : > { %v1668_v0 = vmul.f32 %v1640_v54, %v464_v25  ;;  %v1939_v8 = vadd.f32 %v1938_v21, %v1895_v16 }
 0x1ec   : > { %v2028_v32 = vpop.f32.mrf.mxu1 }
 0x1ed   : > { %v1682_v44 = vpack.c.bf16 %v1668_v0, %v1666_v63  ;;  %v4599_v31 = vadd.f32 %v1939_v8, %v5312_v52  ;;  %v2029_v42 = vadd.f32 %v2028_v32, %v1985_v35  ;;  %v1987_v4 = vpop.f32.mrf.mxu0  ;;  %v5317_v0 = vld [vmem:[#allocation61_spill] sm:$0xff] }
 0x1ee   : > { %v1988_v19 = vadd.f32 %v1987_v4, %v4511_v12 }
 0x1ef   : > { %1962 = vmatmul.bf16.gmra.mxu3 %v1682_v44  ;;  %2050 = vmatmul.bf16.gmra.mxu1 %v1682_v44  ;;  %v2090_v11 = vadd.f32 %v4596_v30, %v4599_v31  ;;  %v4605_v39 = vadd.f32 %v2029_v42, %v5313_v56  ;;  %v2144_v15 = vmul.f32 %v4599_v31, %v4599_v31 }
 0x1f0   : > { %2172 = vadd.xlane.f32.xlu0 %v2171_v33 }
 0x1f1   : > { %2091 = vadd.xlane.f32.xlu1 %v2090_v11  ;;  %v2174_v18 = vadd.f32 %v2145_v7, %v2144_v15  ;;  %v2147_v49 = vmul.f32 %v4605_v39, %v4605_v39 }
 0x1f2   : > { %v1940_v53 = vpop.f32.mrf.mxu3 }
 0x1f3   : > { %v1941_v34 = vadd.f32 %v1940_v53, %v1897_v57  ;;  %v1899_v38 = vpop.f32.mrf.mxu2 }
 0x1f4   : > { %v1900_v62 = vadd.f32 %v1899_v38, %v4524_v9  ;;  %v5320_v38 = vld [vmem:[#allocation66_spill] sm:$0xff] }
 0x1f5   : > { %v4610_v47 = vadd.f32 %v1941_v34, %v5314_v1  ;;  %v1989_v36 = vpop.f32.mrf.mxu0  ;;  %v5319_v34 = vld [vmem:[#allocation70_spill] sm:$0xff] }
 0x1f6   : > { %v1990_v13 = vadd.f32 %v1989_v36, %v4511_v12 }
 0x1f7   : > { %v2146_v61 = vmul.f32 %v4610_v47, %v4610_v47  ;;  %v2093_v51 = vadd.f32 %v4605_v39, %v4610_v47 }
 0x1f9   : > { %2175 = vadd.xlane.f32.xlu1 %v2174_v18  ;;  %v2177_v20 = vadd.f32 %v2147_v49, %v2146_v61 }
 0x1fb   : > { %v2031_v29 = vpop.f32.mrf.mxu1  ;;  %2178 = vadd.xlane.f32.xlu2 %v2177_v20  ;;  %v1901_v48 = vpop.f32.mrf.mxu2 }
 0x1fc   : > { %v2032_v55 = vadd.f32 %v2031_v29, %v1988_v19  ;;  %v1902_v60 = vadd.f32 %v1901_v48, %v4524_v9 }
 0x1fe   : > { %v4623_v40 = vadd.f32 %v2032_v55, %v5315_v5 }
 0x200   : > { %v2149_v16 = vmul.f32 %v4623_v40, %v4623_v40 }
 0x201   : > { %v1943_v46 = vpop.f32.mrf.mxu3  ;;  %2094 = vadd.xlane.f32.xlu1 %v2093_v51  ;;  %v5321_v51 = vld [vmem:[#allocation79_spill] sm:$0xff] }
 0x202   : > { %v1944_v58 = vadd.f32 %v1943_v46, %v1900_v62 }
 0x203   : > { %v2033_v25 = vpop.f32.mrf.mxu1 }
 0x204   : > { %v4627_v26 = vadd.f32 %v1944_v58, %v5316_v14  ;;  %v2034_v10 = vadd.f32 %v2033_v25, %v1990_v13  ;;  %v5322_v58 = vld [vmem:[#allocation78_spill] sm:$0xff] }
 0x206   : > { %v2096_v54 = vadd.f32 %v4623_v40, %v4627_v26  ;;  %v2148_v63 = vmul.f32 %v4627_v26, %v4627_v26  ;;  %v4638_v23 = vadd.f32 %v2034_v10, %v5317_v0 }
 0x208   : > { %2097 = vadd.xlane.f32.xlu2 %v2096_v54  ;;  %v2180_v43 = vadd.f32 %v2149_v16, %v2148_v63  ;;  %v2151_v35 = vmul.f32 %v4638_v23, %v4638_v23 }
 0x209   : > { %v1945_v6 = vpop.f32.mrf.mxu3 }
 0x20a   : > { %v1946_v21 = vadd.f32 %v1945_v6, %v1902_v60  ;;  %2181 = vadd.xlane.f32.xlu0 %v2180_v43  ;;  %v1992_v24 = vpop.f32.mrf.mxu0 }
 0x20b   : > { %v1993_v32 = vadd.f32 %v1992_v24, %v4511_v12  ;;  %v5324_v24 = vld [vmem:[#allocation10_spill] sm:$0xff] }
 0x20c   : > { %v4641_v44 = vadd.f32 %v1946_v21, %v5318_v2  ;;  %v5323_v2 = vld [vmem:[#allocation12_spill] sm:$0xff] }
 0x20e   : > { %v2150_v8 = vmul.f32 %v4641_v44, %v4641_v44  ;;  %v2099_v59 = vadd.f32 %v4638_v23, %v4641_v44 }
 0x210   : > { %v2183_v33 = vadd.f32 %v2151_v35, %v2150_v8  ;;  %2100 = vadd.xlane.f32.xlu2 %v2099_v59  ;;  %v1904_v52 = vpop.f32.mrf.mxu2 }
 0x211   : > { %v1905_v11 = vadd.f32 %v1904_v52, %v4524_v9 }
 0x212   : > { %2184 = vadd.xlane.f32.xlu1 %v2183_v33  ;;  %v1994_v53 = vpop.f32.mrf.mxu0 }
 0x213   : > { %v1995_v1 = vadd.f32 %v1994_v53, %v4511_v12 }
 0x218   : > { %v2036_v42 = vpop.f32.mrf.mxu1  ;;  %v1906_v7 = vpop.f32.mrf.mxu2 }
 0x219   : > { %v2037_v57 = vadd.f32 %v2036_v42, %v1993_v32  ;;  %v1907_v49 = vadd.f32 %v1906_v7, %v4524_v9 }
 0x21b   : > { %v4652_v15 = vadd.f32 %v2037_v57, %v5319_v34 }
 0x21d   : > { %v2153_v55 = vmul.f32 %v4652_v15, %v4652_v15 }
 0x21e   : > { %v1948_v56 = vpop.f32.mrf.mxu3 }
 0x21f   : > { %v1949_v4 = vadd.f32 %v1948_v56, %v1905_v11 }
 0x220   : > { %v2038_v61 = vpop.f32.mrf.mxu1 }
 0x221   : > { %v4656_v18 = vadd.f32 %v1949_v4, %v5320_v38  ;;  %v2039_v19 = vadd.f32 %v2038_v61, %v1995_v1  ;;  %v5325_v1 = vld [vmem:[#allocation28_spill] sm:$0xff]  ;;  %v5326_v61 = vld [vmem:[#allocation23_spill] sm:$0xff] }
 0x223   : > { %v2102_v20 = vadd.f32 %v4652_v15, %v4656_v18  ;;  %v2152_v29 = vmul.f32 %v4656_v18, %v4656_v18  ;;  %v4666_v46 = vadd.f32 %v2039_v19, %v5321_v51 }
 0x224   : > { %v1997_v10 = vpop.f32.mrf.mxu0 }
 0x225   : > { %2103 = vadd.xlane.f32.xlu0 %v2102_v20  ;;  %v2186_v62 = vadd.f32 %v2153_v55, %v2152_v29  ;;  %v2155_v25 = vmul.f32 %v4666_v46, %v4666_v46  ;;  %v1998_v63 = vadd.f32 %v1997_v10, %v4511_v12 }
 0x226   : > { %v1950_v36 = vpop.f32.mrf.mxu3 }
 0x227   : > { %v1951_v5 = vadd.f32 %v1950_v36, %v1907_v49  ;;  %2187 = vadd.xlane.f32.xlu2 %v2186_v62 }
 0x229   : > { %v4669_v13 = vadd.f32 %v1951_v5, %v5322_v58 }
 0x22a   : > { %v1909_v54 = vpop.f32.mrf.mxu2 }
 0x22b   : > { %v2105_v48 = vadd.f32 %v4666_v46, %v4669_v13  ;;  %v2154_v14 = vmul.f32 %v4669_v13, %v4669_v13  ;;  %v1910_v6 = vadd.f32 %v1909_v54, %v4524_v9 }
 0x22c   : > { %v1999_v0 = vpop.f32.mrf.mxu0 }
 0x22d   : > { %2106 = vadd.xlane.f32.xlu1 %v2105_v48  ;;  %v2189_v60 = vadd.f32 %v2155_v25, %v2154_v14  ;;  %v2000_v59 = vadd.f32 %v1999_v0, %v4511_v12 }
 0x22f   : > { %2190 = vadd.xlane.f32.xlu0 %v2189_v60  ;;  %v5327_v60 = vld [vmem:[#allocation39_spill] sm:$0xff] }
 0x232   : > { %v1911_v33 = vpop.f32.mrf.mxu2 }
 0x233   : > { %v1912_v42 = vadd.f32 %v1911_v33, %v4524_v9 }
 0x237   : > { %v2041_v16 = vpop.f32.mrf.mxu1 }
 0x238   : > { %v2042_v43 = vadd.f32 %v2041_v16, %v1998_v63  ;;  %v5328_v16 = vld [vmem:[#allocation37_spill] sm:$0xff] }
 0x23a   : > { %v4680_v8 = vadd.f32 %v2042_v43, %v5323_v2 }
 0x23c   : > { %v2157_v56 = vmul.f32 %v4680_v8, %v4680_v8 }
 0x23d   : > { %v1953_v21 = vpop.f32.mrf.mxu3 }
 0x23e   : > { %v1954_v35 = vadd.f32 %v1953_v21, %v1910_v6 }
 0x23f   : > { %v2043_v32 = vpop.f32.mrf.mxu1  ;;  %v2002_v55 = vpop.f32.mrf.mxu0 }
 0x240   : > { %v4684_v52 = vadd.f32 %v1954_v35, %v5324_v24  ;;  %v2044_v57 = vadd.f32 %v2043_v32, %v2000_v59  ;;  %v2003_v51 = vadd.f32 %v2002_v55, %v4511_v12 }
 0x242   : > { %v2108_v11 = vadd.f32 %v4680_v8, %v4684_v52  ;;  %v2156_v53 = vmul.f32 %v4684_v52, %v4684_v52  ;;  %v4694_v7 = vadd.f32 %v2044_v57, %v5325_v1 }
 0x244   : > { %2109 = vadd.xlane.f32.xlu2 %v2108_v11  ;;  %v2192_v34 = vadd.f32 %v2157_v56, %v2156_v53  ;;  %v2159_v29 = vmul.f32 %v4694_v7, %v4694_v7  ;;  %v5329_v11 = vld [vmem:[#allocation50_spill] sm:$0xff] }
 0x245   : > { %v1955_v4 = vpop.f32.mrf.mxu3  ;;  %v1914_v36 = vpop.f32.mrf.mxu2 }
 0x246   : > { %v1956_v38 = vadd.f32 %v1955_v4, %v1912_v42  ;;  %2193 = vadd.xlane.f32.xlu1 %v2192_v34  ;;  %v1915_v48 = vadd.f32 %v1914_v36, %v4524_v9 }
 0x247   : > { %v2004_v25 = vpop.f32.mrf.mxu0 }
 0x248   : > { %v4697_v49 = vadd.f32 %v1956_v38, %v5326_v61  ;;  %v2005_v6 = vadd.f32 %v2004_v25, %v4511_v12 }
 0x24a   : > { %v2111_v19 = vadd.f32 %v4694_v7, %v4697_v49  ;;  %v2158_v20 = vmul.f32 %v4697_v49, %v4697_v49 }
 0x24c   : > { %2112 = vadd.xlane.f32.xlu0 %v2111_v19  ;;  %v2195_v62 = vadd.f32 %v2159_v29, %v2158_v20 }
 0x24d   : > { %v1916_v63 = vpop.f32.mrf.mxu2 }
 0x24e   : > { %2196 = vadd.xlane.f32.xlu2 %v2195_v62  ;;  %v1917_v0 = vadd.f32 %v1916_v63, %v4524_v9 }
 0x24f   : > { %v2046_v5 = vpop.f32.mrf.mxu1 }
 0x250   : > { %v2047_v58 = vadd.f32 %v2046_v5, %v2003_v51 }
 0x252   : > { %v4708_v10 = vadd.f32 %v2047_v58, %v5327_v60  ;;  %v2086_v1 = vpop.xlane.xlu0 %2085 }
 0x253   : > { %v4729_v61 = vmul.f32 0.00390625, %v2086_v1 }
 0x254   : > { %v2161_v35 = vmul.f32 %v4708_v10, %v4708_v10 }
 0x255   : > { %v1958_v14 = vpop.f32.mrf.mxu3  ;;  %v2170_v38 = vpop.xlane.xlu2 %2169 }
 0x256   : > { %v1959_v54 = vadd.f32 %v1958_v14, %v1915_v48  ;;  %v2210_v20 = vmul.f32 0.00390625, %v2170_v38 }
 0x257   : > { %v2048_v59 = vpop.f32.mrf.mxu1 }
 0x258   : > { %v4711_v43 = vadd.f32 %v1959_v54, %v5328_v16  ;;  %v2049_v33 = vadd.f32 %v2048_v59, %v2005_v6 }
 0x25a   : > { %v2114_v21 = vadd.f32 %v4708_v10, %v4711_v43  ;;  %v2160_v2 = vmul.f32 %v4711_v43, %v4711_v43  ;;  %v4722_v57 = vadd.f32 %v2049_v33, %v5284_v50  ;;  %v2224_v50 = vmul.f32 %v4729_v61, %v4729_v61  ;;  %v2089_v48 = vpop.xlane.xlu0 %2088 }
 0x25c   : > { %2115 = vadd.xlane.f32.xlu1 %v2114_v21  ;;  %v2198_v24 = vadd.f32 %v2161_v35, %v2160_v2  ;;  %v2238_v55 = vsub.f32 %v2210_v20, %v2224_v50  ;;  %v4743_v2 = vmul.f32 0.00390625, %v2089_v48  ;;  %v2663_v48 = vld [vmem:[%s5018_s3 + $0x2] ss:$4 sm:$0x3] }
 0x25d   : > { %v1960_v32 = vpop.f32.mrf.mxu3 }
 0x25e   : > { %v1961_v42 = vadd.f32 %v1960_v32, %v1917_v0  ;;  %2199 = vadd.xlane.f32.xlu0 %v2198_v24  ;;  %v2007_v34 = vpop.f32.mrf.mxu0  ;;  %v2280_v5 = vadd.f32 1e-05, %v2238_v55 }
 0x25f   : > { %v2008_v19 = vadd.f32 %v2007_v34, %v4511_v12 }
 0x260   : > { %v4725_v53 = vadd.f32 %v1961_v42, %v5329_v11  ;;  %3049 = vrsqrt.f32 %v2280_v5  ;;  %v2225_v11 = vmul.f32 %v4743_v2, %v4743_v2  ;;  %vm2300_vm2 = vweird.f32 %v2280_v5 }
 0x262   : > { %v2117_v56 = vadd.f32 %v4722_v57, %v4725_v53 }
 0x263   : > { %v2173_v32 = vpop.xlane.xlu0 %2172 }
 0x264   : > { %2118 = vadd.xlane.f32.xlu2 %v2117_v56  ;;  %v1919_v4 = vpop.f32.mrf.mxu2  ;;  %v2092_v58 = vpop.xlane.xlu1 %2091  ;;  %v2211_v56 = vmul.f32 0.00390625, %v2173_v32 }
 0x265   : > { %v1920_v36 = vadd.f32 %v1919_v4, %v4524_v9  ;;  %v4751_v59 = vmul.f32 0.00390625, %v2092_v58 }
 0x266   : > { %v2009_v51 = vpop.f32.mrf.mxu0  ;;  %v3050_v33 = vpop.eup %3049 }
 0x267   : > { %v2010_v25 = vadd.f32 %v2009_v51, %v4511_v12  ;;  %v2295_v24 = vmul.f32 %v3050_v33, %v2280_v5  ;;  %v2226_v38 = vmul.f32 %v4751_v59, %v4751_v59  ;;  %vm2301_vm1 = vweird.f32 %v3050_v33 }
 0x268   : > { %vm2302_vm3 = vmor %vm2300_vm2, %vm2301_vm1  ;;  %v2162_v5 = vmul.f32 %v4725_v53, %v4725_v53 }
 0x269   : > { %v2296_v1 = vmul.f32 %v3050_v33, %v2295_v24 }
 0x26c   : > { %v2051_v29 = vpop.f32.mrf.mxu1  ;;  %v1921_v63 = vpop.f32.mrf.mxu2 }
 0x26d   : > { %v2052_v62 = vadd.f32 %v2051_v29, %v2008_v19  ;;  %v1922_v21 = vadd.f32 %v1921_v63, %v4524_v9  ;;  %v2176_v34 = vpop.xlane.xlu1 %2175  ;;  %v2239_v29 = vsub.f32 %v2211_v56, %v2225_v11 }
 0x26e   : > { %v2212_v19 = vmul.f32 0.00390625, %v2176_v34  ;;  %v2179_v20 = vpop.xlane.xlu2 %2178 }
 0x26f   : > { %v4737_v60 = vadd.f32 %v2052_v62, %v5309_v27 }
 0x270   : > { %v2240_v55 = vsub.f32 %v2212_v19, %v2226_v38 }
 0x271   : > { %v2165_v27 = vmul.f32 %v4737_v60, %v4737_v60 }
 0x272   : > { %v1963_v14 = vpop.f32.mrf.mxu3 }
 0x273   : > { %v1964_v54 = vadd.f32 %v1963_v14, %v1920_v36  ;;  %v4765_v36 = vadd.f32 1e-05, %v2239_v29  ;;  %v4774_v14 = vadd.f32 1e-05, %v2240_v55 }
 0x274   : > { %v2053_v6 = vpop.f32.mrf.mxu1 }
 0x275   : > { %v4740_v16 = vadd.f32 %v1964_v54, %v5292_v41  ;;  %v2054_v0 = vadd.f32 %v2053_v6, %v2010_v25  ;;  %3051 = vrsqrt.f32 %v4765_v36  ;;  %v2664_v54 = vld [vmem:[%s5018_s3 + $0x3] ss:$4 sm:$0x3]  ;;  %v2252_v6 = vsub.f32 %v4557_v37, %v4729_v61 }
 0x276   : > { %3053 = vrsqrt.f32 %v4774_v14  ;;  %v4794_v24 = vperm.slane %v2664_v54, 0  ;;  %v4796_v37 = vperm.slane %v2664_v54, 1  ;;  %vm2310_vm6 = vweird.f32 %v4765_v36 }
 0x277   : > { %v2120_v35 = vadd.f32 %v4737_v60, %v4740_v16  ;;  %v2164_v12 = vmul.f32 %v4740_v16, %v4740_v16  ;;  %v4754_v9 = vadd.f32 %v2054_v0, %v5310_v22  ;;  %v2297_v22 = vmul.f32 0.5, %v2296_v1 }
 0x278   : > { %v2253_v0 = vsub.f32 %v4552_v28, %v4729_v61  ;;  %v2163_v61 = vmul.f32 %v4722_v57, %v4722_v57  ;;  %vm2320_vm8 = vweird.f32 %v4774_v14 }
 0x279   : > { %2121 = vadd.xlane.f32.xlu0 %v2120_v35  ;;  %v2204_v41 = vadd.f32 %v2165_v27, %v2164_v12  ;;  %v2167_v62 = vmul.f32 %v4754_v9, %v4754_v9  ;;  %v4787_v35 = vperm.slane %v2663_v48, 1  ;;  %v2095_v12 = vpop.xlane.xlu1 %2094 }
 0x27a   : > { %v1965_v42 = vpop.f32.mrf.mxu3  ;;  %v2201_v19 = vadd.f32 %v2163_v61, %v2162_v5 }
 0x27b   : > { %v1966_v4 = vadd.f32 %v1965_v42, %v1922_v21  ;;  %2205 = vadd.xlane.f32.xlu2 %v2204_v41  ;;  %v4785_v21 = vperm.slane %v2663_v48, 0  ;;  %v4792_v41 = vmul.f32 0.00390625, %v2095_v12  ;;  %v2213_v42 = vmul.f32 0.00390625, %v2179_v20  ;;  %v2098_v56 = vpop.xlane.xlu2 %2097  ;;  %v3052_v34 = vpop.eup %3051 }
 0x27c   : > { %v4806_v1 = vmul.f32 0.00390625, %v2098_v56  ;;  %v3054_v38 = vpop.eup %3053  ;;  %v2305_v29 = vmul.f32 %v3052_v34, %v4765_v36  ;;  %vm2311_vm4 = vweird.f32 %v3052_v34  ;;  %v2255_v56 = vsub.f32 %v4580_v45, %v4743_v2 }
 0x27d   : > { %v4761_v50 = vadd.f32 %v1966_v4, %v5296_v3  ;;  %v2298_v3 = vsub.f32 1.5, %v2297_v22  ;;  %v2227_v11 = vmul.f32 %v4792_v41, %v4792_v41  ;;  %v2182_v55 = vpop.xlane.xlu0 %2181  ;;  %vm2321_vm5 = vweird.f32 %v3054_v38  ;;  %vm2312_vm7 = vmor %vm2310_vm6, %vm2311_vm4 }
 0x27e   : > { %v2228_v54 = vmul.f32 %v4806_v1, %v4806_v1  ;;  %vm2322_vm9 = vmor %vm2320_vm8, %vm2321_vm5 }
 0x27f   : > { %v2123_v51 = vadd.f32 %v4754_v9, %v4761_v50  ;;  %v2166_v58 = vmul.f32 %v4761_v50, %v4761_v50  ;;  %v2299_v63 = vmul.f32 %v3050_v33, %v2298_v3  ;;  %v2241_v22 = vsub.f32 %v2213_v42, %v2227_v11 }
 0x280   : > { %v2254_v11 = vsub.f32 %v4576_v17, %v4743_v2  ;;  %v2257_v17 = vsub.f32 %v4596_v30, %v4751_v59 }
 0x281   : > { %2124 = vadd.xlane.f32.xlu1 %v2123_v51  ;;  %v2207_v25 = vadd.f32 %v2167_v62, %v2166_v58  ;;  %v2303_v27 = vsel %vm2302_vm3, %v3050_v33, %v2299_v63  ;;  %v2315_v51 = vmul.f32 %v3054_v38, %v4774_v14  ;;  %v2306_v58 = vmul.f32 %v3052_v34, %v2305_v29 }
 0x282   : > { %v2434_v32 = vmul.f32 %v2303_v27, %v2252_v6  ;;  %v2435_v28 = vmul.f32 %v2303_v27, %v2253_v0  ;;  %v4812_v48 = vadd.f32 1e-05, %v2241_v22  ;;  %v2214_v63 = vmul.f32 0.00390625, %v2182_v55 }
 0x283   : > { %2208 = vadd.xlane.f32.xlu0 %v2207_v25  ;;  %v2316_v25 = vmul.f32 %v3054_v38, %v2315_v51  ;;  %v2307_v6 = vmul.f32 0.5, %v2306_v58  ;;  %v2101_v27 = vpop.xlane.xlu2 %2100  ;;  %v2256_v22 = vsub.f32 %v4599_v31, %v4751_v59 }
 0x284   : > { %v2467_v33 = vmul.f32 %v4785_v21, %v2434_v32  ;;  %v2468_v4 = vmul.f32 %v4787_v35, %v2435_v28  ;;  %3055 = vrsqrt.f32 %v4812_v48  ;;  %v2242_v12 = vsub.f32 %v2214_v63, %v2228_v54 }
 0x285   : > { %v2317_v0 = vmul.f32 0.5, %v2316_v25  ;;  %v2308_v5 = vsub.f32 1.5, %v2307_v6  ;;  %v2185_v61 = vpop.xlane.xlu1 %2184  ;;  %v4822_v42 = vmul.f32 0.00390625, %v2101_v27  ;;  %vm2330_vm11 = vweird.f32 %v4812_v48 }
 0x286   : > { %v2500_v62 = vadd.f32 %v4794_v24, %v2467_v33  ;;  %v2501_v20 = vadd.f32 %v4796_v37, %v2468_v4  ;;  %v4820_v28 = vadd.f32 1e-05, %v2242_v12  ;;  %v2215_v2 = vmul.f32 0.00390625, %v2185_v61 }
 0x287   : > { %v2318_v32 = vsub.f32 1.5, %v2317_v0  ;;  %v2309_v33 = vmul.f32 %v3052_v34, %v2308_v5 }
 0x288   : > { %v2528_v3 = vpack.c.bf16 %v2501_v20, %v2500_v62  ;;  %3057 = vrsqrt.f32 %v4820_v28  ;;  %vm2340_vm14 = vweird.f32 %v4820_v28 }
 0x289   : > { %2202 = vadd.xlane.f32.xlu1 %v2201_v19  ;;  %v2319_v4 = vmul.f32 %v3054_v38, %v2318_v32  ;;  %v2229_v19 = vmul.f32 %v4822_v42, %v4822_v42  ;;  %v2313_v45 = vsel %vm2312_vm7, %v3052_v34, %v2309_v33 }
 0x28a   : > { %2542 = vst [vmem:[%s4817_s7] sm:$0xff] %v2528_v3  ;;  %v3056_v29 = vpop.eup %3055  ;;  %v2436_v36 = vmul.f32 %v2313_v45, %v2254_v11  ;;  %v2437_v55 = vmul.f32 %v2313_v45, %v2255_v56 }
 0x28b   : > { %v2323_v62 = vsel %vm2322_vm9, %v3054_v38, %v2319_v4  ;;  %v2325_v14 = vmul.f32 %v3056_v29, %v4812_v48  ;;  %v2243_v58 = vsub.f32 %v2215_v2, %v2229_v19  ;;  %vm2331_vm10 = vweird.f32 %v3056_v29 }
 0x28c   : > { %v2438_v20 = vmul.f32 %v2323_v62, %v2256_v22  ;;  %v2439_v51 = vmul.f32 %v2323_v62, %v2257_v17  ;;  %v2469_v3 = vmul.f32 %v4785_v21, %v2436_v36  ;;  %v2470_v25 = vmul.f32 %v4787_v35, %v2437_v55  ;;  %vm2332_vm12 = vmor %vm2330_vm11, %vm2331_vm10 }
 0x28d   : > { %v2326_v31 = vmul.f32 %v3056_v29, %v2325_v14  ;;  %v4843_v59 = vadd.f32 1e-05, %v2243_v58  ;;  %v2258_v19 = vsub.f32 %v4610_v47, %v4792_v41  ;;  %v2259_v22 = vsub.f32 %v4605_v39, %v4792_v41 }
 0x28e   : > { %v2471_v54 = vmul.f32 %v4785_v21, %v2438_v20  ;;  %v2472_v30 = vmul.f32 %v4787_v35, %v2439_v51  ;;  %v3058_v34 = vpop.eup %3057  ;;  %v2502_v38 = vadd.f32 %v4794_v24, %v2469_v3  ;;  %v2503_v63 = vadd.f32 %v4796_v37, %v2470_v25 }
 0x28f   : > { %v2327_v6 = vmul.f32 0.5, %v2326_v31  ;;  %v2335_v5 = vmul.f32 %v3058_v34, %v4820_v28  ;;  %3059 = vrsqrt.f32 %v4843_v59  ;;  %vm2341_vm13 = vweird.f32 %v3058_v34 }
 0x290   : > { %v2504_v0 = vadd.f32 %v4794_v24, %v2471_v54  ;;  %v2505_v12 = vadd.f32 %v4796_v37, %v2472_v30  ;;  %v2529_v27 = vpack.c.bf16 %v2503_v63, %v2502_v38  ;;  %v2261_v58 = vsub.f32 %v4623_v40, %v4806_v1  ;;  %vm2342_vm15 = vmor %vm2340_vm14, %vm2341_vm13 }
 0x291   : > { %v2328_v32 = vsub.f32 1.5, %v2327_v6  ;;  %v2336_v11 = vmul.f32 %v3058_v34, %v2335_v5  ;;  %vm2350_vm1 = vweird.f32 %v4843_v59 }
 0x292   : > { %v2530_v61 = vpack.c.bf16 %v2505_v12, %v2504_v0  ;;  %2543 = vst [vmem:[%s4817_s7 + $0x8] sm:$0xff] %v2529_v27 }
 0x293   : > { %v2329_v33 = vmul.f32 %v3056_v29, %v2328_v32  ;;  %v2337_v17 = vmul.f32 0.5, %v2336_v11 }
 0x294   : > { %2544 = vst [vmem:[%s4817_s7 + $0x10] sm:$0xff] %v2530_v61 }
 0x295   : > { %v2333_v2 = vsel %vm2332_vm12, %v3056_v29, %v2329_v33  ;;  %v2338_v14 = vsub.f32 1.5, %v2337_v17  ;;  %v3060_v20 = vpop.eup %3059  ;;  %v2260_v29 = vsub.f32 %v4627_v26, %v4806_v1 }
 0x296   : > { %v2440_v55 = vmul.f32 %v2333_v2, %v2258_v19  ;;  %v2441_v62 = vmul.f32 %v2333_v2, %v2259_v22  ;;  %v2345_v41 = vmul.f32 %v3060_v20, %v4843_v59  ;;  %vm2351_vm0 = vweird.f32 %v3060_v20 }
 0x297   : > { %v2339_v39 = vmul.f32 %v3058_v34, %v2338_v14  ;;  %v2262_v19 = vsub.f32 %v4641_v44, %v4822_v42  ;;  %v2263_v22 = vsub.f32 %v4638_v23, %v4822_v42  ;;  %vm2352_vm2 = vmor %vm2350_vm1, %vm2351_vm0 }
 0x298   : > { %v2104_v56 = vpop.xlane.xlu0 %2103  ;;  %v2473_v47 = vmul.f32 %v4785_v21, %v2440_v55  ;;  %v2474_v51 = vmul.f32 %v4787_v35, %v2441_v62  ;;  %v2346_v54 = vmul.f32 %v3060_v20, %v2345_v41 }
 0x299   : > { %v4853_v4 = vmul.f32 0.00390625, %v2104_v56  ;;  %v2343_v31 = vsel %vm2342_vm15, %v3058_v34, %v2339_v39 }
 0x29a   : > { %v2188_v45 = vpop.xlane.xlu2 %2187  ;;  %v2506_v25 = vadd.f32 %v4794_v24, %v2473_v47  ;;  %v2507_v28 = vadd.f32 %v4796_v37, %v2474_v51  ;;  %v2442_v38 = vmul.f32 %v2343_v31, %v2260_v29  ;;  %v2443_v63 = vmul.f32 %v2343_v31, %v2261_v58 }
 0x29b   : > { %v2216_v36 = vmul.f32 0.00390625, %v2188_v45  ;;  %v2230_v48 = vmul.f32 %v4853_v4, %v4853_v4  ;;  %v2347_v26 = vmul.f32 0.5, %v2346_v54  ;;  %v2264_v58 = vsub.f32 %v4656_v18, %v4853_v4 }
 0x29c   : > { %v2531_v12 = vpack.c.bf16 %v2507_v28, %v2506_v25  ;;  %v2475_v40 = vmul.f32 %v4785_v21, %v2442_v38  ;;  %v2476_v1 = vmul.f32 %v4787_v35, %v2443_v63 }
 0x29d   : > { %v2244_v3 = vsub.f32 %v2216_v36, %v2230_v48  ;;  %v2348_v27 = vsub.f32 1.5, %v2347_v26 }
 0x29e   : > { %2545 = vst [vmem:[%s4817_s7 + $0x18] sm:$0xff] %v2531_v12  ;;  %v2508_v32 = vadd.f32 %v4794_v24, %v2475_v40  ;;  %v2509_v61 = vadd.f32 %v4796_v37, %v2476_v1 }
 0x29f   : > { %v2286_v6 = vadd.f32 1e-05, %v2244_v3  ;;  %v2349_v56 = vmul.f32 %v3060_v20, %v2348_v27  ;;  %v2265_v3 = vsub.f32 %v4652_v15, %v4853_v4 }
 0x2a0   : > { %v2107_v30 = vpop.xlane.xlu1 %2106  ;;  %v2532_v33 = vpack.c.bf16 %v2509_v61, %v2508_v32 }
 0x2a1   : > { %v4872_v0 = vmul.f32 0.00390625, %v2107_v30  ;;  %3061 = vrsqrt.f32 %v2286_v6  ;;  %v2353_v45 = vsel %vm2352_vm2, %v3060_v20, %v2349_v56  ;;  %vm2360_vm4 = vweird.f32 %v2286_v6 }
 0x2a2   : > { %v2191_v5 = vpop.xlane.xlu0 %2190  ;;  %2546 = vst [vmem:[%s4817_s7 + $0x20] sm:$0xff] %v2532_v33  ;;  %v2444_v36 = vmul.f32 %v2353_v45, %v2262_v19  ;;  %v2445_v55 = vmul.f32 %v2353_v45, %v2263_v22 }
 0x2a3   : > { %v2231_v34 = vmul.f32 %v4872_v0, %v4872_v0  ;;  %v2217_v11 = vmul.f32 0.00390625, %v2191_v5  ;;  %v2267_v32 = vsub.f32 %v4666_v46, %v4872_v0 }
 0x2a4   : > { %v2477_v48 = vmul.f32 %v4785_v21, %v2444_v36  ;;  %v2478_v59 = vmul.f32 %v4787_v35, %v2445_v55 }
 0x2a5   : > { %v2245_v17 = vsub.f32 %v2217_v11, %v2231_v34  ;;  %v2266_v34 = vsub.f32 %v4669_v13, %v4872_v0 }
 0x2a6   : > { %v2510_v44 = vadd.f32 %v4794_v24, %v2477_v48  ;;  %v2511_v23 = vadd.f32 %v4796_v37, %v2478_v59 }
 0x2a7   : > { %v3062_v2 = vpop.eup %3061  ;;  %v2287_v62 = vadd.f32 1e-05, %v2245_v17 }
 0x2a8   : > { %v2355_v14 = vmul.f32 %v3062_v2, %v2286_v6  ;;  %v2533_v51 = vpack.c.bf16 %v2511_v23, %v2510_v44  ;;  %vm2361_vm3 = vweird.f32 %v3062_v2 }
 0x2a9   : > { %3063 = vrsqrt.f32 %v2287_v62  ;;  %vm2362_vm5 = vmor %vm2360_vm4, %vm2361_vm3  ;;  %vm2370_vm7 = vweird.f32 %v2287_v62 }
 0x2aa   : > { %v2356_v47 = vmul.f32 %v3062_v2, %v2355_v14  ;;  %2547 = vst [vmem:[%s4817_s7 + $0x28] sm:$0xff] %v2533_v51 }
 0x2ac   : > { %v2357_v42 = vmul.f32 0.5, %v2356_v47 }
 0x2ae   : > { %v2358_v20 = vsub.f32 1.5, %v2357_v42 }
 0x2af   : > { %v3064_v39 = vpop.eup %3063 }
 0x2b0   : > { %v2359_v41 = vmul.f32 %v3062_v2, %v2358_v20  ;;  %v2365_v29 = vmul.f32 %v3064_v39, %v2287_v62  ;;  %vm2371_vm6 = vweird.f32 %v3064_v39 }
 0x2b1   : > { %vm2372_vm8 = vmor %vm2370_vm7, %vm2371_vm6 }
 0x2b2   : > { %v2363_v25 = vsel %vm2362_vm5, %v3062_v2, %v2359_v41  ;;  %v2366_v28 = vmul.f32 %v3064_v39, %v2365_v29 }
 0x2b3   : > { %v2446_v31 = vmul.f32 %v2363_v25, %v2264_v58  ;;  %v2447_v54 = vmul.f32 %v2363_v25, %v2265_v3 }
 0x2b4   : > { %v2367_v30 = vmul.f32 0.5, %v2366_v28 }
 0x2b5   : > { %v2479_v63 = vmul.f32 %v4785_v21, %v2446_v31  ;;  %v2480_v12 = vmul.f32 %v4787_v35, %v2447_v54 }
 0x2b6   : > { %v2368_v6 = vsub.f32 1.5, %v2367_v30 }
 0x2b7   : > { %v2110_v38 = vpop.xlane.xlu2 %2109  ;;  %v2512_v18 = vadd.f32 %v4794_v24, %v2479_v63  ;;  %v2513_v15 = vadd.f32 %v4796_v37, %v2480_v12 }
 0x2b8   : > { %v2134_v26 = vmul.f32 0.00390625, %v2110_v38  ;;  %v2369_v4 = vmul.f32 %v3064_v39, %v2368_v6 }
 0x2b9   : > { %v2194_v5 = vpop.xlane.xlu1 %2193  ;;  %v2534_v27 = vpack.c.bf16 %v2513_v15, %v2512_v18 }
 0x2ba   : > { %v2218_v40 = vmul.f32 0.00390625, %v2194_v5  ;;  %v2232_v1 = vmul.f32 %v2134_v26, %v2134_v26  ;;  %v2373_v61 = vsel %vm2372_vm8, %v3064_v39, %v2369_v4  ;;  %v2268_v58 = vsub.f32 %v4684_v52, %v2134_v26 }
 0x2bb   : > { %2548 = vst [vmem:[%s4817_s7 + $0x30] sm:$0xff] %v2534_v27  ;;  %v2448_v56 = vmul.f32 %v2373_v61, %v2266_v34  ;;  %v2449_v33 = vmul.f32 %v2373_v61, %v2267_v32  ;;  %v2269_v3 = vsub.f32 %v4680_v8, %v2134_v26 }
 0x2bc   : > { %v2246_v11 = vsub.f32 %v2218_v40, %v2232_v1 }
 0x2bd   : > { %v2481_v17 = vmul.f32 %v4785_v21, %v2448_v56  ;;  %v2482_v45 = vmul.f32 %v4787_v35, %v2449_v33 }
 0x2be   : > { %v2288_v19 = vadd.f32 1e-05, %v2246_v11 }
 0x2bf   : > { %v2113_v22 = vpop.xlane.xlu0 %2112  ;;  %v2514_v13 = vadd.f32 %v4794_v24, %v2481_v17  ;;  %v2515_v46 = vadd.f32 %v4796_v37, %v2482_v45 }
 0x2c0   : > { %v2135_v2 = vmul.f32 0.00390625, %v2113_v22  ;;  %3065 = vrsqrt.f32 %v2288_v19  ;;  %vm2380_vm10 = vweird.f32 %v2288_v19 }
 0x2c1   : > { %v2197_v36 = vpop.xlane.xlu2 %2196  ;;  %v2535_v62 = vpack.c.bf16 %v2515_v46, %v2514_v13 }
 0x2c2   : > { %v2219_v0 = vmul.f32 0.00390625, %v2197_v36  ;;  %v2233_v55 = vmul.f32 %v2135_v2, %v2135_v2  ;;  %v2270_v1 = vsub.f32 %v4697_v49, %v2135_v2  ;;  %v2271_v27 = vsub.f32 %v4694_v7, %v2135_v2 }
 0x2c3   : > { %2549 = vst [vmem:[%s4817_s7 + $0x38] sm:$0xff] %v2535_v62 }
 0x2c4   : > { %v2247_v14 = vsub.f32 %v2219_v0, %v2233_v55 }
 0x2c6   : > { %v3066_v48 = vpop.eup %3065  ;;  %v2289_v59 = vadd.f32 1e-05, %v2247_v14 }
 0x2c7   : > { %v2375_v47 = vmul.f32 %v3066_v48, %v2288_v19  ;;  %vm2381_vm9 = vweird.f32 %v3066_v48 }
 0x2c8   : > { %3067 = vrsqrt.f32 %v2289_v59  ;;  %vm2382_vm11 = vmor %vm2380_vm10, %vm2381_vm9  ;;  %vm2390_vm13 = vweird.f32 %v2289_v59 }
 0x2c9   : > { %v2376_v44 = vmul.f32 %v3066_v48, %v2375_v47 }
 0x2cb   : > { %v2377_v23 = vmul.f32 0.5, %v2376_v44 }
 0x2cd   : > { %v2378_v42 = vsub.f32 1.5, %v2377_v23 }
 0x2ce   : > { %v3068_v51 = vpop.eup %3067 }
 0x2cf   : > { %v2116_v20 = vpop.xlane.xlu1 %2115  ;;  %v2379_v39 = vmul.f32 %v3066_v48, %v2378_v42  ;;  %v2385_v41 = vmul.f32 %v3068_v51, %v2289_v59  ;;  %vm2391_vm12 = vweird.f32 %v3068_v51 }
 0x2d0   : > { %v2136_v29 = vmul.f32 0.00390625, %v2116_v20  ;;  %vm2392_vm14 = vmor %vm2390_vm13, %vm2391_vm12 }
 0x2d1   : > { %v2200_v25 = vpop.xlane.xlu0 %2199  ;;  %v2383_v28 = vsel %vm2382_vm11, %v3066_v48, %v2379_v39  ;;  %v2386_v31 = vmul.f32 %v3068_v51, %v2385_v41 }
 0x2d2   : > { %v2450_v54 = vmul.f32 %v2383_v28, %v2268_v58  ;;  %v2451_v30 = vmul.f32 %v2383_v28, %v2269_v3  ;;  %v2234_v38 = vmul.f32 %v2136_v29, %v2136_v29  ;;  %v2220_v63 = vmul.f32 0.00390625, %v2200_v25 }
 0x2d3   : > { %v2387_v12 = vmul.f32 0.5, %v2386_v31  ;;  %v2272_v46 = vsub.f32 %v4711_v43, %v2136_v29  ;;  %v2273_v0 = vsub.f32 %v4708_v10, %v2136_v29 }
 0x2d4   : > { %v2483_v6 = vmul.f32 %v4785_v21, %v2450_v54  ;;  %v2484_v5 = vmul.f32 %v4787_v35, %v2451_v30  ;;  %v2248_v18 = vsub.f32 %v2220_v63, %v2234_v38 }
 0x2d5   : > { %v2388_v15 = vsub.f32 1.5, %v2387_v12 }
 0x2d6   : > { %v2516_v52 = vadd.f32 %v4794_v24, %v2483_v6  ;;  %v2517_v8 = vadd.f32 %v4796_v37, %v2484_v5  ;;  %v2290_v26 = vadd.f32 1e-05, %v2248_v18 }
 0x2d7   : > { %v2389_v4 = vmul.f32 %v3068_v51, %v2388_v15  ;;  %v2119_v36 = vpop.xlane.xlu2 %2118 }
 0x2d8   : > { %v2536_v40 = vpack.c.bf16 %v2517_v8, %v2516_v52  ;;  %3069 = vrsqrt.f32 %v2290_v26  ;;  %vm2400_vm0 = vweird.f32 %v2290_v26  ;;  %v2137_v54 = vmul.f32 0.00390625, %v2119_v36 }
 0x2d9   : > { %v2393_v34 = vsel %vm2392_vm14, %v3068_v51, %v2389_v4 }
 0x2da   : > { %2550 = vst [vmem:[%s4817_s7 + $0x40] sm:$0xff] %v2536_v40  ;;  %v2452_v32 = vmul.f32 %v2393_v34, %v2270_v1  ;;  %v2453_v61 = vmul.f32 %v2393_v34, %v2271_v27  ;;  %v2235_v5 = vmul.f32 %v2137_v54, %v2137_v54 }
 0x2dc   : > { %v2485_v11 = vmul.f32 %v4785_v21, %v2452_v32  ;;  %v2486_v56 = vmul.f32 %v4787_v35, %v2453_v61 }
 0x2de   : > { %v3070_v33 = vpop.eup %3069  ;;  %v2518_v19 = vadd.f32 %v4794_v24, %v2485_v11  ;;  %v2519_v22 = vadd.f32 %v4796_v37, %v2486_v56 }
 0x2df   : > { %v2395_v17 = vmul.f32 %v3070_v33, %v2290_v26  ;;  %vm2401_vm15 = vweird.f32 %v3070_v33 }
 0x2e0   : > { %v2537_v49 = vpack.c.bf16 %v2519_v22, %v2518_v19  ;;  %vm2402_vm1 = vmor %vm2400_vm0, %vm2401_vm15 }
 0x2e1   : > { %v2396_v45 = vmul.f32 %v3070_v33, %v2395_v17 }
 0x2e2   : > { %2551 = vst [vmem:[%s4817_s7 + $0x48] sm:$0xff] %v2537_v49 }
 0x2e3   : > { %v2397_v7 = vmul.f32 0.5, %v2396_v45 }
 0x2e5   : > { %v2398_v2 = vsub.f32 1.5, %v2397_v7 }
 0x2e7   : > { %v2399_v13 = vmul.f32 %v3070_v33, %v2398_v2 }
 0x2e9   : > { %v2403_v55 = vsel %vm2402_vm1, %v3070_v33, %v2399_v13 }
 0x2ea   : > { %v2454_v62 = vmul.f32 %v2403_v55, %v2272_v46  ;;  %v2455_v14 = vmul.f32 %v2403_v55, %v2273_v0 }
 0x2ec   : > { %v2122_v48 = vpop.xlane.xlu0 %2121  ;;  %v2487_v59 = vmul.f32 %v4785_v21, %v2454_v62  ;;  %v2488_v47 = vmul.f32 %v4787_v35, %v2455_v14 }
 0x2ed   : > { %v2138_v44 = vmul.f32 0.00390625, %v2122_v48 }
 0x2ee   : > { %v2206_v23 = vpop.xlane.xlu2 %2205  ;;  %v2520_v42 = vadd.f32 %v4794_v24, %v2487_v59  ;;  %v2521_v51 = vadd.f32 %v4796_v37, %v2488_v47 }
 0x2ef   : > { %v2222_v20 = vmul.f32 0.00390625, %v2206_v23  ;;  %v2236_v43 = vmul.f32 %v2138_v44, %v2138_v44  ;;  %v2276_v27 = vsub.f32 %v4740_v16, %v2138_v44  ;;  %v2277_v34 = vsub.f32 %v4737_v60, %v2138_v44 }
 0x2f0   : > { %v2538_v39 = vpack.c.bf16 %v2521_v51, %v2520_v42  ;;  %v2274_v23 = vsub.f32 %v4725_v53, %v2137_v54  ;;  %v2275_v42 = vsub.f32 %v4722_v57, %v2137_v54 }
 0x2f1   : > { %v2250_v10 = vsub.f32 %v2222_v20, %v2236_v43 }
 0x2f2   : > { %2552 = vst [vmem:[%s4817_s7 + $0x50] sm:$0xff] %v2538_v39 }
 0x2f3   : > { %v2292_v41 = vadd.f32 1e-05, %v2250_v10 }
 0x2f4   : > { %v2125_v29 = vpop.xlane.xlu1 %2124 }
 0x2f5   : > { %v2139_v58 = vmul.f32 0.00390625, %v2125_v29  ;;  %3071 = vrsqrt.f32 %v2292_v41  ;;  %vm2420_vm3 = vweird.f32 %v2292_v41 }
 0x2f6   : > { %v2209_v3 = vpop.xlane.xlu0 %2208 }
 0x2f7   : > { %v2237_v25 = vmul.f32 %v2139_v58, %v2139_v58  ;;  %v2223_v28 = vmul.f32 0.00390625, %v2209_v3  ;;  %v2278_v2 = vsub.f32 %v4761_v50, %v2139_v58  ;;  %v2279_v36 = vsub.f32 %v4754_v9, %v2139_v58 }
 0x2f9   : > { %v2251_v31 = vsub.f32 %v2223_v28, %v2237_v25 }
 0x2fb   : > { %v2293_v30 = vadd.f32 1e-05, %v2251_v31  ;;  %v3072_v38 = vpop.eup %3071 }
 0x2fc   : > { %v2203_v63 = vpop.xlane.xlu1 %2202  ;;  %v2415_v12 = vmul.f32 %v3072_v38, %v2292_v41  ;;  %vm2421_vm2 = vweird.f32 %v3072_v38 }
 0x2fd   : > { %3073 = vrsqrt.f32 %v2293_v30  ;;  %v2221_v6 = vmul.f32 0.00390625, %v2203_v63  ;;  %vm2422_vm4 = vmor %vm2420_vm3, %vm2421_vm2  ;;  %vm2430_vm6 = vweird.f32 %v2293_v30 }
 0x2fe   : > { %v2416_v18 = vmul.f32 %v3072_v38, %v2415_v12 }
 0x2ff   : > { %v2249_v15 = vsub.f32 %v2221_v6, %v2235_v5 }
 0x300   : > { %v2417_v52 = vmul.f32 0.5, %v2416_v18 }
 0x301   : > { %v2291_v8 = vadd.f32 1e-05, %v2249_v15 }
 0x302   : > { %v2418_v4 = vsub.f32 1.5, %v2417_v52 }
 0x303   : > { %v3074_v26 = vpop.eup %3073  ;;  %3075 = vrsqrt.f32 %v2291_v8  ;;  %vm2410_vm9 = vweird.f32 %v2291_v8 }
 0x304   : > { %v2425_v40 = vmul.f32 %v3074_v26, %v2293_v30  ;;  %v2419_v1 = vmul.f32 %v3072_v38, %v2418_v4  ;;  %vm2431_vm5 = vweird.f32 %v3074_v26 }
 0x305   : > { %vm2432_vm7 = vmor %vm2430_vm6, %vm2431_vm5 }
 0x306   : > { %v2426_v32 = vmul.f32 %v3074_v26, %v2425_v40  ;;  %v2423_v61 = vsel %vm2422_vm4, %v3072_v38, %v2419_v1 }
 0x307   : > { %v2458_v11 = vmul.f32 %v2423_v61, %v2276_v27  ;;  %v2459_v56 = vmul.f32 %v2423_v61, %v2277_v34 }
 0x308   : > { %v2427_v33 = vmul.f32 0.5, %v2426_v32 }
 0x309   : > { %v3076_v19 = vpop.eup %3075  ;;  %v2491_v22 = vmul.f32 %v4785_v21, %v2458_v11  ;;  %v2492_v17 = vmul.f32 %v4787_v35, %v2459_v56 }
 0x30a   : > { %v2428_v49 = vsub.f32 1.5, %v2427_v33  ;;  %v2405_v45 = vmul.f32 %v3076_v19, %v2291_v8  ;;  %vm2411_vm8 = vweird.f32 %v3076_v19 }
 0x30b   : > { %v2524_v7 = vadd.f32 %v4794_v24, %v2491_v22  ;;  %v2525_v16 = vadd.f32 %v4796_v37, %v2492_v17  ;;  %vm2412_vm10 = vmor %vm2410_vm9, %vm2411_vm8 }
 0x30c   : > { %v2429_v60 = vmul.f32 %v3074_v26, %v2428_v49  ;;  %v2406_v13 = vmul.f32 %v3076_v19, %v2405_v45 }
 0x30d   : > { %v2540_v46 = vpack.c.bf16 %v2525_v16, %v2524_v7 }
 0x30e   : > { %v2433_v0 = vsel %vm2432_vm7, %v3074_v26, %v2429_v60  ;;  %v2407_v14 = vmul.f32 0.5, %v2406_v13 }
 0x30f   : > { %v2460_v55 = vmul.f32 %v2433_v0, %v2278_v2  ;;  %v2461_v62 = vmul.f32 %v2433_v0, %v2279_v36  ;;  %2554 = vst [vmem:[%s4817_s7 + $0x60] sm:$0xff] %v2540_v46 }
 0x310   : > { %v2408_v47 = vsub.f32 1.5, %v2407_v14 }
 0x311   : > { %v2493_v48 = vmul.f32 %v4785_v21, %v2460_v55  ;;  %v2494_v59 = vmul.f32 %v4787_v35, %v2461_v62 }
 0x312   : > { %v2409_v9 = vmul.f32 %v3076_v19, %v2408_v47 }
 0x313   : > { %v2526_v44 = vadd.f32 %v4794_v24, %v2493_v48  ;;  %v2527_v50 = vadd.f32 %v4796_v37, %v2494_v59 }
 0x314   : > { %v2413_v20 = vsel %vm2412_vm10, %v3076_v19, %v2409_v9 }
 0x315   : > { %v2541_v51 = vpack.c.bf16 %v2527_v50, %v2526_v44  ;;  %v2456_v43 = vmul.f32 %v2413_v20, %v2274_v23  ;;  %v2457_v39 = vmul.f32 %v2413_v20, %v2275_v42 }
 0x317   : > { %2555 = vst [vmem:[%s4817_s7 + $0x68] sm:$0xff] %v2541_v51  ;;  %v2489_v10 = vmul.f32 %v4785_v21, %v2456_v43  ;;  %v2490_v41 = vmul.f32 %v4787_v35, %v2457_v39 }
 0x319   : > { %v2522_v29 = vadd.f32 %v4794_v24, %v2489_v10  ;;  %v2523_v58 = vadd.f32 %v4796_v37, %v2490_v41  ;;  %2563 = sbr.rel (!%p3255_p5) target bundleno = 829 (0x33d), region = 44 }
 0x31b   : > { %v2539_v3 = vpack.c.bf16 %v2523_v58, %v2522_v29 }
 0x31d   : > { %2553 = vst [vmem:[%s4817_s7 + $0x58] sm:$0xff] %v2539_v3 }
 0x31e   : > { %s5336_s11 = smov (!%p2566_p0, %s2565_s11), 14 }
 0x31f   : > { %s2931_s12 = sshll.u32 %s5336_s11, 3 }
 0x320   : > { %s2570_s13 = ssub.s32 112, %s2931_s12 }
 0x321   : > { %s2571_s14 = sshll.u32 %s2570_s13, 4 }
 0x322   : > { %2572 = vsyncadd %s4954_s9, %s2571_s14  ;;  %p4963_p1 = scmp.ne.s32.totalorder %s2931_s12, 0  ;;  %s2934_s25 = smul.u32 112, %s3238_s19 }
 0x323   : > { %s2578_s20 = sshll.u32 %s4817_s7, 4  ;;  %s2885_s8 = sshll.u32 %s5336_s11, 7  ;;  %s4973_s20 = int_to_ptr.vmem [resolvable:$true] %s2578_s20 }
 0x324   : > { %s2576_s27 = scalar_lea.hbm %s5019_s4, %s2934_s25  ;;  %s3107_s29 = sshra.s32 %s4973_s20, 4  ;;  %s3108_s29 = int_to_ptr.vmem [resolvable:$true] %s3107_s29 }
 0x325   : > { %s2580_s28 = sshll.u32 %s2576_s27, 4  ;;  %s3109_s30 = sshrl.u32 %s2885_s8, 4  ;;  %s4975_s28 = int_to_ptr.hbm [resolvable:$true] %s2580_s28 }
 0x326   : > { %s3114_s5 = scalar_lea.vmem %s3108_s29, %s3109_s30  ;;  %s3189_s19 = smov [#allocation5]  }
 0x327   : > { %p3115_p2 = scmp.ne.s32.totalorder %s3108_s29, %s3114_s5  ;;  %s3118_s6 = scalar_lea.vmem %s3189_s19, 224 }
 0x328   : > { %p3120_p5 = scmp.lt.s32.totalorder %s3118_s6, %s3114_s5 }
 0x329   : > { %p3116_p3 = pnand %p3115_p2, %p4963_p1 }
 0x32b   : > { %p3117_p4 = pneg %p3116_p3 }
 0x32d   : > { %p3122_p7 = pnand %p3120_p5, %p3117_p4 }
 0x32f   : > { %3125 = shalt.err (!%p3122_p7)
}
 0x330   : > { %s3126_s7 = sshra.s32 %s4975_s28, 4  ;;  %s3137_s25 = scalar_lea.hbm %s5019_s4, 200  ;;  %s3127_s7 = int_to_ptr.hbm [resolvable:$true] %s3126_s7 }
 0x331   : > { %s3133_s12 = scalar_lea.hbm %s3127_s7, %s3109_s30  ;;  %p3138_p11 = scmp.lt.s32.totalorder %s3127_s7, %s5019_s4 }
 0x332   : > { %p3134_p8 = scmp.ne.s32.totalorder %s3127_s7, %s3133_s12  ;;  %p3139_p12 = scmp.lt.s32.totalorder %s3137_s25, %s3133_s12 }
 0x334   : > { %p3135_p9 = pnand %p3134_p8, %p4963_p1  ;;  %p3140_p13 = por %p3139_p12, %p3138_p11 }
 0x336   : > { %p3136_p10 = pneg %p3135_p9 }
 0x338   : > { %p3141_p0 = pnand %p3140_p13, %p3136_p10 }
 0x33a   : > { %3144 = shalt.err (!%p3141_p0)
}
 0x33b   : > { %s3190_s27 = smov 128   ;;  %s3191_s29 = smov 8  }
 0x33c   : > { %2586 = dma.vmem_to_hbm [thread:$0]  (%p4963_p1), %s4973_s20, %s2885_s8, %s4975_s28, %s4954_s9, %s3190_s27, %s3190_s27, %s3191_s29  }
 0x33d PF: > { %p2955_p2 = scmp.ge.s32.totalorder %s3184_s18, 2  ;;  %s2595_s30 = sand.u32 1, %s3172_s15  }
 0x33e   : > { %s2596_s5 = scalar_lea.sflag [#allocation4], %s2595_s30 }
 0x33f   : > { %p2950_p3 = pnand %p2955_p2, %p3259_p6 }
 0x341   : > { %p2951_p4 = pneg %p2950_p3 }
 0x343   : > { %3167 = dma.done.wait (%p2951_p4), %s2596_s5, 1792  }
 0x344   : > { %3169 = vsyncadd (%p2951_p4), %s2596_s5, 4294965504  ;;  %p15_p5 = scmp.ge.s32.totalorder %s3242_s21, 4   ;;  %s5331_s15 = smov %s3176_s16 }
 0x345   : > { %s5332_s16 = smov %s3180_s17  ;;  %s5333_s17 = smov %s3253_s24 }
 0x346   : > { %s5334_s18 = smov %s3242_s21  ;;  %17 = sbr.rel (!%p15_p5) target bundleno = 4 (0x4), region = 79 }
 0x34b   :  { %2602 = vsyncpa [#allocation3], 1 }
 0x34c   :  { %2604 = vsyncpa [#allocation3 + $0x1], 1 }
 0x34d   :  { %2605 = vsyncpa [#allocation4], 1 }
 0x34e   :  { %2607 = vsyncpa [#allocation4 + $0x1], 1 }

</bundles_post_ra>
